<compile_context>
chip_gen: v5e
topology: v5e:2x2
jax: 0.10.0
libtpu: 0.0.40
codegen_flags: <defaults>
</compile_context>

<pallas_src>
import math
import functools

import jax
import jax.numpy as jnp
from jax.experimental import pallas as pl
from jax.experimental.pallas import tpu as pltpu

_BN_EPS = 1e-5
_LANE = 128


def _round_up(x, m):
    return (x + m - 1) // m * m


def _gelu(x):
    # tanh-approximate GELU (EUP tanh instead of a long VALU erf polynomial).
    # TODO(synk): reference nn.GELU() is exact-erf; tanh form deviates <~1e-3.
    c = math.sqrt(2.0 / math.pi)
    return 0.5 * x * (1.0 + jnp.tanh(c * (x + 0.044715 * (x * x * x))))


@functools.lru_cache(maxsize=None)
def _vmem_limit_bytes():
    # v5e/v6e: 128 MiB physical VMEM -> allow a 96 MiB scoped budget.
    # v7x-class (<=64 MiB physical): keep the compiler default.
    try:
        cap = int(pltpu.get_tpu_info().vmem_capacity_bytes)
    except Exception:
        return None
    if cap >= 100 * 1024 * 1024:
        return 96 * 1024 * 1024
    return None


def _compiler_params(sem):
    kw = dict(dimension_semantics=sem)
    lim = _vmem_limit_bytes()
    if lim is not None:
        kw["vmem_limit_bytes"] = lim
    return pltpu.CompilerParams(**kw)


def _const_spec(shape, index_map):
    # Constant-index operands (weights / bias / BN affine): a single pipeline
    # buffer is enough -> reclaim the second double-buffer's VMEM.
    try:
        return pl.BlockSpec(shape, index_map, pipeline_mode=pl.Buffered(1))
    except (TypeError, AttributeError):
        return pl.BlockSpec(shape, index_map)


# ----------------------------------------------------------------------------
# 3x3x3 conv: kw taps K-packed (lane concat), kh via free leading-axis slices,
# kd via clamped slab index maps + scalar validity mask.  Emits bf16 z and
# f32 per-tile BN (sum, sum_sq).
# ----------------------------------------------------------------------------
def _conv3x3x3_kernel(xm_ref, x0_ref, xp_ref, w_ref, b_ref, z_ref, st_ref, *,
                      depth):
    # xm/x0/xp: (1, Hp, Wp, Cp) bf16, H/W-padded slabs at depth d-1, d, d+1
    #           (clamped; masked to zero when outside [0, depth)).
    # w_ref:    (9, 3*Cp, Cp) bf16; row kd*3+kh, K index = kw*Cp + cin.
    # b_ref:    (1, Cp) f32 conv bias.
    # z_ref:    (1, H, W, Cp) bf16 conv + bias output (pre-BN).
    # st_ref:   (1, 2, Cp) f32 per-tile (sum, sum_sq) for BN statistics.
    H, W, Cp = z_ref.shape[1], z_ref.shape[2], z_ref.shape[3]
    d = pl.program_id(1)
    slabs = (xm_ref, x0_ref, xp_ref)

    acc = jnp.zeros((H * W, Cp), jnp.float32)
    for kd in range(3):
        raw = slabs[kd][0]                                    # (Hp, Wp, Cp)
        if kd == 1:
            slab = raw                                        # always valid
        else:
            din = d + (kd - 1)
            valid = jnp.logical_and(din >= 0, din <= depth - 1)
            slab = raw * valid.astype(raw.dtype)              # depth zero-pad
        # kw-im2col: lane-aligned concat of the three shifted W windows.
        imc = jnp.concatenate([slab[:, kw:kw + W, :] for kw in range(3)],
                              axis=-1)                        # (Hp, W, 3*Cp)
        for kh in range(3):
            tap = imc[kh:kh + H].reshape(H * W, 3 * Cp)       # free H slice
            acc = acc + jnp.dot(tap, w_ref[kd * 3 + kh],
                                preferred_element_type=jnp.float32)

    z = acc + b_ref[...]                                      # f32
    st_ref[0, pl.ds(0, 1), :] = jnp.sum(z, axis=0, keepdims=True)
    st_ref[0, pl.ds(1, 1), :] = jnp.sum(z * z, axis=0, keepdims=True)
    z_ref[0] = z.reshape(H, W, Cp).astype(z_ref.dtype)


def _conv3x3x3(xpad, w, b, n_batch, depth_d):
    # xpad: (N*D, Hp, Wp, Cp) bf16 H/W-padded activations (no depth padding).
    _, Hp, Wp, Cp = xpad.shape
    N, D = n_batch, depth_d
    H, W = Hp - 2, Wp - 2

    def slab_spec(kd):
        def imap(n, d, kd=kd):
            dd = jnp.maximum(jnp.minimum(d + (kd - 1), D - 1), 0)
            return (n * D + dd, 0, 0, 0)
        return pl.BlockSpec((1, Hp, Wp, Cp), imap)

    kernel = functools.partial(_conv3x3x3_kernel, depth=D)
    flops = 2 * N * D * H * W * 27 * Cp * Cp
    bytes_accessed = (3 * N * D * Hp * Wp * Cp * 2 + 27 * Cp * Cp * 2
                      + N * D * H * W * Cp * 2 + N * D * 2 * Cp * 4)
    return pl.pallas_call(
        kernel,
        out_shape=(jax.ShapeDtypeStruct((N * D, H, W, Cp), jnp.bfloat16),
                   jax.ShapeDtypeStruct((N * D, 2, Cp), jnp.float32)),
        grid=(N, D),
        in_specs=[
            slab_spec(0), slab_spec(1), slab_spec(2),
            _const_spec((9, 3 * Cp, Cp), lambda n, d: (0, 0, 0)),
            _const_spec((1, Cp), lambda n, d: (0, 0)),
        ],
        out_specs=(
            pl.BlockSpec((1, H, W, Cp), lambda n, d: (n * D + d, 0, 0, 0)),
            pl.BlockSpec((1, 2, Cp), lambda n, d: (n * D + d, 0, 0)),
        ),
        compiler_params=_compiler_params(("parallel", "parallel")),
        cost_estimate=pl.CostEstimate(flops=flops, transcendentals=0,
                                      bytes_accessed=bytes_accessed),
    )(xpad, xpad, xpad, w, b)


def _bn_affine(stats, gamma, beta, count):
    # Fold training-mode BatchNorm3d (batch stats, biased variance) + gamma /
    # beta into a per-channel affine (scale, shift).  Tiny JAX reduction.
    s = jnp.sum(stats, axis=0)                                # (2, Cp)
    mean = s[0] / count
    var = jnp.maximum(s[1] / count - mean * mean, 0.0)
    scale = gamma * jax.lax.rsqrt(var + _BN_EPS)
    shift = beta - mean * scale
    return scale.reshape(1, -1), shift.reshape(1, -1)
    # TODO(synk): running_mean/running_var buffer updates are training-state
    # side effects that do not affect the forward output; not reproduced.


# ----------------------------------------------------------------------------
# BN affine + (block residual) + GELU, writing the H/W-padded layout the next
# conv consumes.  All loads/stores are lane/sublane aligned: the W zero
# borders are folded in via a lane-aligned concat before GELU (gelu(0)=0).
# ----------------------------------------------------------------------------
def _make_affine_pad_kernel(with_res):
    def kernel(*refs):
        if with_res:
            z_ref, sc_ref, sh_ref, res_ref, o_ref = refs
        else:
            z_ref, sc_ref, sh_ref, o_ref = refs
        H, W, Cp = z_ref.shape[1], z_ref.shape[2], z_ref.shape[3]
        Hp, Wp = o_ref.shape[1], o_ref.shape[2]

        y = z_ref[0].astype(jnp.float32) * sc_ref[...] + sh_ref[...]  # (H,W,Cp)
        zcol = jnp.zeros((H, 1, Cp), jnp.float32)
        y_wide = jnp.concatenate([zcol, y, zcol], axis=1)             # (H,Wp,Cp)
        if with_res:
            # residual borders are exactly zero, so adding the full padded row
            # block keeps the W borders zero and the load stays aligned.
            y_wide = y_wide + res_ref[0, pl.ds(1, H), :, :].astype(jnp.float32)
        y_wide = _gelu(y_wide).astype(o_ref.dtype)                    # gelu(0)=0

        zrow = jnp.zeros((1, Wp, Cp), o_ref.dtype)
        o_ref[0, pl.ds(0, 1), :, :] = zrow
        o_ref[0, pl.ds(Hp - 1, 1), :, :] = zrow
        o_ref[0, pl.ds(1, H), :, :] = y_wide
    return kernel


def _affine_gelu_pad(z, scale, shift, res=None):
    ND, H, W, Cp = z.shape
    Hp, Wp = H + 2, W + 2
    with_res = res is not None

    in_specs = [
        pl.BlockSpec((1, H, W, Cp), lambda i: (i, 0, 0, 0)),
        _const_spec((1, Cp), lambda i: (0, 0)),
        _const_spec((1, Cp), lambda i: (0, 0)),
    ]
    args = [z, scale, shift]
    if with_res:
        in_specs.append(pl.BlockSpec((1, Hp, Wp, Cp), lambda i: (i, 0, 0, 0)))
        args.append(res)

    elems = ND * H * W * Cp
    return pl.pallas_call(
        _make_affine_pad_kernel(with_res),
        out_shape=jax.ShapeDtypeStruct((ND, Hp, Wp, Cp), jnp.bfloat16),
        grid=(ND,),
        in_specs=in_specs,
        out_specs=pl.BlockSpec((1, Hp, Wp, Cp), lambda i: (i, 0, 0, 0)),
        compiler_params=_compiler_params(("parallel",)),
        cost_estimate=pl.CostEstimate(
            flops=10 * elems, transcendentals=elems,
            bytes_accessed=elems * 2 * (3 if with_res else 2)
            + ND * Hp * Wp * Cp * 2),
    )(*args)


# ----------------------------------------------------------------------------
# Last-block epilogue: BN affine + block residual + GELU + stage residual,
# written unpadded for the downsample kernel.
# ----------------------------------------------------------------------------
def _affine_gelu_stage_kernel(z_ref, sc_ref, sh_ref, bres_ref, sres_ref, o_ref):
    H, W = z_ref.shape[1], z_ref.shape[2]
    y = z_ref[0].astype(jnp.float32) * sc_ref[...] + sh_ref[...]
    y = y + bres_ref[0, pl.ds(1, H), pl.ds(1, W), :].astype(jnp.float32)
    y = _gelu(y)
    y = y + sres_ref[0, pl.ds(1, H), pl.ds(1, W), :].astype(jnp.float32)
    o_ref[0] = y.astype(o_ref.dtype)


def _affine_gelu_stage(z, scale, shift, block_res, stage_res):
    ND, H, W, Cp = z.shape
    Hp, Wp = H + 2, W + 2
    elems = ND * H * W * Cp
    return pl.pallas_call(
        _affine_gelu_stage_kernel,
        out_shape=jax.ShapeDtypeStruct((ND, H, W, Cp), jnp.bfloat16),
        grid=(ND,),
        in_specs=[
            pl.BlockSpec((1, H, W, Cp), lambda i: (i, 0, 0, 0)),
            _const_spec((1, Cp), lambda i: (0, 0)),
            _const_spec((1, Cp), lambda i: (0, 0)),
            pl.BlockSpec((1, Hp, Wp, Cp), lambda i: (i, 0, 0, 0)),
            pl.BlockSpec((1, Hp, Wp, Cp), lambda i: (i, 0, 0, 0)),
        ],
        out_specs=pl.BlockSpec((1, H, W, Cp), lambda i: (i, 0, 0, 0)),
        compiler_params=_compiler_params(("parallel",)),
        cost_estimate=pl.CostEstimate(flops=14 * elems, transcendentals=elems,
                                      bytes_accessed=elems * 8),
    )(z, scale, shift, block_res, stage_res)


# ----------------------------------------------------------------------------
# MaxPool3d(2, 2) + Conv3d(1x1x1) fused.  Several depth pairs per grid step so
# the matmul M is large; the W pooling pair lives in the lane axis (free
# reshape) so all slices are 128-aligned.
# ----------------------------------------------------------------------------
def _maxpool_conv1x1_kernel(s_ref, w_ref, b_ref, o_ref):
    # s_ref: (DP, 2, H2, 2, W2, 2*Cp) bf16; o_ref: (DP, H2, W2, CoutP) f32.
    DP, H2, W2, CoutP = o_ref.shape
    Cp = w_ref.shape[0]
    m = None
    for kd in range(2):
        for kh in range(2):
            for kw in range(2):
                v = s_ref[:, kd, :, kh, :, pl.ds(kw * Cp, Cp)]   # (DP,H2,W2,Cp)
                m = v if m is None else jnp.maximum(m, v)
    p = m.reshape(DP * H2 * W2, Cp)
    out = jnp.dot(p, w_ref[...], preferred_element_type=jnp.float32) + b_ref[...]
    o_ref[...] = out.reshape(DP, H2, W2, CoutP)


def _maxpool_conv1x1(s, w, b, n_batch, depth_d):
    # s: (N*D, H, W, Cp) bf16 (block outputs + stage residual already added).
    _, H, W, Cp = s.shape
    N, D = n_batch, depth_d
    D2, H2, W2 = D // 2, H // 2, W // 2
    CoutP = w.shape[1]
    s6 = s.reshape(N * D2, 2, H2, 2, W2, 2 * Cp)       # free row-major regroup
    DP = 1
    for cand in (8, 4, 2):                              # depth pairs per step
        if D2 % cand == 0:
            DP = cand
            break
    flops = 2 * N * D2 * H2 * W2 * Cp * CoutP
    bytes_accessed = N * D * H * W * Cp * 2 + N * D2 * H2 * W2 * CoutP * 4
    return pl.pallas_call(
        _maxpool_conv1x1_kernel,
        out_shape=jax.ShapeDtypeStruct((N * D2, H2, W2, CoutP), jnp.float32),
        grid=(N * D2 // DP,),
        in_specs=[
            pl.BlockSpec((DP, 2, H2, 2, W2, 2 * Cp),
                         lambda i: (i, 0, 0, 0, 0, 0)),
            _const_spec((Cp, CoutP), lambda i: (0, 0)),
            _const_spec((1, CoutP), lambda i: (0, 0)),
        ],
        out_specs=pl.BlockSpec((DP, H2, W2, CoutP), lambda i: (i, 0, 0, 0)),
        compiler_params=_compiler_params(("parallel",)),
        cost_estimate=pl.CostEstimate(flops=flops, transcendentals=0,
                                      bytes_accessed=bytes_accessed),
    )(s6, w, b)


# ----------------------------------------------------------------------------
# Stage forward
# ----------------------------------------------------------------------------
def swin_stage_forward(x_ncdhw, params, downscale=True, out_dim=None):
    N, C, D, H, W = x_ncdhw.shape
    if out_dim is None:
        out_dim = 2 * C if downscale else C
    blocks = params.get('blocks', [])
    if blocks:
        Cp = blocks[0]['w1'].shape[-1]
    elif downscale:
        Cp = params['w_ds'].shape[0]
    else:
        Cp = _round_up(C, _LANE)

    # NCDHW -> N D H W C, channel zero-pad to 128 lanes, H/W zero-pad for the
    # padding=1 convs; fold batch into depth.  The depth halo is NOT stored:
    # it is recreated inside the conv kernel (clamped index maps + mask).
    x_cl = jnp.transpose(x_ncdhw, (0, 2, 3, 4, 1))
    x_cl = jnp.pad(x_cl, ((0, 0),) * 4 + ((0, Cp - C),))
    xpad = jnp.pad(x_cl, ((0, 0), (0, 0), (1, 1), (1, 1), (0, 0)))
    xpad = xpad.astype(jnp.bfloat16).reshape(N * D, H + 2, W + 2, Cp)
    stage_id_pad = xpad
    count = float(N * D * H * W)      # BatchNorm3d reduction count per channel

    cur = xpad
    s = None
    for i, bp in enumerate(blocks):
        is_last = i == len(blocks) - 1
        # conv1 -> BN1 -> GELU (re-padded layout for the next conv)
        z, st = _conv3x3x3(cur, bp['w1'], bp['b1'], N, D)
        sc, sh = _bn_affine(st, bp['g1'], bp['beta1'], count)
        y1 = _affine_gelu_pad(z, sc, sh)
        # conv2 -> BN2 -> (+ block identity) -> GELU (-> + stage identity)
        z, st = _conv3x3x3(y1, bp['w2'], bp['b2'], N, D)
        sc, sh = _bn_affine(st, bp['g2'], bp['beta2'], count)
        if is_last:
            s = _affine_gelu_stage(z, sc, sh, cur, stage_id_pad)
        else:
            cur = _affine_gelu_pad(z, sc, sh, res=cur)
    if s is None:                      # depth == 0: x + identity == 2x
        s = (2.0 * x_cl).astype(jnp.bfloat16).reshape(N * D, H, W, Cp)

    if not downscale:
        out = s.astype(jnp.float32).reshape(N, D, H, W, Cp)[..., :out_dim]
        return jnp.transpose(out, (0, 4, 1, 2, 3))

    # MaxPool3d(2, 2) with even spatial dims (PyTorch would floor odd dims).
    assert D % 2 == 0 and H % 2 == 0 and W % 2 == 0
    out = _maxpool_conv1x1(s, params['w_ds'], params['b_ds'], N, D)
    out = out.reshape(N, D // 2, H // 2, W // 2, -1)[..., :out_dim]
    return jnp.transpose(out, (0, 4, 1, 2, 3))         # back to NCDHW


# ----------------------------------------------------------------------------
# Deterministic parameter init (shapes per module __init__), TPU-padded layout
# ----------------------------------------------------------------------------
def init_params(key, dim, depth, downscale=True, out_dim=None):
    out_dim = out_dim if out_dim is not None else (dim * 2 if downscale else dim)
    Cp = _round_up(dim, _LANE)
    CoutP = _round_up(out_dim, _LANE)
    fan_in = dim * 27
    std = math.sqrt(2.0 / fan_in)            # kaiming_normal_ (fan_in, relu)

    def conv_w(w):
        # torch Conv3d weight (Cout, Cin, 3,3,3) -> (9, 3*Cp, Cp) bf16:
        # row kd*3+kh, K axis ordered (kw, cin) to match the kernel's kw-im2col.
        wk = jnp.transpose(w, (2, 3, 4, 1, 0))            # (kd, kh, kw, cin, cout)
        wk = jnp.pad(wk, ((0, 0), (0, 0), (0, 0), (0, Cp - dim), (0, Cp - dim)))
        return wk.reshape(9, 3 * Cp, Cp).astype(jnp.bfloat16)

    def pad_vec(v, n, fill=0.0):
        return jnp.pad(v, (0, n - v.shape[0]), constant_values=fill)

    blocks = []
    for _ in range(depth):
        key, k1, k2, k3, k4 = jax.random.split(key, 5)
        w1 = jax.random.normal(k1, (dim, dim, 3, 3, 3), jnp.float32) * std
        b1 = jax.random.uniform(k2, (dim,), jnp.float32, -1.0, 1.0) / math.sqrt(fan_in)
        w2 = jax.random.normal(k3, (dim, dim, 3, 3, 3), jnp.float32) * std
        b2 = jax.random.uniform(k4, (dim,), jnp.float32, -1.0, 1.0) / math.sqrt(fan_in)
        blocks.append(dict(
            w1=conv_w(w1), b1=pad_vec(b1, Cp).reshape(1, Cp),
            g1=pad_vec(jnp.ones((dim,), jnp.float32), Cp),
            beta1=pad_vec(jnp.zeros((dim,), jnp.float32), Cp),
            w2=conv_w(w2), b2=pad_vec(b2, Cp).reshape(1, Cp),
            g2=pad_vec(jnp.ones((dim,), jnp.float32), Cp),
            beta2=pad_vec(jnp.zeros((dim,), jnp.float32), Cp),
        ))
    params = dict(blocks=blocks)
    if downscale:
        key, k5, k6 = jax.random.split(key, 3)
        w_ds = jax.random.normal(k5, (out_dim, dim, 1, 1, 1), jnp.float32) * math.sqrt(1.0 / dim)
        b_ds = jax.random.uniform(k6, (out_dim,), jnp.float32, -1.0, 1.0) / math.sqrt(dim)
        wk = jnp.pad(w_ds.reshape(out_dim, dim).T,
                     ((0, Cp - dim), (0, CoutP - out_dim)))
        params['w_ds'] = wk.astype(jnp.bfloat16)
        params['b_ds'] = jnp.pad(b_ds, (0, CoutP - out_dim)).reshape(1, CoutP)
    return params


# ----------------------------------------------------------------------------
if __name__ == "__main__":
    key = jax.random.PRNGKey(0)
    kx, kp = jax.random.split(key)

    # Small shapes consistent with the module: 5-D NCDHW volumetric input.
    N, C, D, H, W = 2, 4, 8, 8, 8
    depth = 2
    x = jax.random.normal(kx, (N, C, D, H, W), jnp.float32)
    params = init_params(kp, dim=C, depth=depth, downscale=True)

    fwd = jax.jit(functools.partial(swin_stage_forward, downscale=True,
                                    out_dim=2 * C))
    out = fwd(x, params)
    jax.block_until_ready(out)

    assert out.shape == (N, 2 * C, D // 2, H // 2, W // 2), out.shape
    assert out.dtype == jnp.float32
    assert bool(jnp.all(jnp.isfinite(out)))
    print("KERNEL_OK")
</pallas_src>

<mosaic_0001>
module attributes {stable_mosaic.version = 11 : i64} {
  func.func @_conv3x3x3_kernel(%arg0: i32, %arg1: i32, %arg2: memref<1x10x10x128xbf16, #tpu.memory_space<vmem>>, %arg3: memref<1x10x10x128xbf16, #tpu.memory_space<vmem>>, %arg4: memref<1x10x10x128xbf16, #tpu.memory_space<vmem>>, %arg5: memref<9x384x128xbf16, #tpu.memory_space<vmem>>, %arg6: memref<1x128xf32, #tpu.memory_space<vmem>>, %arg7: memref<1x8x8x128xbf16, #tpu.memory_space<vmem>>, %arg8: memref<1x2x128xf32, #tpu.memory_space<vmem>>) attributes {dimension_semantics = [#tpu.dimension_semantics<parallel>, #tpu.dimension_semantics<parallel>], iteration_bounds = array<i64: 2, 8>, scalar_prefetch = 0 : i64, scratch_operands = 0 : i64, tpu.core_type = #tpu.core_type<tc>, window_params = [{transform_indices = @transform_0, window_bounds = array<i64: 1, 10, 10, 128>}, {transform_indices = @transform_1, window_bounds = array<i64: 1, 10, 10, 128>}, {transform_indices = @transform_2, window_bounds = array<i64: 1, 10, 10, 128>}, {pipeline_mode = #tpu.pipeline_mode<synchronous>, transform_indices = @transform_3, window_bounds = array<i64: 9, 384, 128>}, {pipeline_mode = #tpu.pipeline_mode<synchronous>, transform_indices = @transform_4, window_bounds = array<i64: 1, 128>}, {transform_indices = @transform_5, window_bounds = array<i64: 1, 8, 8, 128>}, {transform_indices = @transform_6, window_bounds = array<i64: 1, 2, 128>}]} {
    %cst = arith.constant 0.000000e+00 : f32
    %0 = vector.broadcast %cst : f32 to vector<64x128xf32>
    %c0 = arith.constant 0 : index
    %c0_0 = arith.constant 0 : index
    %c0_1 = arith.constant 0 : index
    %c0_2 = arith.constant 0 : index
    %1 = vector.load %arg2[%c0, %c0_0, %c0_1, %c0_2] : memref<1x10x10x128xbf16, #tpu.memory_space<vmem>>, vector<1x10x10x128xbf16>
    %2 = vector.shape_cast %1 : vector<1x10x10x128xbf16> to vector<10x10x128xbf16>
    %c-1_i32 = arith.constant -1 : i32
    %3 = arith.addi %arg1, %c-1_i32 : i32
    %c0_i32 = arith.constant 0 : i32
    %4 = arith.cmpi sge, %3, %c0_i32 : i32
    %c7_i32 = arith.constant 7 : i32
    %5 = arith.cmpi sle, %3, %c7_i32 : i32
    %6 = arith.andi %4, %5 : i1
    %7 = arith.extui %6 : i1 to i32
    %8 = arith.sitofp %7 : i32 to f32
    %9 = arith.truncf %8 : f32 to bf16
    %10 = vector.broadcast %9 : bf16 to vector<10x10x128xbf16>
    %11 = arith.mulf %2, %10 : vector<10x10x128xbf16>
    %12 = vector.extract_strided_slice %11 {offsets = [0, 0, 0], sizes = [10, 8, 128], strides = [1, 1, 1]} : vector<10x10x128xbf16> to vector<10x8x128xbf16>
    %13 = vector.extract_strided_slice %11 {offsets = [0, 1, 0], sizes = [10, 8, 128], strides = [1, 1, 1]} : vector<10x10x128xbf16> to vector<10x8x128xbf16>
    %14 = vector.extract_strided_slice %11 {offsets = [0, 2, 0], sizes = [10, 8, 128], strides = [1, 1, 1]} : vector<10x10x128xbf16> to vector<10x8x128xbf16>
    %15 = tpu.concatenate %12, %13, %14 in 2 : vector<10x8x128xbf16>, vector<10x8x128xbf16>, vector<10x8x128xbf16> -> vector<10x8x384xbf16>
    %16 = vector.extract_strided_slice %15 {offsets = [0, 0, 0], sizes = [8, 8, 384], strides = [1, 1, 1]} : vector<10x8x384xbf16> to vector<8x8x384xbf16>
    %17 = vector.shape_cast %16 : vector<8x8x384xbf16> to vector<64x384xbf16>
    %c0_3 = arith.constant 0 : index
    %c0_4 = arith.constant 0 : index
    %c0_5 = arith.constant 0 : index
    %18 = vector.load %arg5[%c0_3, %c0_4, %c0_5] : memref<9x384x128xbf16, #tpu.memory_space<vmem>>, vector<1x384x128xbf16>
    %19 = vector.shape_cast %18 : vector<1x384x128xbf16> to vector<384x128xbf16>
    %cst_6 = arith.constant dense<0.000000e+00> : vector<64x128xf32>
    %20 = tpu.matmul %17, %19, %cst_6 {dimension_numbers = #tpu.dot_dimension_numbers<[1], [0], [0], [1], [0, 0, 1, 1], [], []>} : vector<64x384xbf16>, vector<384x128xbf16>, vector<64x128xf32> -> vector<64x128xf32>
    %21 = arith.addf %0, %20 : vector<64x128xf32>
    %22 = vector.extract_strided_slice %15 {offsets = [1, 0, 0], sizes = [8, 8, 384], strides = [1, 1, 1]} : vector<10x8x384xbf16> to vector<8x8x384xbf16>
    %23 = vector.shape_cast %22 : vector<8x8x384xbf16> to vector<64x384xbf16>
    %c1 = arith.constant 1 : index
    %c0_7 = arith.constant 0 : index
    %c0_8 = arith.constant 0 : index
    %24 = vector.load %arg5[%c1, %c0_7, %c0_8] : memref<9x384x128xbf16, #tpu.memory_space<vmem>>, vector<1x384x128xbf16>
    %25 = vector.shape_cast %24 : vector<1x384x128xbf16> to vector<384x128xbf16>
    %cst_9 = arith.constant dense<0.000000e+00> : vector<64x128xf32>
    %26 = tpu.matmul %23, %25, %cst_9 {dimension_numbers = #tpu.dot_dimension_numbers<[1], [0], [0], [1], [0, 0, 1, 1], [], []>} : vector<64x384xbf16>, vector<384x128xbf16>, vector<64x128xf32> -> vector<64x128xf32>
    %27 = arith.addf %21, %26 : vector<64x128xf32>
    %28 = vector.extract_strided_slice %15 {offsets = [2, 0, 0], sizes = [8, 8, 384], strides = [1, 1, 1]} : vector<10x8x384xbf16> to vector<8x8x384xbf16>
    %29 = vector.shape_cast %28 : vector<8x8x384xbf16> to vector<64x384xbf16>
    %c2 = arith.constant 2 : index
    %c0_10 = arith.constant 0 : index
    %c0_11 = arith.constant 0 : index
    %30 = vector.load %arg5[%c2, %c0_10, %c0_11] : memref<9x384x128xbf16, #tpu.memory_space<vmem>>, vector<1x384x128xbf16>
    %31 = vector.shape_cast %30 : vector<1x384x128xbf16> to vector<384x128xbf16>
    %cst_12 = arith.constant dense<0.000000e+00> : vector<64x128xf32>
    %32 = tpu.matmul %29, %31, %cst_12 {dimension_numbers = #tpu.dot_dimension_numbers<[1], [0], [0], [1], [0, 0, 1, 1], [], []>} : vector<64x384xbf16>, vector<384x128xbf16>, vector<64x128xf32> -> vector<64x128xf32>
    %33 = arith.addf %27, %32 : vector<64x128xf32>
    %c0_13 = arith.constant 0 : index
    %c0_14 = arith.constant 0 : index
    %c0_15 = arith.constant 0 : index
    %c0_16 = arith.constant 0 : index
    %34 = vector.load %arg3[%c0_13, %c0_14, %c0_15, %c0_16] : memref<1x10x10x128xbf16, #tpu.memory_space<vmem>>, vector<1x10x10x128xbf16>
    %35 = vector.shape_cast %34 : vector<1x10x10x128xbf16> to vector<10x10x128xbf16>
    %36 = vector.extract_strided_slice %35 {offsets = [0, 0, 0], sizes = [10, 8, 128], strides = [1, 1, 1]} : vector<10x10x128xbf16> to vector<10x8x128xbf16>
    %37 = vector.extract_strided_slice %35 {offsets = [0, 1, 0], sizes = [10, 8, 128], strides = [1, 1, 1]} : vector<10x10x128xbf16> to vector<10x8x128xbf16>
    %38 = vector.extract_strided_slice %35 {offsets = [0, 2, 0], sizes = [10, 8, 128], strides = [1, 1, 1]} : vector<10x10x128xbf16> to vector<10x8x128xbf16>
    %39 = tpu.concatenate %36, %37, %38 in 2 : vector<10x8x128xbf16>, vector<10x8x128xbf16>, vector<10x8x128xbf16> -> vector<10x8x384xbf16>
    %40 = vector.extract_strided_slice %39 {offsets = [0, 0, 0], sizes = [8, 8, 384], strides = [1, 1, 1]} : vector<10x8x384xbf16> to vector<8x8x384xbf16>
    %41 = vector.shape_cast %40 : vector<8x8x384xbf16> to vector<64x384xbf16>
    %c3 = arith.constant 3 : index
    %c0_17 = arith.constant 0 : index
    %c0_18 = arith.constant 0 : index
    %42 = vector.load %arg5[%c3, %c0_17, %c0_18] : memref<9x384x128xbf16, #tpu.memory_space<vmem>>, vector<1x384x128xbf16>
    %43 = vector.shape_cast %42 : vector<1x384x128xbf16> to vector<384x128xbf16>
    %cst_19 = arith.constant dense<0.000000e+00> : vector<64x128xf32>
    %44 = tpu.matmul %41, %43, %cst_19 {dimension_numbers = #tpu.dot_dimension_numbers<[1], [0], [0], [1], [0, 0, 1, 1], [], []>} : vector<64x384xbf16>, vector<384x128xbf16>, vector<64x128xf32> -> vector<64x128xf32>
    %45 = arith.addf %33, %44 : vector<64x128xf32>
    %46 = vector.extract_strided_slice %39 {offsets = [1, 0, 0], sizes = [8, 8, 384], strides = [1, 1, 1]} : vector<10x8x384xbf16> to vector<8x8x384xbf16>
    %47 = vector.shape_cast %46 : vector<8x8x384xbf16> to vector<64x384xbf16>
    %c4 = arith.constant 4 : index
    %c0_20 = arith.constant 0 : index
    %c0_21 = arith.constant 0 : index
    %48 = vector.load %arg5[%c4, %c0_20, %c0_21] : memref<9x384x128xbf16, #tpu.memory_space<vmem>>, vector<1x384x128xbf16>
    %49 = vector.shape_cast %48 : vector<1x384x128xbf16> to vector<384x128xbf16>
    %cst_22 = arith.constant dense<0.000000e+00> : vector<64x128xf32>
    %50 = tpu.matmul %47, %49, %cst_22 {dimension_numbers = #tpu.dot_dimension_numbers<[1], [0], [0], [1], [0, 0, 1, 1], [], []>} : vector<64x384xbf16>, vector<384x128xbf16>, vector<64x128xf32> -> vector<64x128xf32>
    %51 = arith.addf %45, %50 : vector<64x128xf32>
    %52 = vector.extract_strided_slice %39 {offsets = [2, 0, 0], sizes = [8, 8, 384], strides = [1, 1, 1]} : vector<10x8x384xbf16> to vector<8x8x384xbf16>
    %53 = vector.shape_cast %52 : vector<8x8x384xbf16> to vector<64x384xbf16>
    %c5 = arith.constant 5 : index
    %c0_23 = arith.constant 0 : index
    %c0_24 = arith.constant 0 : index
    %54 = vector.load %arg5[%c5, %c0_23, %c0_24] : memref<9x384x128xbf16, #tpu.memory_space<vmem>>, vector<1x384x128xbf16>
    %55 = vector.shape_cast %54 : vector<1x384x128xbf16> to vector<384x128xbf16>
    %cst_25 = arith.constant dense<0.000000e+00> : vector<64x128xf32>
    %56 = tpu.matmul %53, %55, %cst_25 {dimension_numbers = #tpu.dot_dimension_numbers<[1], [0], [0], [1], [0, 0, 1, 1], [], []>} : vector<64x384xbf16>, vector<384x128xbf16>, vector<64x128xf32> -> vector<64x128xf32>
    %57 = arith.addf %51, %56 : vector<64x128xf32>
    %c0_26 = arith.constant 0 : index
    %c0_27 = arith.constant 0 : index
    %c0_28 = arith.constant 0 : index
    %c0_29 = arith.constant 0 : index
    %58 = vector.load %arg4[%c0_26, %c0_27, %c0_28, %c0_29] : memref<1x10x10x128xbf16, #tpu.memory_space<vmem>>, vector<1x10x10x128xbf16>
    %59 = vector.shape_cast %58 : vector<1x10x10x128xbf16> to vector<10x10x128xbf16>
    %c1_i32 = arith.constant 1 : i32
    %60 = arith.addi %arg1, %c1_i32 : i32
    %c0_i32_30 = arith.constant 0 : i32
    %61 = arith.cmpi sge, %60, %c0_i32_30 : i32
    %c7_i32_31 = arith.constant 7 : i32
    %62 = arith.cmpi sle, %60, %c7_i32_31 : i32
    %63 = arith.andi %61, %62 : i1
    %64 = arith.extui %63 : i1 to i32
    %65 = arith.sitofp %64 : i32 to f32
    %66 = arith.truncf %65 : f32 to bf16
    %67 = vector.broadcast %66 : bf16 to vector<10x10x128xbf16>
    %68 = arith.mulf %59, %67 : vector<10x10x128xbf16>
    %69 = vector.extract_strided_slice %68 {offsets = [0, 0, 0], sizes = [10, 8, 128], strides = [1, 1, 1]} : vector<10x10x128xbf16> to vector<10x8x128xbf16>
    %70 = vector.extract_strided_slice %68 {offsets = [0, 1, 0], sizes = [10, 8, 128], strides = [1, 1, 1]} : vector<10x10x128xbf16> to vector<10x8x128xbf16>
    %71 = vector.extract_strided_slice %68 {offsets = [0, 2, 0], sizes = [10, 8, 128], strides = [1, 1, 1]} : vector<10x10x128xbf16> to vector<10x8x128xbf16>
    %72 = tpu.concatenate %69, %70, %71 in 2 : vector<10x8x128xbf16>, vector<10x8x128xbf16>, vector<10x8x128xbf16> -> vector<10x8x384xbf16>
    %73 = vector.extract_strided_slice %72 {offsets = [0, 0, 0], sizes = [8, 8, 384], strides = [1, 1, 1]} : vector<10x8x384xbf16> to vector<8x8x384xbf16>
    %74 = vector.shape_cast %73 : vector<8x8x384xbf16> to vector<64x384xbf16>
    %c6 = arith.constant 6 : index
    %c0_32 = arith.constant 0 : index
    %c0_33 = arith.constant 0 : index
    %75 = vector.load %arg5[%c6, %c0_32, %c0_33] : memref<9x384x128xbf16, #tpu.memory_space<vmem>>, vector<1x384x128xbf16>
    %76 = vector.shape_cast %75 : vector<1x384x128xbf16> to vector<384x128xbf16>
    %cst_34 = arith.constant dense<0.000000e+00> : vector<64x128xf32>
    %77 = tpu.matmul %74, %76, %cst_34 {dimension_numbers = #tpu.dot_dimension_numbers<[1], [0], [0], [1], [0, 0, 1, 1], [], []>} : vector<64x384xbf16>, vector<384x128xbf16>, vector<64x128xf32> -> vector<64x128xf32>
    %78 = arith.addf %57, %77 : vector<64x128xf32>
    %79 = vector.extract_strided_slice %72 {offsets = [1, 0, 0], sizes = [8, 8, 384], strides = [1, 1, 1]} : vector<10x8x384xbf16> to vector<8x8x384xbf16>
    %80 = vector.shape_cast %79 : vector<8x8x384xbf16> to vector<64x384xbf16>
    %c7 = arith.constant 7 : index
    %c0_35 = arith.constant 0 : index
    %c0_36 = arith.constant 0 : index
    %81 = vector.load %arg5[%c7, %c0_35, %c0_36] : memref<9x384x128xbf16, #tpu.memory_space<vmem>>, vector<1x384x128xbf16>
    %82 = vector.shape_cast %81 : vector<1x384x128xbf16> to vector<384x128xbf16>
    %cst_37 = arith.constant dense<0.000000e+00> : vector<64x128xf32>
    %83 = tpu.matmul %80, %82, %cst_37 {dimension_numbers = #tpu.dot_dimension_numbers<[1], [0], [0], [1], [0, 0, 1, 1], [], []>} : vector<64x384xbf16>, vector<384x128xbf16>, vector<64x128xf32> -> vector<64x128xf32>
    %84 = arith.addf %78, %83 : vector<64x128xf32>
    %85 = vector.extract_strided_slice %72 {offsets = [2, 0, 0], sizes = [8, 8, 384], strides = [1, 1, 1]} : vector<10x8x384xbf16> to vector<8x8x384xbf16>
    %86 = vector.shape_cast %85 : vector<8x8x384xbf16> to vector<64x384xbf16>
    %c8 = arith.constant 8 : index
    %c0_38 = arith.constant 0 : index
    %c0_39 = arith.constant 0 : index
    %87 = vector.load %arg5[%c8, %c0_38, %c0_39] : memref<9x384x128xbf16, #tpu.memory_space<vmem>>, vector<1x384x128xbf16>
    %88 = vector.shape_cast %87 : vector<1x384x128xbf16> to vector<384x128xbf16>
    %cst_40 = arith.constant dense<0.000000e+00> : vector<64x128xf32>
    %89 = tpu.matmul %86, %88, %cst_40 {dimension_numbers = #tpu.dot_dimension_numbers<[1], [0], [0], [1], [0, 0, 1, 1], [], []>} : vector<64x384xbf16>, vector<384x128xbf16>, vector<64x128xf32> -> vector<64x128xf32>
    %90 = arith.addf %84, %89 : vector<64x128xf32>
    %c0_41 = arith.constant 0 : index
    %c0_42 = arith.constant 0 : index
    %91 = vector.load %arg6[%c0_41, %c0_42] : memref<1x128xf32, #tpu.memory_space<vmem>>, vector<1x128xf32>
    %92 = vector.broadcast %91 : vector<1x128xf32> to vector<64x128xf32>
    %93 = arith.addf %90, %92 : vector<64x128xf32>
    %cst_43 = arith.constant dense<0.000000e+00> : vector<128xf32>
    %94 = vector.multi_reduction <add>, %93, %cst_43 [0] : vector<64x128xf32> to vector<128xf32>
    %95 = vector.shape_cast %94 : vector<128xf32> to vector<1x128xf32>
    %c0_44 = arith.constant 0 : index
    %c0_45 = arith.constant 0 : index
    %c0_46 = arith.constant 0 : index
    %96 = vector.load %arg8[%c0_44, %c0_45, %c0_46] : memref<1x2x128xf32, #tpu.memory_space<vmem>>, vector<1x1x128xf32>
    %97 = vector.shape_cast %96 : vector<1x1x128xf32> to vector<1x128xf32>
    %98 = vector.shape_cast %95 : vector<1x128xf32> to vector<1x1x128xf32>
    tpu.vector_store %arg8[%c0_44, %c0_45, %c0_46], %98 {strides = array<i32>} : memref<1x2x128xf32, #tpu.memory_space<vmem>>, vector<1x1x128xf32>,
    %99 = arith.mulf %93, %93 : vector<64x128xf32>
    %cst_47 = arith.constant dense<0.000000e+00> : vector<128xf32>
    %100 = vector.multi_reduction <add>, %99, %cst_47 [0] : vector<64x128xf32> to vector<128xf32>
    %101 = vector.shape_cast %100 : vector<128xf32> to vector<1x128xf32>
    %c0_48 = arith.constant 0 : index
    %c1_49 = arith.constant 1 : index
    %c0_50 = arith.constant 0 : index
    %102 = vector.load %arg8[%c0_48, %c1_49, %c0_50] : memref<1x2x128xf32, #tpu.memory_space<vmem>>, vector<1x1x128xf32>
    %103 = vector.shape_cast %102 : vector<1x1x128xf32> to vector<1x128xf32>
    %104 = vector.shape_cast %101 : vector<1x128xf32> to vector<1x1x128xf32>
    tpu.vector_store %arg8[%c0_48, %c1_49, %c0_50], %104 {strides = array<i32>} : memref<1x2x128xf32, #tpu.memory_space<vmem>>, vector<1x1x128xf32>,
    %105 = vector.shape_cast %93 : vector<64x128xf32> to vector<8x8x128xf32>
    %106 = arith.truncf %105 : vector<8x8x128xf32> to vector<8x8x128xbf16>
    %c0_51 = arith.constant 0 : index
    %c0_52 = arith.constant 0 : index
    %c0_53 = arith.constant 0 : index
    %c0_54 = arith.constant 0 : index
    %107 = vector.load %arg7[%c0_51, %c0_52, %c0_53, %c0_54] : memref<1x8x8x128xbf16, #tpu.memory_space<vmem>>, vector<1x8x8x128xbf16>
    %108 = vector.shape_cast %107 : vector<1x8x8x128xbf16> to vector<8x8x128xbf16>
    %109 = vector.shape_cast %106 : vector<8x8x128xbf16> to vector<1x8x8x128xbf16>
    tpu.vector_store %arg7[%c0_51, %c0_52, %c0_53, %c0_54], %109 {strides = array<i32>} : memref<1x8x8x128xbf16, #tpu.memory_space<vmem>>, vector<1x8x8x128xbf16>,
    return
  }
  func.func @transform_0(%arg0: i32, %arg1: i32) -> (i32, i32, i32, i32) {
    %c-1_i32 = arith.constant -1 : i32
    %0 = arith.addi %arg1, %c-1_i32 : i32
    %c7_i32 = arith.constant 7 : i32
    %1 = arith.minsi %0, %c7_i32 : i32
    %c0_i32 = arith.constant 0 : i32
    %2 = arith.maxsi %1, %c0_i32 : i32
    %c8_i32 = arith.constant 8 : i32
    %3 = arith.muli %arg0, %c8_i32 : i32
    %4 = arith.addi %3, %2 : i32
    %c0_i32_0 = arith.constant 0 : i32
    %c0_i32_1 = arith.constant 0 : i32
    %c0_i32_2 = arith.constant 0 : i32
    %c0_i32_3 = arith.constant 0 : i32
    return %4, %c0_i32_0, %c0_i32_1, %c0_i32_2 : i32, i32, i32, i32
  }
  func.func @transform_1(%arg0: i32, %arg1: i32) -> (i32, i32, i32, i32) {
    %c0_i32 = arith.constant 0 : i32
    %0 = arith.addi %arg1, %c0_i32 : i32
    %c7_i32 = arith.constant 7 : i32
    %1 = arith.minsi %0, %c7_i32 : i32
    %c0_i32_0 = arith.constant 0 : i32
    %2 = arith.maxsi %1, %c0_i32_0 : i32
    %c8_i32 = arith.constant 8 : i32
    %3 = arith.muli %arg0, %c8_i32 : i32
    %4 = arith.addi %3, %2 : i32
    %c0_i32_1 = arith.constant 0 : i32
    %c0_i32_2 = arith.constant 0 : i32
    %c0_i32_3 = arith.constant 0 : i32
    %c0_i32_4 = arith.constant 0 : i32
    return %4, %c0_i32_1, %c0_i32_2, %c0_i32_3 : i32, i32, i32, i32
  }
  func.func @transform_2(%arg0: i32, %arg1: i32) -> (i32, i32, i32, i32) {
    %c1_i32 = arith.constant 1 : i32
    %0 = arith.addi %arg1, %c1_i32 : i32
    %c7_i32 = arith.constant 7 : i32
    %1 = arith.minsi %0, %c7_i32 : i32
    %c0_i32 = arith.constant 0 : i32
    %2 = arith.maxsi %1, %c0_i32 : i32
    %c8_i32 = arith.constant 8 : i32
    %3 = arith.muli %arg0, %c8_i32 : i32
    %4 = arith.addi %3, %2 : i32
    %c0_i32_0 = arith.constant 0 : i32
    %c0_i32_1 = arith.constant 0 : i32
    %c0_i32_2 = arith.constant 0 : i32
    %c0_i32_3 = arith.constant 0 : i32
    return %4, %c0_i32_0, %c0_i32_1, %c0_i32_2 : i32, i32, i32, i32
  }
  func.func @transform_3(%arg0: i32, %arg1: i32) -> (i32, i32, i32) {
    %c0_i32 = arith.constant 0 : i32
    %c0_i32_0 = arith.constant 0 : i32
    %c0_i32_1 = arith.constant 0 : i32
    %c0_i32_2 = arith.constant 0 : i32
    return %c0_i32, %c0_i32_0, %c0_i32_1 : i32, i32, i32
  }
  func.func @transform_4(%arg0: i32, %arg1: i32) -> (i32, i32) {
    %c0_i32 = arith.constant 0 : i32
    %c0_i32_0 = arith.constant 0 : i32
    %c0_i32_1 = arith.constant 0 : i32
    return %c0_i32, %c0_i32_0 : i32, i32
  }
  func.func @transform_5(%arg0: i32, %arg1: i32) -> (i32, i32, i32, i32) {
    %c8_i32 = arith.constant 8 : i32
    %0 = arith.muli %arg0, %c8_i32 : i32
    %1 = arith.addi %0, %arg1 : i32
    %c0_i32 = arith.constant 0 : i32
    %c0_i32_0 = arith.constant 0 : i32
    %c0_i32_1 = arith.constant 0 : i32
    %c0_i32_2 = arith.constant 0 : i32
    return %1, %c0_i32, %c0_i32_0, %c0_i32_1 : i32, i32, i32, i32
  }
  func.func @transform_6(%arg0: i32, %arg1: i32) -> (i32, i32, i32) {
    %c8_i32 = arith.constant 8 : i32
    %0 = arith.muli %arg0, %c8_i32 : i32
    %1 = arith.addi %0, %arg1 : i32
    %c0_i32 = arith.constant 0 : i32
    %c0_i32_0 = arith.constant 0 : i32
    %c0_i32_1 = arith.constant 0 : i32
    return %1, %c0_i32, %c0_i32_0 : i32, i32, i32
  }
}

module attributes {stable_mosaic.version = 11 : i64} {
  func.func @kernel(%arg0: i32, %arg1: memref<1x8x8x128xbf16, #tpu.memory_space<vmem>>, %arg2: memref<1x128xf32, #tpu.memory_space<vmem>>, %arg3: memref<1x128xf32, #tpu.memory_space<vmem>>, %arg4: memref<1x10x10x128xbf16, #tpu.memory_space<vmem>>) attributes {dimension_semantics = [#tpu.dimension_semantics<parallel>], iteration_bounds = array<i64: 16>, scalar_prefetch = 0 : i64, scratch_operands = 0 : i64, tpu.core_type = #tpu.core_type<tc>, window_params = [{transform_indices = @transform_0, window_bounds = array<i64: 1, 8, 8, 128>}, {pipeline_mode = #tpu.pipeline_mode<synchronous>, transform_indices = @transform_1, window_bounds = array<i64: 1, 128>}, {pipeline_mode = #tpu.pipeline_mode<synchronous>, transform_indices = @transform_2, window_bounds = array<i64: 1, 128>}, {transform_indices = @transform_3, window_bounds = array<i64: 1, 10, 10, 128>}]} {
    %c0 = arith.constant 0 : index
    %c0_0 = arith.constant 0 : index
    %c0_1 = arith.constant 0 : index
    %c0_2 = arith.constant 0 : index
    %0 = vector.load %arg1[%c0, %c0_0, %c0_1, %c0_2] : memref<1x8x8x128xbf16, #tpu.memory_space<vmem>>, vector<1x8x8x128xbf16>
    %1 = vector.shape_cast %0 : vector<1x8x8x128xbf16> to vector<8x8x128xbf16>
    %2 = arith.extf %1 : vector<8x8x128xbf16> to vector<8x8x128xf32>
    %c0_3 = arith.constant 0 : index
    %c0_4 = arith.constant 0 : index
    %3 = vector.load %arg2[%c0_3, %c0_4] : memref<1x128xf32, #tpu.memory_space<vmem>>, vector<1x128xf32>
    %4 = vector.shape_cast %3 : vector<1x128xf32> to vector<1x1x128xf32>
    %5 = vector.broadcast %4 : vector<1x1x128xf32> to vector<8x8x128xf32>
    %6 = arith.mulf %2, %5 : vector<8x8x128xf32>
    %c0_5 = arith.constant 0 : index
    %c0_6 = arith.constant 0 : index
    %7 = vector.load %arg3[%c0_5, %c0_6] : memref<1x128xf32, #tpu.memory_space<vmem>>, vector<1x128xf32>
    %8 = vector.shape_cast %7 : vector<1x128xf32> to vector<1x1x128xf32>
    %9 = vector.broadcast %8 : vector<1x1x128xf32> to vector<8x8x128xf32>
    %10 = arith.addf %6, %9 : vector<8x8x128xf32>
    %cst = arith.constant 0.000000e+00 : f32
    %11 = vector.broadcast %cst : f32 to vector<8x1x128xf32>
    %12 = tpu.concatenate %11, %10, %11 in 1 : vector<8x1x128xf32>, vector<8x8x128xf32>, vector<8x1x128xf32> -> vector<8x10x128xf32>
    %cst_7 = arith.constant 5.000000e-01 : f32
    %13 = vector.broadcast %cst_7 : f32 to vector<8x10x128xf32>
    %14 = arith.mulf %13, %12 : vector<8x10x128xf32>
    %15 = arith.mulf %12, %12 : vector<8x10x128xf32>
    %16 = arith.mulf %15, %12 : vector<8x10x128xf32>
    %cst_8 = arith.constant 4.471500e-02 : f32
    %17 = vector.broadcast %cst_8 : f32 to vector<8x10x128xf32>
    %18 = arith.mulf %17, %16 : vector<8x10x128xf32>
    %19 = arith.addf %12, %18 : vector<8x10x128xf32>
    %cst_9 = arith.constant 0.797884583 : f32
    %20 = vector.broadcast %cst_9 : f32 to vector<8x10x128xf32>
    %21 = arith.mulf %20, %19 : vector<8x10x128xf32>
    %22 = math.tanh %21 : vector<8x10x128xf32>
    %cst_10 = arith.constant 1.000000e+00 : f32
    %23 = vector.broadcast %cst_10 : f32 to vector<8x10x128xf32>
    %24 = arith.addf %23, %22 : vector<8x10x128xf32>
    %25 = arith.mulf %14, %24 : vector<8x10x128xf32>
    %26 = arith.truncf %25 : vector<8x10x128xf32> to vector<8x10x128xbf16>
    %cst_11 = arith.constant 0.000000e+00 : bf16
    %27 = vector.broadcast %cst_11 : bf16 to vector<1x10x128xbf16>
    %c0_12 = arith.constant 0 : index
    %c0_13 = arith.constant 0 : index
    %c0_14 = arith.constant 0 : index
    %c0_15 = arith.constant 0 : index
    %28 = vector.load %arg4[%c0_12, %c0_13, %c0_14, %c0_15] : memref<1x10x10x128xbf16, #tpu.memory_space<vmem>>, vector<1x1x10x128xbf16>
    %29 = vector.shape_cast %28 : vector<1x1x10x128xbf16> to vector<1x10x128xbf16>
    %30 = vector.shape_cast %27 : vector<1x10x128xbf16> to vector<1x1x10x128xbf16>
    tpu.vector_store %arg4[%c0_12, %c0_13, %c0_14, %c0_15], %30 {strides = array<i32>} : memref<1x10x10x128xbf16, #tpu.memory_space<vmem>>, vector<1x1x10x128xbf16>,
    %c0_16 = arith.constant 0 : index
    %c9 = arith.constant 9 : index
    %c0_17 = arith.constant 0 : index
    %c0_18 = arith.constant 0 : index
    %31 = vector.load %arg4[%c0_16, %c9, %c0_17, %c0_18] : memref<1x10x10x128xbf16, #tpu.memory_space<vmem>>, vector<1x1x10x128xbf16>
    %32 = vector.shape_cast %31 : vector<1x1x10x128xbf16> to vector<1x10x128xbf16>
    %33 = vector.shape_cast %27 : vector<1x10x128xbf16> to vector<1x1x10x128xbf16>
    tpu.vector_store %arg4[%c0_16, %c9, %c0_17, %c0_18], %33 {strides = array<i32>} : memref<1x10x10x128xbf16, #tpu.memory_space<vmem>>, vector<1x1x10x128xbf16>,
    %c0_19 = arith.constant 0 : index
    %c1 = arith.constant 1 : index
    %c0_20 = arith.constant 0 : index
    %c0_21 = arith.constant 0 : index
    %34 = vector.load %arg4[%c0_19, %c1, %c0_20, %c0_21] : memref<1x10x10x128xbf16, #tpu.memory_space<vmem>>, vector<1x8x10x128xbf16>
    %35 = vector.shape_cast %34 : vector<1x8x10x128xbf16> to vector<8x10x128xbf16>
    %36 = vector.shape_cast %26 : vector<8x10x128xbf16> to vector<1x8x10x128xbf16>
    tpu.vector_store %arg4[%c0_19, %c1, %c0_20, %c0_21], %36 {strides = array<i32>} : memref<1x10x10x128xbf16, #tpu.memory_space<vmem>>, vector<1x8x10x128xbf16>,
    return
  }
  func.func @transform_0(%arg0: i32) -> (i32, i32, i32, i32) {
    %c0_i32 = arith.constant 0 : i32
    %c0_i32_0 = arith.constant 0 : i32
    %c0_i32_1 = arith.constant 0 : i32
    %c0_i32_2 = arith.constant 0 : i32
    return %arg0, %c0_i32, %c0_i32_0, %c0_i32_1 : i32, i32, i32, i32
  }
  func.func @transform_1(%arg0: i32) -> (i32, i32) {
    %c0_i32 = arith.constant 0 : i32
    %c0_i32_0 = arith.constant 0 : i32
    %c0_i32_1 = arith.constant 0 : i32
    return %c0_i32, %c0_i32_0 : i32, i32
  }
  func.func @transform_2(%arg0: i32) -> (i32, i32) {
    %c0_i32 = arith.constant 0 : i32
    %c0_i32_0 = arith.constant 0 : i32
    %c0_i32_1 = arith.constant 0 : i32
    return %c0_i32, %c0_i32_0 : i32, i32
  }
  func.func @transform_3(%arg0: i32) -> (i32, i32, i32, i32) {
    %c0_i32 = arith.constant 0 : i32
    %c0_i32_0 = arith.constant 0 : i32
    %c0_i32_1 = arith.constant 0 : i32
    %c0_i32_2 = arith.constant 0 : i32
    return %arg0, %c0_i32, %c0_i32_0, %c0_i32_1 : i32, i32, i32, i32
  }
}

module attributes {stable_mosaic.version = 11 : i64} {
  func.func @kernel(%arg0: i32, %arg1: memref<1x8x8x128xbf16, #tpu.memory_space<vmem>>, %arg2: memref<1x128xf32, #tpu.memory_space<vmem>>, %arg3: memref<1x128xf32, #tpu.memory_space<vmem>>, %arg4: memref<1x10x10x128xbf16, #tpu.memory_space<vmem>>, %arg5: memref<1x10x10x128xbf16, #tpu.memory_space<vmem>>) attributes {dimension_semantics = [#tpu.dimension_semantics<parallel>], iteration_bounds = array<i64: 16>, scalar_prefetch = 0 : i64, scratch_operands = 0 : i64, tpu.core_type = #tpu.core_type<tc>, window_params = [{transform_indices = @transform_0, window_bounds = array<i64: 1, 8, 8, 128>}, {pipeline_mode = #tpu.pipeline_mode<synchronous>, transform_indices = @transform_1, window_bounds = array<i64: 1, 128>}, {pipeline_mode = #tpu.pipeline_mode<synchronous>, transform_indices = @transform_2, window_bounds = array<i64: 1, 128>}, {transform_indices = @transform_3, window_bounds = array<i64: 1, 10, 10, 128>}, {transform_indices = @transform_4, window_bounds = array<i64: 1, 10, 10, 128>}]} {
    %c0 = arith.constant 0 : index
    %c0_0 = arith.constant 0 : index
    %c0_1 = arith.constant 0 : index
    %c0_2 = arith.constant 0 : index
    %0 = vector.load %arg1[%c0, %c0_0, %c0_1, %c0_2] : memref<1x8x8x128xbf16, #tpu.memory_space<vmem>>, vector<1x8x8x128xbf16>
    %1 = vector.shape_cast %0 : vector<1x8x8x128xbf16> to vector<8x8x128xbf16>
    %2 = arith.extf %1 : vector<8x8x128xbf16> to vector<8x8x128xf32>
    %c0_3 = arith.constant 0 : index
    %c0_4 = arith.constant 0 : index
    %3 = vector.load %arg2[%c0_3, %c0_4] : memref<1x128xf32, #tpu.memory_space<vmem>>, vector<1x128xf32>
    %4 = vector.shape_cast %3 : vector<1x128xf32> to vector<1x1x128xf32>
    %5 = vector.broadcast %4 : vector<1x1x128xf32> to vector<8x8x128xf32>
    %6 = arith.mulf %2, %5 : vector<8x8x128xf32>
    %c0_5 = arith.constant 0 : index
    %c0_6 = arith.constant 0 : index
    %7 = vector.load %arg3[%c0_5, %c0_6] : memref<1x128xf32, #tpu.memory_space<vmem>>, vector<1x128xf32>
    %8 = vector.shape_cast %7 : vector<1x128xf32> to vector<1x1x128xf32>
    %9 = vector.broadcast %8 : vector<1x1x128xf32> to vector<8x8x128xf32>
    %10 = arith.addf %6, %9 : vector<8x8x128xf32>
    %cst = arith.constant 0.000000e+00 : f32
    %11 = vector.broadcast %cst : f32 to vector<8x1x128xf32>
    %12 = tpu.concatenate %11, %10, %11 in 1 : vector<8x1x128xf32>, vector<8x8x128xf32>, vector<8x1x128xf32> -> vector<8x10x128xf32>
    %c0_7 = arith.constant 0 : index
    %c1 = arith.constant 1 : index
    %c0_8 = arith.constant 0 : index
    %c0_9 = arith.constant 0 : index
    %13 = vector.load %arg4[%c0_7, %c1, %c0_8, %c0_9] : memref<1x10x10x128xbf16, #tpu.memory_space<vmem>>, vector<1x8x10x128xbf16>
    %14 = vector.shape_cast %13 : vector<1x8x10x128xbf16> to vector<8x10x128xbf16>
    %15 = arith.extf %14 : vector<8x10x128xbf16> to vector<8x10x128xf32>
    %16 = arith.addf %12, %15 : vector<8x10x128xf32>
    %cst_10 = arith.constant 5.000000e-01 : f32
    %17 = vector.broadcast %cst_10 : f32 to vector<8x10x128xf32>
    %18 = arith.mulf %17, %16 : vector<8x10x128xf32>
    %19 = arith.mulf %16, %16 : vector<8x10x128xf32>
    %20 = arith.mulf %19, %16 : vector<8x10x128xf32>
    %cst_11 = arith.constant 4.471500e-02 : f32
    %21 = vector.broadcast %cst_11 : f32 to vector<8x10x128xf32>
    %22 = arith.mulf %21, %20 : vector<8x10x128xf32>
    %23 = arith.addf %16, %22 : vector<8x10x128xf32>
    %cst_12 = arith.constant 0.797884583 : f32
    %24 = vector.broadcast %cst_12 : f32 to vector<8x10x128xf32>
    %25 = arith.mulf %24, %23 : vector<8x10x128xf32>
    %26 = math.tanh %25 : vector<8x10x128xf32>
    %cst_13 = arith.constant 1.000000e+00 : f32
    %27 = vector.broadcast %cst_13 : f32 to vector<8x10x128xf32>
    %28 = arith.addf %27, %26 : vector<8x10x128xf32>
    %29 = arith.mulf %18, %28 : vector<8x10x128xf32>
    %30 = arith.truncf %29 : vector<8x10x128xf32> to vector<8x10x128xbf16>
    %cst_14 = arith.constant 0.000000e+00 : bf16
    %31 = vector.broadcast %cst_14 : bf16 to vector<1x10x128xbf16>
    %c0_15 = arith.constant 0 : index
    %c0_16 = arith.constant 0 : index
    %c0_17 = arith.constant 0 : index
    %c0_18 = arith.constant 0 : index
    %32 = vector.load %arg5[%c0_15, %c0_16, %c0_17, %c0_18] : memref<1x10x10x128xbf16, #tpu.memory_space<vmem>>, vector<1x1x10x128xbf16>
    %33 = vector.shape_cast %32 : vector<1x1x10x128xbf16> to vector<1x10x128xbf16>
    %34 = vector.shape_cast %31 : vector<1x10x128xbf16> to vector<1x1x10x128xbf16>
    tpu.vector_store %arg5[%c0_15, %c0_16, %c0_17, %c0_18], %34 {strides = array<i32>} : memref<1x10x10x128xbf16, #tpu.memory_space<vmem>>, vector<1x1x10x128xbf16>,
    %c0_19 = arith.constant 0 : index
    %c9 = arith.constant 9 : index
    %c0_20 = arith.constant 0 : index
    %c0_21 = arith.constant 0 : index
    %35 = vector.load %arg5[%c0_19, %c9, %c0_20, %c0_21] : memref<1x10x10x128xbf16, #tpu.memory_space<vmem>>, vector<1x1x10x128xbf16>
    %36 = vector.shape_cast %35 : vector<1x1x10x128xbf16> to vector<1x10x128xbf16>
    %37 = vector.shape_cast %31 : vector<1x10x128xbf16> to vector<1x1x10x128xbf16>
    tpu.vector_store %arg5[%c0_19, %c9, %c0_20, %c0_21], %37 {strides = array<i32>} : memref<1x10x10x128xbf16, #tpu.memory_space<vmem>>, vector<1x1x10x128xbf16>,
    %c0_22 = arith.constant 0 : index
    %c1_23 = arith.constant 1 : index
    %c0_24 = arith.constant 0 : index
    %c0_25 = arith.constant 0 : index
    %38 = vector.load %arg5[%c0_22, %c1_23, %c0_24, %c0_25] : memref<1x10x10x128xbf16, #tpu.memory_space<vmem>>, vector<1x8x10x128xbf16>
    %39 = vector.shape_cast %38 : vector<1x8x10x128xbf16> to vector<8x10x128xbf16>
    %40 = vector.shape_cast %30 : vector<8x10x128xbf16> to vector<1x8x10x128xbf16>
    tpu.vector_store %arg5[%c0_22, %c1_23, %c0_24, %c0_25], %40 {strides = array<i32>} : memref<1x10x10x128xbf16, #tpu.memory_space<vmem>>, vector<1x8x10x128xbf16>,
    return
  }
  func.func @transform_0(%arg0: i32) -> (i32, i32, i32, i32) {
    %c0_i32 = arith.constant 0 : i32
    %c0_i32_0 = arith.constant 0 : i32
    %c0_i32_1 = arith.constant 0 : i32
    %c0_i32_2 = arith.constant 0 : i32
    return %arg0, %c0_i32, %c0_i32_0, %c0_i32_1 : i32, i32, i32, i32
  }
  func.func @transform_1(%arg0: i32) -> (i32, i32) {
    %c0_i32 = arith.constant 0 : i32
    %c0_i32_0 = arith.constant 0 : i32
    %c0_i32_1 = arith.constant 0 : i32
    return %c0_i32, %c0_i32_0 : i32, i32
  }
  func.func @transform_2(%arg0: i32) -> (i32, i32) {
    %c0_i32 = arith.constant 0 : i32
    %c0_i32_0 = arith.constant 0 : i32
    %c0_i32_1 = arith.constant 0 : i32
    return %c0_i32, %c0_i32_0 : i32, i32
  }
  func.func @transform_3(%arg0: i32) -> (i32, i32, i32, i32) {
    %c0_i32 = arith.constant 0 : i32
    %c0_i32_0 = arith.constant 0 : i32
    %c0_i32_1 = arith.constant 0 : i32
    %c0_i32_2 = arith.constant 0 : i32
    return %arg0, %c0_i32, %c0_i32_0, %c0_i32_1 : i32, i32, i32, i32
  }
  func.func @transform_4(%arg0: i32) -> (i32, i32, i32, i32) {
    %c0_i32 = arith.constant 0 : i32
    %c0_i32_0 = arith.constant 0 : i32
    %c0_i32_1 = arith.constant 0 : i32
    %c0_i32_2 = arith.constant 0 : i32
    return %arg0, %c0_i32, %c0_i32_0, %c0_i32_1 : i32, i32, i32, i32
  }
}

module attributes {stable_mosaic.version = 11 : i64} {
  func.func @_affine_gelu_stage_kernel(%arg0: i32, %arg1: memref<1x8x8x128xbf16, #tpu.memory_space<vmem>>, %arg2: memref<1x128xf32, #tpu.memory_space<vmem>>, %arg3: memref<1x128xf32, #tpu.memory_space<vmem>>, %arg4: memref<1x10x10x128xbf16, #tpu.memory_space<vmem>>, %arg5: memref<1x10x10x128xbf16, #tpu.memory_space<vmem>>, %arg6: memref<1x8x8x128xbf16, #tpu.memory_space<vmem>>) attributes {dimension_semantics = [#tpu.dimension_semantics<parallel>], iteration_bounds = array<i64: 16>, scalar_prefetch = 0 : i64, scratch_operands = 0 : i64, tpu.core_type = #tpu.core_type<tc>, window_params = [{transform_indices = @transform_0, window_bounds = array<i64: 1, 8, 8, 128>}, {pipeline_mode = #tpu.pipeline_mode<synchronous>, transform_indices = @transform_1, window_bounds = array<i64: 1, 128>}, {pipeline_mode = #tpu.pipeline_mode<synchronous>, transform_indices = @transform_2, window_bounds = array<i64: 1, 128>}, {transform_indices = @transform_3, window_bounds = array<i64: 1, 10, 10, 128>}, {transform_indices = @transform_4, window_bounds = array<i64: 1, 10, 10, 128>}, {transform_indices = @transform_5, window_bounds = array<i64: 1, 8, 8, 128>}]} {
    %c0 = arith.constant 0 : index
    %c0_0 = arith.constant 0 : index
    %c0_1 = arith.constant 0 : index
    %c0_2 = arith.constant 0 : index
    %0 = vector.load %arg1[%c0, %c0_0, %c0_1, %c0_2] : memref<1x8x8x128xbf16, #tpu.memory_space<vmem>>, vector<1x8x8x128xbf16>
    %1 = vector.shape_cast %0 : vector<1x8x8x128xbf16> to vector<8x8x128xbf16>
    %2 = arith.extf %1 : vector<8x8x128xbf16> to vector<8x8x128xf32>
    %c0_3 = arith.constant 0 : index
    %c0_4 = arith.constant 0 : index
    %3 = vector.load %arg2[%c0_3, %c0_4] : memref<1x128xf32, #tpu.memory_space<vmem>>, vector<1x128xf32>
    %4 = vector.shape_cast %3 : vector<1x128xf32> to vector<1x1x128xf32>
    %5 = vector.broadcast %4 : vector<1x1x128xf32> to vector<8x8x128xf32>
    %6 = arith.mulf %2, %5 : vector<8x8x128xf32>
    %c0_5 = arith.constant 0 : index
    %c0_6 = arith.constant 0 : index
    %7 = vector.load %arg3[%c0_5, %c0_6] : memref<1x128xf32, #tpu.memory_space<vmem>>, vector<1x128xf32>
    %8 = vector.shape_cast %7 : vector<1x128xf32> to vector<1x1x128xf32>
    %9 = vector.broadcast %8 : vector<1x1x128xf32> to vector<8x8x128xf32>
    %10 = arith.addf %6, %9 : vector<8x8x128xf32>
    %c0_7 = arith.constant 0 : index
    %c1 = arith.constant 1 : index
    %c1_8 = arith.constant 1 : index
    %c0_9 = arith.constant 0 : index
    %11 = vector.load %arg4[%c0_7, %c1, %c1_8, %c0_9] : memref<1x10x10x128xbf16, #tpu.memory_space<vmem>>, vector<1x8x8x128xbf16>
    %12 = vector.shape_cast %11 : vector<1x8x8x128xbf16> to vector<8x8x128xbf16>
    %13 = arith.extf %12 : vector<8x8x128xbf16> to vector<8x8x128xf32>
    %14 = arith.addf %10, %13 : vector<8x8x128xf32>
    %cst = arith.constant 5.000000e-01 : f32
    %15 = vector.broadcast %cst : f32 to vector<8x8x128xf32>
    %16 = arith.mulf %15, %14 : vector<8x8x128xf32>
    %17 = arith.mulf %14, %14 : vector<8x8x128xf32>
    %18 = arith.mulf %17, %14 : vector<8x8x128xf32>
    %cst_10 = arith.constant 4.471500e-02 : f32
    %19 = vector.broadcast %cst_10 : f32 to vector<8x8x128xf32>
    %20 = arith.mulf %19, %18 : vector<8x8x128xf32>
    %21 = arith.addf %14, %20 : vector<8x8x128xf32>
    %cst_11 = arith.constant 0.797884583 : f32
    %22 = vector.broadcast %cst_11 : f32 to vector<8x8x128xf32>
    %23 = arith.mulf %22, %21 : vector<8x8x128xf32>
    %24 = math.tanh %23 : vector<8x8x128xf32>
    %cst_12 = arith.constant 1.000000e+00 : f32
    %25 = vector.broadcast %cst_12 : f32 to vector<8x8x128xf32>
    %26 = arith.addf %25, %24 : vector<8x8x128xf32>
    %27 = arith.mulf %16, %26 : vector<8x8x128xf32>
    %c0_13 = arith.constant 0 : index
    %c1_14 = arith.constant 1 : index
    %c1_15 = arith.constant 1 : index
    %c0_16 = arith.constant 0 : index
    %28 = vector.load %arg5[%c0_13, %c1_14, %c1_15, %c0_16] : memref<1x10x10x128xbf16, #tpu.memory_space<vmem>>, vector<1x8x8x128xbf16>
    %29 = vector.shape_cast %28 : vector<1x8x8x128xbf16> to vector<8x8x128xbf16>
    %30 = arith.extf %29 : vector<8x8x128xbf16> to vector<8x8x128xf32>
    %31 = arith.addf %27, %30 : vector<8x8x128xf32>
    %32 = arith.truncf %31 : vector<8x8x128xf32> to vector<8x8x128xbf16>
    %c0_17 = arith.constant 0 : index
    %c0_18 = arith.constant 0 : index
    %c0_19 = arith.constant 0 : index
    %c0_20 = arith.constant 0 : index
    %33 = vector.load %arg6[%c0_17, %c0_18, %c0_19, %c0_20] : memref<1x8x8x128xbf16, #tpu.memory_space<vmem>>, vector<1x8x8x128xbf16>
    %34 = vector.shape_cast %33 : vector<1x8x8x128xbf16> to vector<8x8x128xbf16>
    %35 = vector.shape_cast %32 : vector<8x8x128xbf16> to vector<1x8x8x128xbf16>
    tpu.vector_store %arg6[%c0_17, %c0_18, %c0_19, %c0_20], %35 {strides = array<i32>} : memref<1x8x8x128xbf16, #tpu.memory_space<vmem>>, vector<1x8x8x128xbf16>,
    return
  }
  func.func @transform_0(%arg0: i32) -> (i32, i32, i32, i32) {
    %c0_i32 = arith.constant 0 : i32
    %c0_i32_0 = arith.constant 0 : i32
    %c0_i32_1 = arith.constant 0 : i32
    %c0_i32_2 = arith.constant 0 : i32
    return %arg0, %c0_i32, %c0_i32_0, %c0_i32_1 : i32, i32, i32, i32
  }
  func.func @transform_1(%arg0: i32) -> (i32, i32) {
    %c0_i32 = arith.constant 0 : i32
    %c0_i32_0 = arith.constant 0 : i32
    %c0_i32_1 = arith.constant 0 : i32
    return %c0_i32, %c0_i32_0 : i32, i32
  }
  func.func @transform_2(%arg0: i32) -> (i32, i32) {
    %c0_i32 = arith.constant 0 : i32
    %c0_i32_0 = arith.constant 0 : i32
    %c0_i32_1 = arith.constant 0 : i32
    return %c0_i32, %c0_i32_0 : i32, i32
  }
  func.func @transform_3(%arg0: i32) -> (i32, i32, i32, i32) {
    %c0_i32 = arith.constant 0 : i32
    %c0_i32_0 = arith.constant 0 : i32
    %c0_i32_1 = arith.constant 0 : i32
    %c0_i32_2 = arith.constant 0 : i32
    return %arg0, %c0_i32, %c0_i32_0, %c0_i32_1 : i32, i32, i32, i32
  }
  func.func @transform_4(%arg0: i32) -> (i32, i32, i32, i32) {
    %c0_i32 = arith.constant 0 : i32
    %c0_i32_0 = arith.constant 0 : i32
    %c0_i32_1 = arith.constant 0 : i32
    %c0_i32_2 = arith.constant 0 : i32
    return %arg0, %c0_i32, %c0_i32_0, %c0_i32_1 : i32, i32, i32, i32
  }
  func.func @transform_5(%arg0: i32) -> (i32, i32, i32, i32) {
    %c0_i32 = arith.constant 0 : i32
    %c0_i32_0 = arith.constant 0 : i32
    %c0_i32_1 = arith.constant 0 : i32
    %c0_i32_2 = arith.constant 0 : i32
    return %arg0, %c0_i32, %c0_i32_0, %c0_i32_1 : i32, i32, i32, i32
  }
}

module attributes {stable_mosaic.version = 11 : i64} {
  func.func @_maxpool_conv1x1_kernel(%arg0: i32, %arg1: memref<4x2x4x2x4x256xbf16, #tpu.memory_space<vmem>>, %arg2: memref<128x128xbf16, #tpu.memory_space<vmem>>, %arg3: memref<1x128xf32, #tpu.memory_space<vmem>>, %arg4: memref<4x4x4x128xf32, #tpu.memory_space<vmem>>) attributes {dimension_semantics = [#tpu.dimension_semantics<parallel>], iteration_bounds = array<i64: 2>, scalar_prefetch = 0 : i64, scratch_operands = 0 : i64, tpu.core_type = #tpu.core_type<tc>, window_params = [{transform_indices = @transform_0, window_bounds = array<i64: 4, 2, 4, 2, 4, 256>}, {pipeline_mode = #tpu.pipeline_mode<synchronous>, transform_indices = @transform_1, window_bounds = array<i64: 128, 128>}, {pipeline_mode = #tpu.pipeline_mode<synchronous>, transform_indices = @transform_2, window_bounds = array<i64: 1, 128>}, {transform_indices = @transform_3, window_bounds = array<i64: 4, 4, 4, 128>}]} {
    %c0 = arith.constant 0 : index
    %c0_0 = arith.constant 0 : index
    %c0_1 = arith.constant 0 : index
    %c0_2 = arith.constant 0 : index
    %c0_3 = arith.constant 0 : index
    %c0_4 = arith.constant 0 : index
    %0 = vector.load %arg1[%c0, %c0_0, %c0_1, %c0_2, %c0_3, %c0_4] : memref<4x2x4x2x4x256xbf16, #tpu.memory_space<vmem>>, vector<4x1x4x1x4x128xbf16>
    %1 = vector.shape_cast %0 : vector<4x1x4x1x4x128xbf16> to vector<4x4x4x128xbf16>
    %c0_5 = arith.constant 0 : index
    %c0_6 = arith.constant 0 : index
    %c0_7 = arith.constant 0 : index
    %c0_8 = arith.constant 0 : index
    %c0_9 = arith.constant 0 : index
    %c128 = arith.constant 128 : index
    %2 = vector.load %arg1[%c0_5, %c0_6, %c0_7, %c0_8, %c0_9, %c128] : memref<4x2x4x2x4x256xbf16, #tpu.memory_space<vmem>>, vector<4x1x4x1x4x128xbf16>
    %3 = vector.shape_cast %2 : vector<4x1x4x1x4x128xbf16> to vector<4x4x4x128xbf16>
    %4 = arith.maximumf %1, %3 : vector<4x4x4x128xbf16>
    %c0_10 = arith.constant 0 : index
    %c0_11 = arith.constant 0 : index
    %c0_12 = arith.constant 0 : index
    %c1 = arith.constant 1 : index
    %c0_13 = arith.constant 0 : index
    %c0_14 = arith.constant 0 : index
    %5 = vector.load %arg1[%c0_10, %c0_11, %c0_12, %c1, %c0_13, %c0_14] : memref<4x2x4x2x4x256xbf16, #tpu.memory_space<vmem>>, vector<4x1x4x1x4x128xbf16>
    %6 = vector.shape_cast %5 : vector<4x1x4x1x4x128xbf16> to vector<4x4x4x128xbf16>
    %7 = arith.maximumf %4, %6 : vector<4x4x4x128xbf16>
    %c0_15 = arith.constant 0 : index
    %c0_16 = arith.constant 0 : index
    %c0_17 = arith.constant 0 : index
    %c1_18 = arith.constant 1 : index
    %c0_19 = arith.constant 0 : index
    %c128_20 = arith.constant 128 : index
    %8 = vector.load %arg1[%c0_15, %c0_16, %c0_17, %c1_18, %c0_19, %c128_20] : memref<4x2x4x2x4x256xbf16, #tpu.memory_space<vmem>>, vector<4x1x4x1x4x128xbf16>
    %9 = vector.shape_cast %8 : vector<4x1x4x1x4x128xbf16> to vector<4x4x4x128xbf16>
    %10 = arith.maximumf %7, %9 : vector<4x4x4x128xbf16>
    %c0_21 = arith.constant 0 : index
    %c1_22 = arith.constant 1 : index
    %c0_23 = arith.constant 0 : index
    %c0_24 = arith.constant 0 : index
    %c0_25 = arith.constant 0 : index
    %c0_26 = arith.constant 0 : index
    %11 = vector.load %arg1[%c0_21, %c1_22, %c0_23, %c0_24, %c0_25, %c0_26] : memref<4x2x4x2x4x256xbf16, #tpu.memory_space<vmem>>, vector<4x1x4x1x4x128xbf16>
    %12 = vector.shape_cast %11 : vector<4x1x4x1x4x128xbf16> to vector<4x4x4x128xbf16>
    %13 = arith.maximumf %10, %12 : vector<4x4x4x128xbf16>
    %c0_27 = arith.constant 0 : index
    %c1_28 = arith.constant 1 : index
    %c0_29 = arith.constant 0 : index
    %c0_30 = arith.constant 0 : index
    %c0_31 = arith.constant 0 : index
    %c128_32 = arith.constant 128 : index
    %14 = vector.load %arg1[%c0_27, %c1_28, %c0_29, %c0_30, %c0_31, %c128_32] : memref<4x2x4x2x4x256xbf16, #tpu.memory_space<vmem>>, vector<4x1x4x1x4x128xbf16>
    %15 = vector.shape_cast %14 : vector<4x1x4x1x4x128xbf16> to vector<4x4x4x128xbf16>
    %16 = arith.maximumf %13, %15 : vector<4x4x4x128xbf16>
    %c0_33 = arith.constant 0 : index
    %c1_34 = arith.constant 1 : index
    %c0_35 = arith.constant 0 : index
    %c1_36 = arith.constant 1 : index
    %c0_37 = arith.constant 0 : index
    %c0_38 = arith.constant 0 : index
    %17 = vector.load %arg1[%c0_33, %c1_34, %c0_35, %c1_36, %c0_37, %c0_38] : memref<4x2x4x2x4x256xbf16, #tpu.memory_space<vmem>>, vector<4x1x4x1x4x128xbf16>
    %18 = vector.shape_cast %17 : vector<4x1x4x1x4x128xbf16> to vector<4x4x4x128xbf16>
    %19 = arith.maximumf %16, %18 : vector<4x4x4x128xbf16>
    %c0_39 = arith.constant 0 : index
    %c1_40 = arith.constant 1 : index
    %c0_41 = arith.constant 0 : index
    %c1_42 = arith.constant 1 : index
    %c0_43 = arith.constant 0 : index
    %c128_44 = arith.constant 128 : index
    %20 = vector.load %arg1[%c0_39, %c1_40, %c0_41, %c1_42, %c0_43, %c128_44] : memref<4x2x4x2x4x256xbf16, #tpu.memory_space<vmem>>, vector<4x1x4x1x4x128xbf16>
    %21 = vector.shape_cast %20 : vector<4x1x4x1x4x128xbf16> to vector<4x4x4x128xbf16>
    %22 = arith.maximumf %19, %21 : vector<4x4x4x128xbf16>
    %23 = vector.shape_cast %22 : vector<4x4x4x128xbf16> to vector<64x128xbf16>
    %c0_45 = arith.constant 0 : index
    %c0_46 = arith.constant 0 : index
    %24 = vector.load %arg2[%c0_45, %c0_46] : memref<128x128xbf16, #tpu.memory_space<vmem>>, vector<128x128xbf16>
    %cst = arith.constant dense<0.000000e+00> : vector<64x128xf32>
    %25 = tpu.matmul %23, %24, %cst {dimension_numbers = #tpu.dot_dimension_numbers<[1], [0], [0], [1], [0, 0, 1, 1], [], []>} : vector<64x128xbf16>, vector<128x128xbf16>, vector<64x128xf32> -> vector<64x128xf32>
    %c0_47 = arith.constant 0 : index
    %c0_48 = arith.constant 0 : index
    %26 = vector.load %arg3[%c0_47, %c0_48] : memref<1x128xf32, #tpu.memory_space<vmem>>, vector<1x128xf32>
    %27 = vector.broadcast %26 : vector<1x128xf32> to vector<64x128xf32>
    %28 = arith.addf %25, %27 : vector<64x128xf32>
    %29 = vector.shape_cast %28 : vector<64x128xf32> to vector<4x4x4x128xf32>
    %c0_49 = arith.constant 0 : index
    %c0_50 = arith.constant 0 : index
    %c0_51 = arith.constant 0 : index
    %c0_52 = arith.constant 0 : index
    %30 = vector.load %arg4[%c0_49, %c0_50, %c0_51, %c0_52] : memref<4x4x4x128xf32, #tpu.memory_space<vmem>>, vector<4x4x4x128xf32>
    tpu.vector_store %arg4[%c0_49, %c0_50, %c0_51, %c0_52], %29 {strides = array<i32>} : memref<4x4x4x128xf32, #tpu.memory_space<vmem>>, vector<4x4x4x128xf32>,
    return
  }
  func.func @transform_0(%arg0: i32) -> (i32, i32, i32, i32, i32, i32) {
    %c0_i32 = arith.constant 0 : i32
    %c0_i32_0 = arith.constant 0 : i32
    %c0_i32_1 = arith.constant 0 : i32
    %c0_i32_2 = arith.constant 0 : i32
    %c0_i32_3 = arith.constant 0 : i32
    %c0_i32_4 = arith.constant 0 : i32
    return %arg0, %c0_i32, %c0_i32_0, %c0_i32_1, %c0_i32_2, %c0_i32_3 : i32, i32, i32, i32, i32, i32
  }
  func.func @transform_1(%arg0: i32) -> (i32, i32) {
    %c0_i32 = arith.constant 0 : i32
    %c0_i32_0 = arith.constant 0 : i32
    %c0_i32_1 = arith.constant 0 : i32
    return %c0_i32, %c0_i32_0 : i32, i32
  }
  func.func @transform_2(%arg0: i32) -> (i32, i32) {
    %c0_i32 = arith.constant 0 : i32
    %c0_i32_0 = arith.constant 0 : i32
    %c0_i32_1 = arith.constant 0 : i32
    return %c0_i32, %c0_i32_0 : i32, i32
  }
  func.func @transform_3(%arg0: i32) -> (i32, i32, i32, i32) {
    %c0_i32 = arith.constant 0 : i32
    %c0_i32_0 = arith.constant 0 : i32
    %c0_i32_1 = arith.constant 0 : i32
    %c0_i32_2 = arith.constant 0 : i32
    return %arg0, %c0_i32, %c0_i32_0, %c0_i32_1 : i32, i32, i32, i32
  }
}

</mosaic_0001>

<bundles_post_ra>
// kernel: swin_stage_forward.10
= control target key start
LH: loop header
LB: loop body
LE: loop exit
PB: predicated region body
PF: predicated region fallthrough
CT: control target
= control target key end

     0   :  { %s611_s12 = smov 0   ;;  %s748_s0 = inlined_call_operand.vmem [shape: bf16[16,8,8,128], index: 0, kind: input, shape index: {}]   ;;  %s749_s1 = inlined_call_operand.vmem [shape: f32[1,128], index: 1, kind: input, shape index: {}]   ;;  %s750_s2 = inlined_call_operand.vmem [shape: f32[1,128], index: 2, kind: input, shape index: {}]   ;;  %s751_s3 = inlined_call_operand.vmem [shape: bf16[16,10,10,128], index: 3, kind: output, shape index: {}]  }
   0x1 LB: > { %s490_s13 = sadd.s32 4294967295, %s588_s12   ;;  %p494_p0 = scmp.ge.s32.totalorder %s588_s12, 1  ;;  %s588_s12 = sphi %s611_s12, %s13_s12  }
   0x2   : > { %p137_p1 = scmp.lt.s32.totalorder %s588_s12, 17 }
   0x4   : > { %p138_p2 = pnand %p494_p0, %p137_p1 }
   0x5   : > { %p161_p3 = scmp.lt.s32.totalorder (!%p138_p2), %s490_s13, 15 }
   0x6   : > { %141 = sbr.rel (%p138_p2) target bundleno = 81 (0x51), region = 32 }
   0xb   : > { %s753_s13 = smov (!%p161_p3, %s490_s13), 15  ;;  %v548_v0 = vld [vmem:[%s749_s1] ss:$0 sm:$0xff]  ;;  %v590_v4 = vmov 0   ;;  %vm236_vm0 = vcmask 1040384  }
   0xc   : > { %s538_s14 = smul.u32 80, %s753_s13  ;;  %s518_s15 = sshll.u32 %s753_s13, 5  ;;  %v549_v6 = vld [vmem:[%s750_s2] ss:$0 sm:$0xff] }
   0xd   : > { %s165_s18 = scalar_lea.vmem %s748_s0, %s518_s15 }
   0xe   : > { %s628_s23 = scalar_lea.vmem %s751_s3, %s538_s14  ;;  %v520_v1 = vld [vmem:[%s165_s18] sm:$0xff]   ;;  %v535_v2 = vld [vmem:[%s165_s18 + $0x8] sm:$0xff]   ;;  %v536_v3 = vld [vmem:[%s165_s18 + $0x10] sm:$0xff]  }
   0xf   : > { %413 = vst [vmem:[%s628_s23] sm:$0xf] %v590_v4  ;;  %v521_v5 = vunpack.c.l.bf16 %v520_v1  ;;  %v522_v7 = vunpack.c.h.bf16 %v520_v1  ;;  %v525_v8 = vunpack.c.l.bf16 %v535_v2  ;;  %v526_v9 = vunpack.c.h.bf16 %v535_v2  ;;  %v537_v10 = vld [vmem:[%s165_s18 + $0x18] sm:$0xff]  }
  0x10   : > { %414 = vst [vmem:[%s628_s23 + $0x4] sm:$0x1] %v590_v4  ;;  %v529_v11 = vunpack.c.l.bf16 %v536_v3  ;;  %v530_v12 = vunpack.c.h.bf16 %v536_v3  ;;  %v533_v13 = vunpack.c.l.bf16 %v537_v10  ;;  %v534_v14 = vunpack.c.h.bf16 %v537_v10 }
  0x11   : > { %498 = vst [vmem:[%s628_s23 + $0x48] sm:$0xf] %v590_v4  ;;  %v192_v15 = vmul.f32 %v548_v0, %v521_v5  ;;  %v193_v16 = vmul.f32 %v548_v0, %v522_v7  ;;  %v194_v17 = vmul.f32 %v548_v0, %v525_v8  ;;  %v195_v18 = vmul.f32 %v548_v0, %v526_v9 }
  0x12   : > { %499 = vst [vmem:[%s628_s23 + $0x4c] sm:$0x1] %v590_v4  ;;  %v196_v19 = vmul.f32 %v548_v0, %v529_v11  ;;  %v197_v20 = vmul.f32 %v548_v0, %v530_v12  ;;  %v198_v21 = vmul.f32 %v548_v0, %v533_v13  ;;  %v199_v22 = vmul.f32 %v548_v0, %v534_v14 }
  0x13   : > { %v204_v23 = vadd.f32 %v549_v6, %v192_v15  ;;  %v205_v24 = vadd.f32 %v549_v6, %v193_v16  ;;  %v206_v25 = vadd.f32 %v549_v6, %v194_v17  ;;  %v207_v26 = vadd.f32 %v549_v6, %v195_v18 }
  0x14   : > { %v637_v27 = vadd.f32 %v549_v6, %v196_v19  ;;  %v639_v30 = vadd.f32 %v549_v6, %v197_v20  ;;  %v641_v31 = vadd.f32 %v549_v6, %v198_v21  ;;  %v643_v33 = vadd.f32 %v549_v6, %v199_v22 }
  0x15   : > { %v220_v28 = vrot.slane %v204_v23, 7  ;;  %v221_v29 = vrot.slane %v205_v24, 7  ;;  %v222_v32 = vrot.slane %v206_v25, 7  ;;  %v223_v40 = vrot.slane %v207_v26, 7 }
  0x16   : > { %v224_v41 = vrot.slane %v637_v27, 7  ;;  %v225_v44 = vrot.slane %v639_v30, 7  ;;  %v226_v45 = vrot.slane %v641_v31, 7  ;;  %v227_v53 = vrot.slane %v643_v33, 7 }
  0x17   : > { %v237_v34 = vsel %vm236_vm0, 0.0, %v220_v28  ;;  %v245_v35 = vsel %vm236_vm0, %v220_v28, 0.0  ;;  %v238_v36 = vsel %vm236_vm0, 0.0, %v221_v29  ;;  %v246_v37 = vsel %vm236_vm0, %v221_v29, 0.0 }
  0x18   : > { %v269_v38 = vmul.f32 %v237_v34, %v237_v34  ;;  %v270_v39 = vmul.f32 %v245_v35, %v245_v35  ;;  %v271_v42 = vmul.f32 %v238_v36, %v238_v36  ;;  %v272_v43 = vmul.f32 %v246_v37, %v246_v37 }
  0x19   : > { %v239_v48 = vsel %vm236_vm0, 0.0, %v222_v32  ;;  %v247_v49 = vsel %vm236_vm0, %v222_v32, 0.0  ;;  %v655_v54 = vmul.f32 0.5, %v237_v34  ;;  %v240_v61 = vsel %vm236_vm0, 0.0, %v223_v40 }
  0x1a   : > { %v285_v46 = vmul.f32 %v269_v38, %v237_v34  ;;  %v286_v47 = vmul.f32 %v270_v39, %v245_v35  ;;  %v287_v50 = vmul.f32 %v271_v42, %v238_v36  ;;  %v288_v51 = vmul.f32 %v272_v43, %v246_v37 }
  0x1b   : > { %v273_v52 = vmul.f32 %v239_v48, %v239_v48  ;;  %v274_v57 = vmul.f32 %v247_v49, %v247_v49  ;;  %v254_v63 = vmul.f32 0.5, %v245_v35  ;;  %v275_v5 = vmul.f32 %v240_v61, %v240_v61 }
  0x1c   : > { %v301_v55 = vmul.f32 0.044715, %v285_v46  ;;  %v302_v56 = vmul.f32 0.044715, %v286_v47  ;;  %v303_v58 = vmul.f32 0.044715, %v287_v50 }
  0x1d   : > { %v304_v59 = vmul.f32 0.044715, %v288_v51  ;;  %v289_v60 = vmul.f32 %v273_v52, %v239_v48  ;;  %v290_v1 = vmul.f32 %v274_v57, %v247_v49  ;;  %v291_v12 = vmul.f32 %v275_v5, %v240_v61 }
  0x1e   : > { %v317_v62 = vadd.f32 %v301_v55, %v237_v34  ;;  %v318_v0 = vadd.f32 %v302_v56, %v245_v35  ;;  %v319_v2 = vadd.f32 %v303_v58, %v238_v36  ;;  %v659_v14 = vsel %vm236_vm0, %v223_v40, 0.0 }
  0x1f   : > { %v320_v3 = vadd.f32 %v304_v59, %v246_v37  ;;  %v305_v4 = vmul.f32 0.044715, %v289_v60  ;;  %v306_v8 = vmul.f32 0.044715, %v290_v1  ;;  %v662_v15 = vsel %vm236_vm0, 0.0, %v224_v41 }
  0x20   : > { %v333_v6 = vmul.f32 0.7978846, %v317_v62  ;;  %v334_v7 = vmul.f32 0.7978846, %v318_v0  ;;  %v335_v9 = vmul.f32 0.7978846, %v319_v2  ;;  %v276_v21 = vmul.f32 %v659_v14, %v659_v14 }
  0x21   : > { %v336_v10 = vmul.f32 0.7978846, %v320_v3  ;;  %v321_v11 = vadd.f32 %v305_v4, %v239_v48  ;;  %v322_v13 = vadd.f32 %v306_v8, %v247_v49  ;;  %v255_v16 = vmul.f32 0.5, %v238_v36 }
  0x22   : > { %550 = vtanh.f32 %v333_v6  ;;  %v307_v18 = vmul.f32 0.044715, %v291_v12  ;;  %v256_v19 = vmul.f32 0.5, %v246_v37  ;;  %v277_v23 = vmul.f32 %v662_v15, %v662_v15 }
  0x23   : > { %552 = vtanh.f32 %v334_v7  ;;  %v337_v17 = vmul.f32 0.7978846, %v321_v11  ;;  %v338_v20 = vmul.f32 0.7978846, %v322_v13  ;;  %v669_v24 = vsel %vm236_vm0, %v224_v41, 0.0 }
  0x24   : > { %554 = vtanh.f32 %v335_v9  ;;  %v323_v22 = vadd.f32 %v307_v18, %v240_v61  ;;  %v257_v25 = vmul.f32 0.5, %v239_v48  ;;  %v292_v26 = vmul.f32 %v276_v21, %v659_v14 }
  0x25   : > { %556 = vtanh.f32 %v336_v10  ;;  %v278_v27 = vmul.f32 %v669_v24, %v669_v24  ;;  %v293_v29 = vmul.f32 %v277_v23, %v662_v15  ;;  %v678_v32 = vsel %vm236_vm0, 0.0, %v225_v44 }
  0x26   : > { %558 = vtanh.f32 %v337_v17  ;;  %v339_v28 = vmul.f32 0.7978846, %v323_v22  ;;  %v258_v35 = vmul.f32 0.5, %v247_v49  ;;  %v308_v36 = vmul.f32 0.044715, %v292_v26 }
  0x27   : > { %560 = vtanh.f32 %v338_v20  ;;  %v294_v37 = vmul.f32 %v278_v27, %v669_v24  ;;  %v279_v38 = vmul.f32 %v678_v32, %v678_v32  ;;  %v259_v41 = vmul.f32 0.5, %v240_v61 }
  0x28   : > { %v551_v34 = vpop.eup %550  ;;  %562 = vtanh.f32 %v339_v28  ;;  %v309_v42 = vmul.f32 0.044715, %v293_v29  ;;  %v324_v47 = vadd.f32 %v308_v36, %v659_v14  ;;  %v687_v49 = vsel %vm236_vm0, %v225_v44, 0.0 }
  0x29   : > { %v553_v39 = vpop.eup %552  ;;  %v365_v40 = vadd.f32 1.0, %v551_v34  ;;  %v310_v48 = vmul.f32 0.044715, %v294_v37  ;;  %v295_v56 = vmul.f32 %v279_v38, %v678_v32  ;;  %v280_v12 = vmul.f32 %v687_v49, %v687_v49 }
  0x2a   : > { %v555_v43 = vpop.eup %554  ;;  %v366_v46 = vadd.f32 1.0, %v553_v39  ;;  %v325_v55 = vadd.f32 %v309_v42, %v662_v15  ;;  %v340_v60 = vmul.f32 0.7978846, %v324_v47  ;;  %v701_v13 = vsel %vm236_vm0, 0.0, %v226_v45 }
  0x2b   : > { %v557_v50 = vpop.eup %556  ;;  %v381_v51 = vmul.f32 %v365_v40, %v655_v54  ;;  %v367_v52 = vadd.f32 1.0, %v555_v43  ;;  %v326_v61 = vadd.f32 %v310_v48, %v669_v24  ;;  %v311_v10 = vmul.f32 0.044715, %v295_v56 }
  0x2c   : > { %v559_v57 = vpop.eup %558  ;;  %v382_v58 = vmul.f32 %v366_v46, %v254_v63  ;;  %v368_v59 = vadd.f32 1.0, %v557_v50  ;;  %v341_v1 = vmul.f32 0.7978846, %v325_v55  ;;  %564 = vtanh.f32 %v340_v60 }
  0x2d   : > { %v561_v30 = vpop.eup %560  ;;  %v397_v62 = vpack.c.bf16 %v381_v51, %v381_v51  ;;  %v383_v44 = vmul.f32 %v367_v52, %v255_v16  ;;  %v369_v0 = vadd.f32 1.0, %v559_v57  ;;  %v342_v6 = vmul.f32 0.7978846, %v326_v61 }
  0x2e   : > { %v398_v54 = vpack.c.bf16 %v382_v58, %v382_v58  ;;  %v384_v2 = vmul.f32 %v368_v59, %v256_v19  ;;  %v370_v3 = vadd.f32 1.0, %v561_v30  ;;  %v563_v4 = vpop.eup %562  ;;  %566 = vtanh.f32 %v341_v1 }
  0x2f   : > { %500 = vst [vmem:[%s628_s23 + $0x8] sm:$0xf] %v397_v62  ;;  %v399_v5 = vpack.c.bf16 %v383_v44, %v383_v44  ;;  %v385_v63 = vmul.f32 %v369_v0, %v257_v25  ;;  %v371_v9 = vadd.f32 1.0, %v563_v4  ;;  %568 = vtanh.f32 %v342_v6 }
  0x30   : > { %501 = vst [vmem:[%s628_s23 + $0xc] sm:$0x1] %v398_v54  ;;  %v400_v7 = vpack.c.bf16 %v384_v2, %v384_v2  ;;  %v386_v8 = vmul.f32 %v370_v3, %v258_v35  ;;  %v260_v18 = vmul.f32 0.5, %v659_v14  ;;  %v327_v19 = vadd.f32 %v311_v10, %v678_v32 }
  0x31   : > { %502 = vst [vmem:[%s628_s23 + $0x10] sm:$0xf] %v399_v5  ;;  %v401_v11 = vpack.c.bf16 %v385_v63, %v385_v63  ;;  %v387_v17 = vmul.f32 %v371_v9, %v259_v41  ;;  %v296_v20 = vmul.f32 %v280_v12, %v687_v49  ;;  %v281_v21 = vmul.f32 %v701_v13, %v701_v13 }
  0x32   : > { %503 = vst [vmem:[%s628_s23 + $0x14] sm:$0x1] %v400_v7  ;;  %v402_v16 = vpack.c.bf16 %v386_v8, %v386_v8  ;;  %v251_v22 = vsel %vm236_vm0, %v226_v45, 0.0  ;;  %v716_v23 = vsel %vm236_vm0, 0.0, %v227_v53  ;;  %v565_v25 = vpop.eup %564  ;;  %v261_v26 = vmul.f32 0.5, %v662_v15 }
  0x33   : > { %504 = vst [vmem:[%s628_s23 + $0x18] sm:$0xf] %v401_v11  ;;  %v403_v14 = vpack.c.bf16 %v387_v17, %v387_v17  ;;  %v343_v27 = vmul.f32 0.7978846, %v327_v19  ;;  %v282_v28 = vmul.f32 %v251_v22, %v251_v22  ;;  %v372_v34 = vadd.f32 1.0, %v565_v25 }
  0x34   : > { %505 = vst [vmem:[%s628_s23 + $0x1c] sm:$0x1] %v402_v16  ;;  %v567_v29 = vpop.eup %566  ;;  %v262_v35 = vmul.f32 0.5, %v669_v24  ;;  %v312_v36 = vmul.f32 0.044715, %v296_v20  ;;  %v297_v31 = vmul.f32 %v281_v21, %v701_v13  ;;  %v283_v38 = vmul.f32 %v716_v23, %v716_v23 }
  0x35   : > { %506 = vst [vmem:[%s628_s23 + $0x20] sm:$0xf] %v403_v14  ;;  %v373_v45 = vadd.f32 1.0, %v567_v29  ;;  %570 = vtanh.f32 %v343_v27  ;;  %v298_v37 = vmul.f32 %v282_v28, %v251_v22  ;;  %v569_v39 = vpop.eup %568  ;;  %v388_v40 = vmul.f32 %v372_v34, %v260_v18 }
  0x36   : > { %v328_v15 = vadd.f32 %v312_v36, %v687_v49  ;;  %v313_v41 = vmul.f32 0.044715, %v297_v31  ;;  %v252_v24 = vsel %vm236_vm0, %v227_v53, 0.0  ;;  %v374_v43 = vadd.f32 1.0, %v569_v39 }
  0x37   : > { %v389_v42 = vmul.f32 %v373_v45, %v261_v26  ;;  %v314_v46 = vmul.f32 0.044715, %v298_v37  ;;  %v299_v47 = vmul.f32 %v283_v38, %v716_v23  ;;  %v404_v48 = vpack.c.bf16 %v388_v40, %v388_v40 }
  0x38   : > { %v344_v50 = vmul.f32 0.7978846, %v328_v15  ;;  %v329_v51 = vadd.f32 %v313_v41, %v701_v13  ;;  %v390_v55 = vmul.f32 %v374_v43, %v262_v35  ;;  %v263_v33 = vmul.f32 0.5, %v678_v32 }
  0x39   : > { %v405_v52 = vpack.c.bf16 %v389_v42, %v389_v42  ;;  %v330_v56 = vadd.f32 %v314_v46, %v251_v22  ;;  %v315_v57 = vmul.f32 0.044715, %v299_v47  ;;  %507 = vst [vmem:[%s628_s23 + $0x24] sm:$0x1] %v404_v48  ;;  %v284_v58 = vmul.f32 %v252_v24, %v252_v24 }
  0x3a   : > { %572 = vtanh.f32 %v344_v50  ;;  %v345_v53 = vmul.f32 0.7978846, %v329_v51  ;;  %v406_v60 = vpack.c.bf16 %v390_v55, %v390_v55  ;;  %v264_v32 = vmul.f32 0.5, %v687_v49 }
  0x3b   : > { %v571_v59 = vpop.eup %570  ;;  %508 = vst [vmem:[%s628_s23 + $0x28] sm:$0xf] %v405_v52  ;;  %v346_v61 = vmul.f32 0.7978846, %v330_v56  ;;  %v331_v30 = vadd.f32 %v315_v57, %v716_v23  ;;  %v300_v44 = vmul.f32 %v284_v58, %v252_v24  ;;  %v265_v63 = vmul.f32 0.5, %v701_v13 }
  0x3c   : > { %v375_v62 = vadd.f32 1.0, %v571_v59  ;;  %574 = vtanh.f32 %v345_v53  ;;  %509 = vst [vmem:[%s628_s23 + $0x2c] sm:$0x1] %v406_v60  ;;  %v266_v7 = vmul.f32 0.5, %v251_v22  ;;  %v267_v49 = vmul.f32 0.5, %v716_v23 }
  0x3d   : > { %576 = vtanh.f32 %v346_v61  ;;  %v347_v0 = vmul.f32 0.7978846, %v331_v30  ;;  %v316_v54 = vmul.f32 0.044715, %v300_v44  ;;  %v268_v25 = vmul.f32 0.5, %v252_v24 }
  0x3e   : > { %v391_v1 = vmul.f32 %v375_v62, %v263_v33 }
  0x3f   : > { %578 = vtanh.f32 %v347_v0  ;;  %v332_v4 = vadd.f32 %v316_v54, %v252_v24 }
  0x40   : > { %v573_v2 = vpop.eup %572  ;;  %v407_v3 = vpack.c.bf16 %v391_v1, %v391_v1 }
  0x41   : > { %v376_v5 = vadd.f32 1.0, %v573_v2  ;;  %v348_v8 = vmul.f32 0.7978846, %v332_v4 }
  0x42   : > { %v575_v6 = vpop.eup %574  ;;  %510 = vst [vmem:[%s628_s23 + $0x30] sm:$0xf] %v407_v3 }
  0x43   : > { %v577_v9 = vpop.eup %576  ;;  %v392_v10 = vmul.f32 %v376_v5, %v264_v32  ;;  %v377_v11 = vadd.f32 1.0, %v575_v6  ;;  %580 = vtanh.f32 %v348_v8 }
  0x44   : > { %v378_v12 = vadd.f32 1.0, %v577_v9 }
  0x45   : > { %v579_v16 = vpop.eup %578  ;;  %v408_v17 = vpack.c.bf16 %v392_v10, %v392_v10  ;;  %v393_v18 = vmul.f32 %v377_v11, %v265_v63 }
  0x46   : > { %v394_v13 = vmul.f32 %v378_v12, %v266_v7  ;;  %v379_v19 = vadd.f32 1.0, %v579_v16 }
  0x47   : > { %511 = vst [vmem:[%s628_s23 + $0x34] sm:$0x1] %v408_v17  ;;  %v409_v20 = vpack.c.bf16 %v393_v18, %v393_v18 }
  0x48   : > { %v410_v21 = vpack.c.bf16 %v394_v13, %v394_v13  ;;  %v395_v22 = vmul.f32 %v379_v19, %v267_v49 }
  0x49   : > { %512 = vst [vmem:[%s628_s23 + $0x38] sm:$0xf] %v409_v20  ;;  %v581_v14 = vpop.eup %580 }
  0x4a   : > { %513 = vst [vmem:[%s628_s23 + $0x3c] sm:$0x1] %v410_v21  ;;  %v411_v26 = vpack.c.bf16 %v395_v22, %v395_v22  ;;  %v380_v27 = vadd.f32 1.0, %v581_v14 }
  0x4c   : > { %514 = vst [vmem:[%s628_s23 + $0x40] sm:$0xf] %v411_v26  ;;  %v396_v23 = vmul.f32 %v380_v27, %v268_v25 }
  0x4e   : > { %v412_v28 = vpack.c.bf16 %v396_v23, %v396_v23 }
  0x50   : > { %515 = vst [vmem:[%s628_s23 + $0x44] sm:$0x1] %v412_v28 }
  0x51 PF: > { %s13_s12 = sadd.s32 1, %s588_s12  }
  0x52   : > { %p10_p4 = scmp.ge.s32.totalorder %s13_s12, 18  }
  0x54   :  { %12 = sbr.rel (!%p10_p4) target bundleno = 1 (0x1), region = 64 }

// kernel: swin_stage_forward.12
= control target key start
LH: loop header
LB: loop body
LE: loop exit
PB: predicated region body
PF: predicated region fallthrough
CT: control target
= control target key end

     0   :  { %s741_s15 = smov 0   ;;  %s904_s0 = inlined_call_operand.vmem [shape: bf16[16,8,8,128], index: 0, kind: input, shape index: {}]   ;;  %s905_s1 = inlined_call_operand.vmem [shape: f32[1,128], index: 1, kind: input, shape index: {}]   ;;  %s906_s2 = inlined_call_operand.vmem [shape: f32[1,128], index: 2, kind: input, shape index: {}]   ;;  %s907_s3 = inlined_call_operand.vmem [shape: bf16[16,10,10,128], index: 3, kind: input, shape index: {}]   ;;  %s908_s4 = inlined_call_operand.vmem [shape: bf16[16,10,10,128], index: 4, kind: output, shape index: {}]  }
   0x1 LB: > { %s598_s16 = sadd.s32 4294967295, %s713_s15   ;;  %p602_p0 = scmp.ge.s32.totalorder %s713_s15, 1  ;;  %s713_s15 = sphi %s741_s15, %s14_s15  }
   0x2   : > { %p172_p1 = scmp.lt.s32.totalorder %s713_s15, 17 }
   0x4   : > { %p173_p2 = pnand %p602_p0, %p172_p1 }
   0x5   : > { %p203_p3 = scmp.lt.s32.totalorder (!%p173_p2), %s598_s16, 15 }
   0x6   : > { %176 = sbr.rel (%p173_p2) target bundleno = 92 (0x5c), region = 36 }
   0xb   : > { %s910_s16 = smov (!%p203_p3, %s598_s16), 15  ;;  %v757_v0 = vld [vmem:[%s905_s1] ss:$0 sm:$0xff]  ;;  %vm283_vm0 = vcmask 1040384   ;;  %v715_v5 = vmov 0  }
   0xc   : > { %s663_s17 = smul.u32 80, %s910_s16  ;;  %s643_s18 = sshll.u32 %s910_s16, 5  ;;  %v762_v1 = vld [vmem:[%s906_s2] ss:$0 sm:$0xff] }
   0xd   : > { %s752_s21 = scalar_lea.vmem %s904_s0, %s643_s18 }
   0xe   : > { %s767_s28 = scalar_lea.vmem %s908_s4, %s663_s17  ;;  %s772_s5 = scalar_lea.vmem %s907_s3, %s663_s17  ;;  %v645_v2 = vld [vmem:[%s752_s21] sm:$0xff]   ;;  %v660_v3 = vld [vmem:[%s752_s21 + $0x8] sm:$0xff]   ;;  %v661_v4 = vld [vmem:[%s752_s21 + $0x10] sm:$0xff]  }
   0xf   : > { %509 = vst [vmem:[%s767_s28] sm:$0xf] %v715_v5  ;;  %v646_v6 = vunpack.c.l.bf16 %v645_v2  ;;  %v607_v7 = vld [vmem:[%s772_s5 + $0x8] sm:$0xf]  ;;  %v608_v8 = vld [vmem:[%s772_s5 + $0xc] sm:$0x1]  ;;  %v647_v9 = vunpack.c.h.bf16 %v645_v2  ;;  %v650_v10 = vunpack.c.l.bf16 %v660_v3  ;;  %v651_v11 = vunpack.c.h.bf16 %v660_v3 }
  0x10   : > { %510 = vst [vmem:[%s767_s28 + $0x4] sm:$0x1] %v715_v5  ;;  %v317_v12 = vunpack.c.l.bf16 %v607_v7  ;;  %v609_v13 = vld [vmem:[%s772_s5 + $0x10] sm:$0xf]  ;;  %v610_v14 = vld [vmem:[%s772_s5 + $0x14] sm:$0x1]  ;;  %v318_v16 = vunpack.c.l.bf16 %v608_v8  ;;  %v654_v20 = vunpack.c.l.bf16 %v661_v4  ;;  %v655_v26 = vunpack.c.h.bf16 %v661_v4 }
  0x11   : > { %623 = vst [vmem:[%s767_s28 + $0x48] sm:$0xf] %v715_v5  ;;  %v239_v15 = vmul.f32 %v757_v0, %v646_v6  ;;  %v240_v17 = vmul.f32 %v757_v0, %v647_v9  ;;  %v611_v18 = vld [vmem:[%s772_s5 + $0x18] sm:$0xf]  ;;  %v612_v19 = vld [vmem:[%s772_s5 + $0x1c] sm:$0x1]  ;;  %v319_v21 = vunpack.c.l.bf16 %v609_v13  ;;  %v241_v22 = vmul.f32 %v757_v0, %v650_v10 }
  0x12   : > { %624 = vst [vmem:[%s767_s28 + $0x4c] sm:$0x1] %v715_v5  ;;  %v242_v23 = vmul.f32 %v757_v0, %v651_v11  ;;  %v613_v24 = vld [vmem:[%s772_s5 + $0x20] sm:$0xf]  ;;  %v614_v25 = vld [vmem:[%s772_s5 + $0x24] sm:$0x1]  ;;  %v320_v29 = vunpack.c.l.bf16 %v610_v14  ;;  %v321_v30 = vunpack.c.l.bf16 %v611_v18  ;;  %v322_v34 = vunpack.c.l.bf16 %v612_v19 }
  0x13   : > { %v251_v27 = vadd.f32 %v762_v1, %v239_v15  ;;  %v252_v28 = vadd.f32 %v762_v1, %v240_v17  ;;  %v796_v31 = vld [vmem:[%s772_s5 + $0x28] sm:$0xf]  ;;  %v799_v32 = vld [vmem:[%s772_s5 + $0x2c] sm:$0x1]  ;;  %v253_v33 = vadd.f32 %v762_v1, %v241_v22  ;;  %v323_v36 = vunpack.c.l.bf16 %v613_v24  ;;  %v811_v49 = vld [vmem:[%s772_s5 + $0x30] sm:$0xf] }
  0x14   : > { %v254_v35 = vadd.f32 %v762_v1, %v242_v23  ;;  %v324_v39 = vunpack.c.l.bf16 %v614_v25  ;;  %v243_v40 = vmul.f32 %v757_v0, %v654_v20  ;;  %v325_v43 = vunpack.c.l.bf16 %v796_v31 }
  0x15   : > { %v267_v37 = vrot.slane %v251_v27, 7  ;;  %v268_v38 = vrot.slane %v252_v28, 7  ;;  %v269_v41 = vrot.slane %v253_v33, 7  ;;  %v326_v44 = vunpack.c.l.bf16 %v799_v32 }
  0x16   : > { %v270_v42 = vrot.slane %v254_v35, 7  ;;  %v255_v56 = vadd.f32 %v762_v1, %v243_v40  ;;  %v244_v57 = vmul.f32 %v757_v0, %v655_v26  ;;  %v327_v61 = vunpack.c.l.bf16 %v811_v49 }
  0x17   : > { %v284_v45 = vsel %vm283_vm0, 0.0, %v267_v37  ;;  %v292_v46 = vsel %vm283_vm0, %v267_v37, 0.0  ;;  %v285_v47 = vsel %vm283_vm0, 0.0, %v268_v38  ;;  %v293_v48 = vsel %vm283_vm0, %v268_v38, 0.0 }
  0x18   : > { %v333_v50 = vadd.f32 %v317_v12, %v284_v45  ;;  %v334_v51 = vadd.f32 %v318_v16, %v292_v46  ;;  %v335_v52 = vadd.f32 %v319_v21, %v285_v47  ;;  %v336_v53 = vadd.f32 %v320_v29, %v293_v48 }
  0x19   : > { %v286_v54 = vsel %vm283_vm0, 0.0, %v269_v41  ;;  %v294_v55 = vsel %vm283_vm0, %v269_v41, 0.0  ;;  %v287_v60 = vsel %vm283_vm0, 0.0, %v270_v42  ;;  %v295_v3 = vsel %vm283_vm0, %v270_v42, 0.0 }
  0x1a   : > { %v365_v58 = vmul.f32 %v333_v50, %v333_v50  ;;  %v366_v59 = vmul.f32 %v334_v51, %v334_v51  ;;  %v819_v62 = vmul.f32 0.5, %v333_v50  ;;  %v367_v63 = vmul.f32 %v335_v52, %v335_v52 }
  0x1b   : > { %v368_v2 = vmul.f32 %v336_v53, %v336_v53  ;;  %v337_v6 = vadd.f32 %v321_v30, %v286_v54  ;;  %v338_v7 = vadd.f32 %v322_v34, %v294_v55  ;;  %v822_v8 = vmul.f32 0.5, %v334_v51 }
  0x1c   : > { %v381_v4 = vmul.f32 %v365_v58, %v333_v50  ;;  %v382_v5 = vmul.f32 %v366_v59, %v334_v51  ;;  %v383_v9 = vmul.f32 %v367_v63, %v335_v52  ;;  %v339_v11 = vadd.f32 %v323_v36, %v287_v60 }
  0x1d   : > { %v384_v10 = vmul.f32 %v368_v2, %v336_v53  ;;  %v369_v14 = vmul.f32 %v337_v6, %v337_v6  ;;  %v340_v15 = vadd.f32 %v324_v39, %v295_v3  ;;  %v824_v16 = vmul.f32 0.5, %v335_v52 }
  0x1e   : > { %v397_v12 = vmul.f32 0.044715, %v381_v4  ;;  %v398_v13 = vmul.f32 0.044715, %v382_v5  ;;  %v399_v17 = vmul.f32 0.044715, %v383_v9  ;;  %v370_v19 = vmul.f32 %v338_v7, %v338_v7 }
  0x1f   : > { %v400_v18 = vmul.f32 0.044715, %v384_v10  ;;  %v826_v22 = vmul.f32 0.5, %v336_v53  ;;  %v385_v23 = vmul.f32 %v369_v14, %v337_v6  ;;  %v371_v27 = vmul.f32 %v339_v11, %v339_v11  ;;  %v618_v4 = vld [vmem:[%s772_s5 + $0x34] sm:$0x1] }
  0x20   : > { %v413_v20 = vadd.f32 %v397_v12, %v333_v50  ;;  %v414_v21 = vadd.f32 %v398_v13, %v334_v51  ;;  %v415_v24 = vadd.f32 %v399_v17, %v335_v52  ;;  %v386_v26 = vmul.f32 %v370_v19, %v338_v7 }
  0x21   : > { %v416_v25 = vadd.f32 %v400_v18, %v336_v53  ;;  %v401_v30 = vmul.f32 0.044715, %v385_v23  ;;  %v372_v33 = vmul.f32 %v340_v15, %v340_v15  ;;  %v387_v37 = vmul.f32 %v371_v27, %v339_v11 }
  0x22   : > { %v429_v28 = vmul.f32 0.7978846, %v413_v20  ;;  %v430_v29 = vmul.f32 0.7978846, %v414_v21  ;;  %v431_v34 = vmul.f32 0.7978846, %v415_v24  ;;  %v256_v48 = vadd.f32 %v762_v1, %v244_v57 }
  0x23   : > { %v432_v35 = vmul.f32 0.7978846, %v416_v25  ;;  %v402_v36 = vmul.f32 0.044715, %v386_v26  ;;  %v353_v38 = vmul.f32 0.5, %v337_v6  ;;  %v417_v39 = vadd.f32 %v401_v30, %v337_v6 }
  0x24   : > { %675 = vtanh.f32 %v429_v28  ;;  %v388_v40 = vmul.f32 %v372_v33, %v340_v15  ;;  %v403_v42 = vmul.f32 0.044715, %v387_v37  ;;  %v271_v45 = vrot.slane %v255_v56, 7  ;;  %v662_v37 = vld [vmem:[%s752_s21 + $0x18] sm:$0xff]  }
  0x25   : > { %677 = vtanh.f32 %v430_v29  ;;  %v418_v41 = vadd.f32 %v402_v36, %v338_v7  ;;  %v433_v46 = vmul.f32 0.7978846, %v417_v39  ;;  %v272_v57 = vrot.slane %v256_v48, 7 }
  0x26   : > { %679 = vtanh.f32 %v431_v34  ;;  %v404_v47 = vmul.f32 0.044715, %v388_v40  ;;  %v419_v51 = vadd.f32 %v403_v42, %v339_v11  ;;  %v288_v52 = vsel %vm283_vm0, 0.0, %v271_v45 }
  0x27   : > { %681 = vtanh.f32 %v432_v35  ;;  %v434_v50 = vmul.f32 0.7978846, %v418_v41  ;;  %v832_v54 = vadd.f32 %v325_v43, %v288_v52  ;;  %v296_v55 = vsel %vm283_vm0, %v271_v45, 0.0 }
  0x28   : > { %683 = vtanh.f32 %v433_v46  ;;  %v420_v53 = vadd.f32 %v404_v47, %v340_v15  ;;  %v435_v56 = vmul.f32 0.7978846, %v419_v51  ;;  %v837_v58 = vadd.f32 %v326_v44, %v296_v55 }
  0x29   : > { %685 = vtanh.f32 %v434_v50  ;;  %v354_v60 = vmul.f32 0.5, %v338_v7  ;;  %v355_v63 = vmul.f32 0.5, %v339_v11  ;;  %v373_v3 = vmul.f32 %v832_v54, %v832_v54 }
  0x2a   : > { %v676_v59 = vpop.eup %675  ;;  %v436_v2 = vmul.f32 0.7978846, %v420_v53  ;;  %687 = vtanh.f32 %v435_v56  ;;  %v356_v5 = vmul.f32 0.5, %v340_v15  ;;  %v374_v6 = vmul.f32 %v837_v58, %v837_v58 }
  0x2b   : > { %v678_v31 = vpop.eup %677  ;;  %v461_v43 = vadd.f32 1.0, %v676_v59  ;;  %v389_v44 = vmul.f32 %v373_v3, %v832_v54  ;;  %v289_v7 = vsel %vm283_vm0, 0.0, %v272_v57  ;;  %v328_v14 = vunpack.c.l.bf16 %v618_v4  ;;  %v620_v59 = vld [vmem:[%s772_s5 + $0x3c] sm:$0x1] }
  0x2c   : > { %v680_v9 = vpop.eup %679  ;;  %v462_v32 = vadd.f32 1.0, %v678_v31  ;;  %689 = vtanh.f32 %v436_v2  ;;  %v390_v13 = vmul.f32 %v374_v6, %v837_v58  ;;  %v851_v20 = vadd.f32 %v327_v61, %v289_v7  ;;  %v621_v2 = vld [vmem:[%s772_s5 + $0x40] sm:$0xf] }
  0x2d   : > { %v682_v10 = vpop.eup %681  ;;  %v477_v11 = vmul.f32 %v461_v43, %v819_v62  ;;  %v463_v12 = vadd.f32 1.0, %v680_v9  ;;  %v405_v19 = vmul.f32 0.044715, %v389_v44  ;;  %v297_v33 = vsel %vm283_vm0, %v272_v57, 0.0  ;;  %v619_v57 = vld [vmem:[%s772_s5 + $0x38] sm:$0xf] }
  0x2e   : > { %v684_v17 = vpop.eup %683  ;;  %v478_v15 = vmul.f32 %v462_v32, %v822_v8  ;;  %v464_v18 = vadd.f32 1.0, %v682_v10  ;;  %v406_v25 = vmul.f32 0.044715, %v390_v13  ;;  %v865_v46 = vadd.f32 %v328_v14, %v297_v33 }
  0x2f   : > { %v686_v21 = vpop.eup %685  ;;  %v493_v23 = vpack.c.bf16 %v477_v11, %v477_v11  ;;  %v479_v24 = vmul.f32 %v463_v12, %v824_v16  ;;  %v465_v62 = vadd.f32 1.0, %v684_v17  ;;  %v421_v8 = vadd.f32 %v405_v19, %v832_v54 }
  0x30   : > { %v494_v26 = vpack.c.bf16 %v478_v15, %v478_v15  ;;  %v480_v27 = vmul.f32 %v464_v18, %v826_v22  ;;  %v466_v28 = vadd.f32 1.0, %v686_v21  ;;  %v688_v29 = vpop.eup %687  ;;  %v422_v30 = vadd.f32 %v406_v25, %v837_v58 }
  0x31   : > { %625 = vst [vmem:[%s767_s28 + $0x8] sm:$0xf] %v493_v23  ;;  %v495_v49 = vpack.c.bf16 %v479_v24, %v479_v24  ;;  %v481_v61 = vmul.f32 %v465_v62, %v353_v38  ;;  %v467_v36 = vadd.f32 1.0, %v688_v29  ;;  %v437_v22 = vmul.f32 0.7978846, %v421_v8 }
  0x32   : > { %v690_v16 = vpop.eup %689  ;;  %626 = vst [vmem:[%s767_s28 + $0xc] sm:$0x1] %v494_v26  ;;  %v496_v34 = vpack.c.bf16 %v480_v27, %v480_v27  ;;  %v482_v35 = vmul.f32 %v466_v28, %v354_v60  ;;  %v438_v41 = vmul.f32 0.7978846, %v422_v30  ;;  %v375_v38 = vmul.f32 %v851_v20, %v851_v20 }
  0x33   : > { %627 = vst [vmem:[%s767_s28 + $0x10] sm:$0xf] %v495_v49  ;;  %v497_v39 = vpack.c.bf16 %v481_v61, %v481_v61  ;;  %v468_v40 = vadd.f32 1.0, %v690_v16  ;;  %v483_v45 = vmul.f32 %v467_v36, %v355_v63  ;;  %691 = vtanh.f32 %v437_v22 }
  0x34   : > { %628 = vst [vmem:[%s767_s28 + $0x14] sm:$0x1] %v496_v34  ;;  %v498_v42 = vpack.c.bf16 %v482_v35, %v482_v35  ;;  %693 = vtanh.f32 %v438_v41  ;;  %v391_v48 = vmul.f32 %v375_v38, %v851_v20  ;;  %v658_v50 = vunpack.c.l.bf16 %v662_v37 }
  0x35   : > { %629 = vst [vmem:[%s767_s28 + $0x18] sm:$0xf] %v497_v39  ;;  %v484_v47 = vmul.f32 %v468_v40, %v356_v5  ;;  %v499_v51 = vpack.c.bf16 %v483_v45, %v483_v45  ;;  %v376_v52 = vmul.f32 %v865_v46, %v865_v46  ;;  %v659_v63 = vunpack.c.h.bf16 %v662_v37  ;;  %v622_v5 = vld [vmem:[%s772_s5 + $0x44] sm:$0x1] }
  0x36   : > { %630 = vst [vmem:[%s767_s28 + $0x1c] sm:$0x1] %v498_v42  ;;  %v407_v55 = vmul.f32 0.044715, %v391_v48  ;;  %v245_v56 = vmul.f32 %v757_v0, %v658_v50  ;;  %v357_v3 = vmul.f32 0.5, %v832_v54  ;;  %v358_v4 = vmul.f32 0.5, %v837_v58 }
  0x37   : > { %v500_v53 = vpack.c.bf16 %v484_v47, %v484_v47  ;;  %631 = vst [vmem:[%s767_s28 + $0x20] sm:$0xf] %v499_v51  ;;  %v392_v60 = vmul.f32 %v376_v52, %v865_v46  ;;  %v329_v32 = vunpack.c.l.bf16 %v619_v57  ;;  %v330_v44 = vunpack.c.l.bf16 %v620_v59 }
  0x38   : > { %v423_v31 = vadd.f32 %v407_v55, %v851_v20  ;;  %v257_v43 = vadd.f32 %v762_v1, %v245_v56  ;;  %v246_v7 = vmul.f32 %v757_v0, %v659_v63  ;;  %v331_v14 = vunpack.c.l.bf16 %v621_v2 }
  0x39   : > { %632 = vst [vmem:[%s767_s28 + $0x24] sm:$0x1] %v500_v53  ;;  %v692_v6 = vpop.eup %691  ;;  %v408_v9 = vmul.f32 0.044715, %v392_v60  ;;  %v332_v15 = vunpack.c.l.bf16 %v622_v5  ;;  %v359_v49 = vmul.f32 0.5, %v851_v20  ;;  %v360_v37 = vmul.f32 0.5, %v865_v46 }
  0x3a   : > { %v694_v10 = vpop.eup %693  ;;  %v469_v11 = vadd.f32 1.0, %v692_v6  ;;  %v439_v12 = vmul.f32 0.7978846, %v423_v31  ;;  %v273_v13 = vrot.slane %v257_v43, 7  ;;  %v258_v58 = vadd.f32 %v762_v1, %v246_v7 }
  0x3b   : > { %v470_v17 = vadd.f32 1.0, %v694_v10  ;;  %v424_v54 = vadd.f32 %v408_v9, %v865_v46 }
  0x3c   : > { %v485_v18 = vmul.f32 %v469_v11, %v357_v3  ;;  %695 = vtanh.f32 %v439_v12  ;;  %v290_v19 = vsel %vm283_vm0, 0.0, %v273_v13  ;;  %v298_v21 = vsel %vm283_vm0, %v273_v13, 0.0 }
  0x3d   : > { %v486_v0 = vmul.f32 %v470_v17, %v358_v4  ;;  %v440_v23 = vmul.f32 0.7978846, %v424_v54  ;;  %v345_v24 = vadd.f32 %v329_v32, %v290_v19  ;;  %v346_v62 = vadd.f32 %v330_v44, %v298_v21 }
  0x3e   : > { %v501_v25 = vpack.c.bf16 %v485_v18, %v485_v18  ;;  %v274_v26 = vrot.slane %v258_v58, 7 }
  0x3f   : > { %v502_v27 = vpack.c.bf16 %v486_v0, %v486_v0  ;;  %697 = vtanh.f32 %v440_v23  ;;  %v377_v28 = vmul.f32 %v345_v24, %v345_v24  ;;  %v378_v8 = vmul.f32 %v346_v62, %v346_v62 }
  0x40   : > { %633 = vst [vmem:[%s767_s28 + $0x28] sm:$0xf] %v501_v25  ;;  %v291_v1 = vsel %vm283_vm0, 0.0, %v274_v26  ;;  %v299_v29 = vsel %vm283_vm0, %v274_v26, 0.0  ;;  %v361_v2 = vmul.f32 0.5, %v345_v24  ;;  %v362_v4 = vmul.f32 0.5, %v346_v62 }
  0x41   : > { %634 = vst [vmem:[%s767_s28 + $0x2c] sm:$0x1] %v502_v27  ;;  %v393_v61 = vmul.f32 %v377_v28, %v345_v24  ;;  %v347_v30 = vadd.f32 %v331_v14, %v291_v1  ;;  %v348_v33 = vadd.f32 %v332_v15, %v299_v29  ;;  %v394_v34 = vmul.f32 %v378_v8, %v346_v62 }
  0x42   : > { %v696_v16 = vpop.eup %695 }
  0x43   : > { %v471_v35 = vadd.f32 1.0, %v696_v16  ;;  %v409_v36 = vmul.f32 0.044715, %v393_v61  ;;  %v379_v22 = vmul.f32 %v347_v30, %v347_v30  ;;  %v410_v39 = vmul.f32 0.044715, %v394_v34 }
  0x44   : > { %v380_v40 = vmul.f32 %v348_v33, %v348_v33  ;;  %v363_v9 = vmul.f32 0.5, %v347_v30  ;;  %v364_v7 = vmul.f32 0.5, %v348_v33 }
  0x45   : > { %v698_v41 = vpop.eup %697  ;;  %v487_v38 = vmul.f32 %v471_v35, %v359_v49  ;;  %v425_v42 = vadd.f32 %v409_v36, %v345_v24  ;;  %v395_v45 = vmul.f32 %v379_v22, %v347_v30  ;;  %v426_v20 = vadd.f32 %v410_v39, %v346_v62 }
  0x46   : > { %v472_v47 = vadd.f32 1.0, %v698_v41  ;;  %v396_v48 = vmul.f32 %v380_v40, %v348_v33 }
  0x47   : > { %v503_v50 = vpack.c.bf16 %v487_v38, %v487_v38  ;;  %v441_v51 = vmul.f32 0.7978846, %v425_v42  ;;  %v411_v52 = vmul.f32 0.044715, %v395_v45  ;;  %v442_v55 = vmul.f32 0.7978846, %v426_v20 }
  0x48   : > { %v488_v53 = vmul.f32 %v472_v47, %v360_v37  ;;  %v412_v56 = vmul.f32 0.044715, %v396_v48 }
  0x49   : > { %635 = vst [vmem:[%s767_s28 + $0x30] sm:$0xf] %v503_v50  ;;  %699 = vtanh.f32 %v441_v51  ;;  %v427_v46 = vadd.f32 %v411_v52, %v347_v30 }
  0x4a   : > { %v504_v57 = vpack.c.bf16 %v488_v53, %v488_v53  ;;  %701 = vtanh.f32 %v442_v55  ;;  %v428_v59 = vadd.f32 %v412_v56, %v348_v33 }
  0x4b   : > { %v443_v60 = vmul.f32 0.7978846, %v427_v46 }
  0x4c   : > { %636 = vst [vmem:[%s767_s28 + $0x34] sm:$0x1] %v504_v57  ;;  %v444_v63 = vmul.f32 0.7978846, %v428_v59 }
  0x4d   : > { %703 = vtanh.f32 %v443_v60 }
  0x4e   : > { %705 = vtanh.f32 %v444_v63 }
  0x4f   : > { %v700_v3 = vpop.eup %699 }
  0x50   : > { %v702_v31 = vpop.eup %701  ;;  %v473_v43 = vadd.f32 1.0, %v700_v3 }
  0x51   : > { %v474_v5 = vadd.f32 1.0, %v702_v31 }
  0x52   : > { %v489_v6 = vmul.f32 %v473_v43, %v361_v2 }
  0x53   : > { %v704_v32 = vpop.eup %703  ;;  %v490_v44 = vmul.f32 %v474_v5, %v362_v4 }
  0x54   : > { %v706_v10 = vpop.eup %705  ;;  %v505_v11 = vpack.c.bf16 %v489_v6, %v489_v6  ;;  %v475_v12 = vadd.f32 1.0, %v704_v32 }
  0x55   : > { %v506_v13 = vpack.c.bf16 %v490_v44, %v490_v44  ;;  %v476_v14 = vadd.f32 1.0, %v706_v10 }
  0x56   : > { %637 = vst [vmem:[%s767_s28 + $0x38] sm:$0xf] %v505_v11  ;;  %v491_v17 = vmul.f32 %v475_v12, %v363_v9 }
  0x57   : > { %638 = vst [vmem:[%s767_s28 + $0x3c] sm:$0x1] %v506_v13  ;;  %v492_v54 = vmul.f32 %v476_v14, %v364_v7 }
  0x58   : > { %v507_v58 = vpack.c.bf16 %v491_v17, %v491_v17 }
  0x59   : > { %v508_v15 = vpack.c.bf16 %v492_v54, %v492_v54 }
  0x5a   : > { %639 = vst [vmem:[%s767_s28 + $0x40] sm:$0xf] %v507_v58 }
  0x5b   : > { %640 = vst [vmem:[%s767_s28 + $0x44] sm:$0x1] %v508_v15 }
  0x5c PF: > { %s14_s15 = sadd.s32 1, %s713_s15  }
  0x5d   : > { %p11_p4 = scmp.ge.s32.totalorder %s14_s15, 18  }
  0x5f   :  { %13 = sbr.rel (!%p11_p4) target bundleno = 1 (0x1), region = 72 }

// kernel: swin_stage_forward.16
= control target key start
LH: loop header
LB: loop body
LE: loop exit
PB: predicated region body
PF: predicated region fallthrough
CT: control target
= control target key end

     0   :  { %s805_s18 = smov 0   ;;  %s953_s0 = inlined_call_operand.vmem [shape: bf16[16,8,8,128], index: 0, kind: input, shape index: {}]   ;;  %s954_s1 = inlined_call_operand.vmem [shape: f32[1,128], index: 1, kind: input, shape index: {}]   ;;  %s955_s2 = inlined_call_operand.vmem [shape: f32[1,128], index: 2, kind: input, shape index: {}]   ;;  %s956_s3 = inlined_call_operand.vmem [shape: bf16[16,10,10,128], index: 3, kind: input, shape index: {}]   ;;  %s957_s4 = inlined_call_operand.vmem [shape: bf16[16,10,10,128], index: 4, kind: input, shape index: {}]   ;;  %s958_s5 = inlined_call_operand.vmem [shape: bf16[16,8,8,128], index: 5, kind: output, shape index: {}]  }
   0x1 LB: > { %s651_s19 = sadd.s32 4294967295, %s773_s18   ;;  %p655_p0 = scmp.ge.s32.totalorder %s773_s18, 1  ;;  %s773_s18 = sphi %s805_s18, %s15_s18  }
   0x2   : > { %p207_p1 = scmp.lt.s32.totalorder %s773_s18, 17 }
   0x4   : > { %p208_p2 = pnand %p655_p0, %p207_p1 }
   0x5   : > { %p245_p3 = scmp.lt.s32.totalorder (!%p208_p2), %s651_s19, 15 }
   0x6   : > { %211 = sbr.rel (%p208_p2) target bundleno = 78 (0x4e), region = 40 }
   0xb   : > { %s960_s19 = smov (!%p245_p3, %s651_s19), 15  ;;  %v749_v0 = vld [vmem:[%s954_s1] ss:$0 sm:$0xff]  ;;  %vm354_vm0 = vcmask 1046528  }
   0xc   : > { %s696_s20 = sshll.u32 %s960_s19, 5  ;;  %s740_s21 = smul.u32 80, %s960_s19  ;;  %v833_v11 = vld [vmem:[%s955_s2] ss:$0 sm:$0xff] }
   0xd   : > { %s249_s24 = scalar_lea.vmem %s953_s0, %s696_s20  ;;  %s930_s12 = scalar_lea.vmem %s958_s5, %s696_s20 }
   0xe   : > { %s828_s29 = scalar_lea.vmem %s956_s3, %s740_s21  ;;  %v699_v1 = vld [vmem:[%s249_s24] sm:$0xff]   ;;  %v734_v2 = vld [vmem:[%s249_s24 + $0x8] sm:$0xff]   ;;  %v735_v3 = vld [vmem:[%s249_s24 + $0x10] sm:$0xff]   ;;  %s839_s9 = scalar_lea.vmem %s957_s4, %s740_s21 }
   0xf   : > { %v700_v4 = vunpack.c.l.bf16 %v699_v1  ;;  %v701_v5 = vunpack.c.h.bf16 %v699_v1  ;;  %v736_v6 = vld [vmem:[%s249_s24 + $0x18] sm:$0xff]   ;;  %v704_v7 = vunpack.c.l.bf16 %v734_v2  ;;  %v705_v8 = vunpack.c.h.bf16 %v734_v2  ;;  %v662_v12 = vld [vmem:[%s828_s29 + $0x8] sm:$0xf]  ;;  %v663_v17 = vld [vmem:[%s828_s29 + $0xc] sm:$0x1] }
  0x10   : > { %v708_v9 = vunpack.c.l.bf16 %v735_v3  ;;  %v709_v10 = vunpack.c.h.bf16 %v735_v3  ;;  %v712_v13 = vunpack.c.l.bf16 %v736_v6  ;;  %v713_v14 = vunpack.c.h.bf16 %v736_v6  ;;  %v664_v18 = vld [vmem:[%s828_s29 + $0x10] sm:$0xf]  ;;  %v665_v19 = vld [vmem:[%s828_s29 + $0x14] sm:$0x1]  ;;  %v678_v28 = vld [vmem:[%s839_s9 + $0x8] sm:$0xf] }
  0x11   : > { %v285_v15 = vmul.f32 %v749_v0, %v700_v4  ;;  %v286_v16 = vmul.f32 %v749_v0, %v701_v5  ;;  %v287_v20 = vmul.f32 %v749_v0, %v704_v7  ;;  %v288_v21 = vmul.f32 %v749_v0, %v705_v8  ;;  %v679_v29 = vld [vmem:[%s839_s9 + $0xc] sm:$0x1]  ;;  %v666_v34 = vld [vmem:[%s828_s29 + $0x18] sm:$0xf]  ;;  %v667_v35 = vld [vmem:[%s828_s29 + $0x1c] sm:$0x1] }
  0x12   : > { %v289_v22 = vmul.f32 %v749_v0, %v708_v9  ;;  %v290_v23 = vmul.f32 %v749_v0, %v709_v10  ;;  %v322_v24 = vunpack.c.l.bf16 %v662_v12  ;;  %v323_v25 = vunpack.c.l.bf16 %v663_v17  ;;  %v680_v40 = vld [vmem:[%s839_s9 + $0x10] sm:$0xf]  ;;  %v668_v45 = vld [vmem:[%s828_s29 + $0x20] sm:$0xf]  ;;  %v669_v46 = vld [vmem:[%s828_s29 + $0x24] sm:$0x1] }
  0x13   : > { %v324_v26 = vunpack.c.l.bf16 %v664_v18  ;;  %v325_v27 = vunpack.c.l.bf16 %v665_v19  ;;  %v291_v30 = vmul.f32 %v749_v0, %v712_v13  ;;  %v292_v31 = vmul.f32 %v749_v0, %v713_v14  ;;  %v681_v49 = vld [vmem:[%s839_s9 + $0x14] sm:$0x1]  ;;  %v682_v0 = vld [vmem:[%s839_s9 + $0x18] sm:$0xf]  ;;  %v683_v9 = vld [vmem:[%s839_s9 + $0x1c] sm:$0x1] }
  0x14   : > { %v297_v32 = vadd.f32 %v833_v11, %v285_v15  ;;  %v298_v33 = vadd.f32 %v833_v11, %v286_v16  ;;  %v355_v36 = vrot.slane %v322_v24, 1  ;;  %v356_v37 = vrot.slane %v323_v25, 1  ;;  %v684_v14 = vld [vmem:[%s839_s9 + $0x20] sm:$0xf]  ;;  %v685_v15 = vld [vmem:[%s839_s9 + $0x24] sm:$0x1] }
  0x15   : > { %v358_v38 = vrot.slane %v324_v26, 1  ;;  %v359_v39 = vrot.slane %v325_v27, 1  ;;  %v299_v41 = vadd.f32 %v833_v11, %v287_v20  ;;  %v300_v42 = vadd.f32 %v833_v11, %v288_v21  ;;  %v670_v17 = vld [vmem:[%s828_s29 + $0x28] sm:$0xf] }
  0x16   : > { %v484_v43 = vunpack.c.l.bf16 %v678_v28  ;;  %v485_v44 = vunpack.c.l.bf16 %v679_v29  ;;  %v357_v47 = vsel %vm354_vm0, %v355_v36, %v356_v37  ;;  %v326_v50 = vunpack.c.l.bf16 %v666_v34 }
  0x17   : > { %v360_v48 = vsel %vm354_vm0, %v358_v38, %v359_v39  ;;  %v327_v51 = vunpack.c.l.bf16 %v667_v35  ;;  %v859_v52 = vadd.f32 %v833_v11, %v289_v22  ;;  %v861_v53 = vadd.f32 %v357_v47, %v297_v32 }
  0x18   : > { %v863_v54 = vadd.f32 %v360_v48, %v298_v33  ;;  %v486_v55 = vunpack.c.l.bf16 %v680_v40  ;;  %v328_v56 = vunpack.c.l.bf16 %v668_v45  ;;  %v329_v57 = vunpack.c.l.bf16 %v669_v46 }
  0x19   : > { %v361_v58 = vrot.slane %v326_v50, 1  ;;  %v362_v59 = vrot.slane %v327_v51, 1  ;;  %v403_v60 = vmul.f32 %v861_v53, %v861_v53  ;;  %v487_v62 = vunpack.c.l.bf16 %v681_v49 }
  0x1a   : > { %v404_v61 = vmul.f32 %v863_v54, %v863_v54  ;;  %v516_v63 = vrot.slane %v484_v43, 1  ;;  %v517_v1 = vrot.slane %v485_v44, 1  ;;  %v364_v3 = vrot.slane %v328_v56, 1 }
  0x1b   : > { %v363_v2 = vsel %vm354_vm0, %v361_v58, %v362_v59  ;;  %v365_v4 = vrot.slane %v329_v57, 1  ;;  %v302_v5 = vadd.f32 %v833_v11, %v290_v23  ;;  %v411_v6 = vmul.f32 %v403_v60, %v861_v53 }
  0x1c   : > { %v412_v7 = vmul.f32 %v404_v61, %v863_v54  ;;  %v389_v8 = vadd.f32 %v363_v2, %v299_v41  ;;  %v876_v10 = vadd.f32 %v833_v11, %v291_v30  ;;  %v879_v12 = vadd.f32 %v833_v11, %v292_v31  ;;  %v671_v11 = vld [vmem:[%s828_s29 + $0x2c] sm:$0x1]  ;;  %v672_v30 = vld [vmem:[%s828_s29 + $0x30] sm:$0xf]  ;;  %v673_v31 = vld [vmem:[%s828_s29 + $0x34] sm:$0x1] }
  0x1d   : > { %v366_v13 = vsel %vm354_vm0, %v364_v3, %v365_v4  ;;  %v488_v16 = vunpack.c.l.bf16 %v682_v0  ;;  %v419_v18 = vmul.f32 0.044715, %v411_v6  ;;  %v519_v20 = vrot.slane %v486_v55, 1  ;;  %v674_v61 = vld [vmem:[%s828_s29 + $0x38] sm:$0xf] }
  0x1e   : > { %v420_v19 = vmul.f32 0.044715, %v412_v7  ;;  %v390_v21 = vadd.f32 %v366_v13, %v300_v42  ;;  %v886_v22 = vsel %vm354_vm0, %v516_v63, %v517_v1  ;;  %v520_v23 = vrot.slane %v487_v62, 1  ;;  %v905_v2 = vld [vmem:[%s839_s9 + $0x28] sm:$0xf] }
  0x1f   : > { %v405_v24 = vmul.f32 %v389_v8, %v389_v8  ;;  %v489_v25 = vunpack.c.l.bf16 %v683_v9  ;;  %v427_v26 = vadd.f32 %v419_v18, %v861_v53  ;;  %v490_v29 = vunpack.c.l.bf16 %v684_v14  ;;  %v676_v7 = vld [vmem:[%s828_s29 + $0x40] sm:$0xf]  ;;  %v687_v13 = vld [vmem:[%s839_s9 + $0x2c] sm:$0x1]  ;;  %v677_v14 = vld [vmem:[%s828_s29 + $0x44] sm:$0x1] }
  0x20   : > { %v428_v27 = vadd.f32 %v420_v19, %v863_v54  ;;  %v406_v28 = vmul.f32 %v390_v21, %v390_v21  ;;  %v491_v33 = vunpack.c.l.bf16 %v685_v15  ;;  %v522_v34 = vrot.slane %v488_v16, 1 }
  0x21   : > { %v413_v32 = vmul.f32 %v405_v24, %v389_v8  ;;  %v330_v35 = vunpack.c.l.bf16 %v670_v17  ;;  %v435_v36 = vmul.f32 0.7978846, %v427_v26  ;;  %v331_v39 = vunpack.c.l.bf16 %v671_v11 }
  0x22   : > { %v436_v37 = vmul.f32 0.7978846, %v428_v27  ;;  %v414_v38 = vmul.f32 %v406_v28, %v390_v21  ;;  %v332_v41 = vunpack.c.l.bf16 %v672_v30  ;;  %v333_v42 = vunpack.c.l.bf16 %v673_v31 }
  0x23   : > { %v421_v40 = vmul.f32 0.044715, %v413_v32  ;;  %v367_v43 = vrot.slane %v330_v35, 1  ;;  %751 = vtanh.f32 %v435_v36  ;;  %v523_v45 = vrot.slane %v489_v25, 1 }
  0x24   : > { %v422_v44 = vmul.f32 0.044715, %v414_v38  ;;  %v368_v46 = vrot.slane %v331_v39, 1  ;;  %753 = vtanh.f32 %v436_v37  ;;  %v370_v48 = vrot.slane %v332_v41, 1 }
  0x25   : > { %v429_v47 = vadd.f32 %v421_v40, %v389_v8  ;;  %v371_v49 = vrot.slane %v333_v42, 1  ;;  %v525_v51 = vrot.slane %v490_v29, 1  ;;  %v526_v55 = vrot.slane %v491_v33, 1  ;;  %v688_v40 = vld [vmem:[%s839_s9 + $0x30] sm:$0xf] }
  0x26   : > { %v430_v50 = vadd.f32 %v422_v44, %v390_v21  ;;  %v369_v56 = vsel %vm354_vm0, %v367_v43, %v368_v46  ;;  %v521_v57 = vsel %vm354_vm0, %v519_v20, %v520_v23  ;;  %v395_v62 = vmul.f32 0.5, %v861_v53  ;;  %v689_v43 = vld [vmem:[%s839_s9 + $0x34] sm:$0x1] }
  0x27   : > { %v437_v58 = vmul.f32 0.7978846, %v429_v47  ;;  %v372_v59 = vsel %vm354_vm0, %v370_v48, %v371_v49  ;;  %v897_v60 = vadd.f32 %v369_v56, %v859_v52  ;;  %v396_v63 = vmul.f32 0.5, %v863_v54  ;;  %v675_v52 = vld [vmem:[%s828_s29 + $0x3c] sm:$0x1] }
  0x28   : > { %v438_v0 = vmul.f32 0.7978846, %v430_v50  ;;  %v902_v1 = vadd.f32 %v372_v59, %v302_v5  ;;  %v397_v3 = vmul.f32 0.5, %v389_v8  ;;  %v398_v4 = vmul.f32 0.5, %v390_v21 }
  0x29   : > { %755 = vtanh.f32 %v437_v58  ;;  %v407_v6 = vmul.f32 %v897_v60, %v897_v60  ;;  %v752_v9 = vpop.eup %751  ;;  %v524_v53 = vsel %vm354_vm0, %v522_v34, %v523_v45  ;;  %v527_v54 = vsel %vm354_vm0, %v525_v51, %v526_v55 }
  0x2a   : > { %757 = vtanh.f32 %v438_v0  ;;  %v408_v5 = vmul.f32 %v902_v1, %v902_v1  ;;  %v754_v15 = vpop.eup %753  ;;  %v451_v8 = vadd.f32 1.0, %v752_v9  ;;  %v492_v17 = vunpack.c.l.bf16 %v905_v2 }
  0x2b   : > { %v415_v16 = vmul.f32 %v407_v6, %v897_v60  ;;  %v334_v18 = vunpack.c.l.bf16 %v674_v61  ;;  %v452_v19 = vadd.f32 1.0, %v754_v15  ;;  %v335_v21 = vunpack.c.l.bf16 %v675_v52  ;;  %v692_v15 = vld [vmem:[%s839_s9 + $0x40] sm:$0xf] }
  0x2c   : > { %v416_v20 = vmul.f32 %v408_v5, %v902_v1  ;;  %v336_v23 = vunpack.c.l.bf16 %v676_v7  ;;  %v459_v24 = vmul.f32 %v451_v8, %v395_v62  ;;  %v493_v11 = vunpack.c.l.bf16 %v687_v13 }
  0x2d   : > { %v423_v25 = vmul.f32 0.044715, %v415_v16  ;;  %v337_v26 = vunpack.c.l.bf16 %v677_v14  ;;  %v460_v27 = vmul.f32 %v452_v19, %v396_v63  ;;  %v373_v29 = vrot.slane %v334_v18, 1  ;;  %v691_v14 = vld [vmem:[%s839_s9 + $0x3c] sm:$0x1] }
  0x2e   : > { %v424_v28 = vmul.f32 0.044715, %v416_v20  ;;  %v374_v30 = vrot.slane %v335_v21, 1  ;;  %v548_v32 = vadd.f32 %v886_v22, %v459_v24  ;;  %v376_v34 = vrot.slane %v336_v23, 1 }
  0x2f   : > { %v756_v31 = vpop.eup %755  ;;  %v431_v33 = vadd.f32 %v423_v25, %v897_v60  ;;  %v377_v35 = vrot.slane %v337_v26, 1  ;;  %v549_v37 = vadd.f32 %v521_v57, %v460_v27  ;;  %v494_v51 = vunpack.c.l.bf16 %v688_v40 }
  0x30   : > { %v758_v36 = vpop.eup %757  ;;  %v453_v38 = vadd.f32 1.0, %v756_v31  ;;  %v432_v39 = vadd.f32 %v424_v28, %v902_v1  ;;  %v375_v41 = vsel %vm354_vm0, %v373_v29, %v374_v30  ;;  %v495_v57 = vunpack.c.l.bf16 %v689_v43 }
  0x31   : > { %v454_v22 = vadd.f32 1.0, %v758_v36  ;;  %v439_v42 = vmul.f32 0.7978846, %v431_v33  ;;  %v378_v44 = vsel %vm354_vm0, %v376_v34, %v377_v35  ;;  %v393_v45 = vadd.f32 %v375_v41, %v876_v10 }
  0x32   : > { %v717_v46 = vpack.c.bf16 %v549_v37, %v548_v32  ;;  %v461_v47 = vmul.f32 %v453_v38, %v397_v3  ;;  %v440_v48 = vmul.f32 0.7978846, %v432_v39  ;;  %v394_v49 = vadd.f32 %v378_v44, %v879_v12 }
  0x33   : > { %v462_v50 = vmul.f32 %v454_v22, %v398_v4  ;;  %759 = vtanh.f32 %v439_v42  ;;  %v409_v55 = vmul.f32 %v393_v45, %v393_v45  ;;  %v528_v63 = vrot.slane %v492_v17, 1 }
  0x34   : > { %718 = vst [vmem:[%s930_s12] sm:$0xff] %v717_v46   ;;  %v550_v56 = vadd.f32 %v524_v53, %v461_v47  ;;  %761 = vtanh.f32 %v440_v48  ;;  %v410_v58 = vmul.f32 %v394_v49, %v394_v49  ;;  %v529_v0 = vrot.slane %v493_v11, 1  ;;  %v690_v53 = vld [vmem:[%s839_s9 + $0x38] sm:$0xf] }
  0x35   : > { %v551_v59 = vadd.f32 %v527_v54, %v462_v50  ;;  %v417_v61 = vmul.f32 %v409_v55, %v393_v45  ;;  %v399_v2 = vmul.f32 0.5, %v897_v60  ;;  %v531_v3 = vrot.slane %v494_v51, 1  ;;  %v693_v60 = vld [vmem:[%s839_s9 + $0x44] sm:$0x1] }
  0x36   : > { %v418_v62 = vmul.f32 %v410_v58, %v394_v49  ;;  %v532_v4 = vrot.slane %v495_v57, 1  ;;  %v400_v7 = vmul.f32 0.5, %v902_v1  ;;  %v530_v16 = vsel %vm354_vm0, %v528_v63, %v529_v0 }
  0x37   : > { %v722_v10 = vpack.c.bf16 %v551_v59, %v550_v56  ;;  %v425_v12 = vmul.f32 0.044715, %v417_v61  ;;  %v496_v1 = vunpack.c.l.bf16 %v690_v53  ;;  %v497_v23 = vunpack.c.l.bf16 %v691_v14 }
  0x38   : > { %v426_v6 = vmul.f32 0.044715, %v418_v62  ;;  %v533_v19 = vsel %vm354_vm0, %v531_v3, %v532_v4  ;;  %v498_v25 = vunpack.c.l.bf16 %v692_v15  ;;  %v499_v11 = vunpack.c.l.bf16 %v693_v60 }
  0x39   : > { %v760_v52 = vpop.eup %759  ;;  %737 = vst [vmem:[%s930_s12 + $0x8] sm:$0xff] %v722_v10   ;;  %v433_v9 = vadd.f32 %v425_v12, %v393_v45  ;;  %v534_v28 = vrot.slane %v496_v1, 1  ;;  %v535_v29 = vrot.slane %v497_v23, 1  ;;  %v401_v30 = vmul.f32 0.5, %v393_v45 }
  0x3a   : > { %v762_v54 = vpop.eup %761  ;;  %v455_v5 = vadd.f32 1.0, %v760_v52  ;;  %v434_v13 = vadd.f32 %v426_v6, %v394_v49  ;;  %v537_v31 = vrot.slane %v498_v25, 1  ;;  %v538_v32 = vrot.slane %v499_v11, 1 }
  0x3b   : > { %v456_v8 = vadd.f32 1.0, %v762_v54  ;;  %v441_v17 = vmul.f32 0.7978846, %v433_v9  ;;  %v402_v34 = vmul.f32 0.5, %v394_v49  ;;  %v536_v38 = vsel %vm354_vm0, %v534_v28, %v535_v29 }
  0x3c   : > { %v463_v18 = vmul.f32 %v455_v5, %v399_v2  ;;  %v442_v20 = vmul.f32 0.7978846, %v434_v13  ;;  %v539_v40 = vsel %vm354_vm0, %v537_v31, %v538_v32 }
  0x3d   : > { %v464_v21 = vmul.f32 %v456_v8, %v400_v7  ;;  %763 = vtanh.f32 %v441_v17 }
  0x3e   : > { %v552_v24 = vadd.f32 %v530_v16, %v463_v18  ;;  %765 = vtanh.f32 %v442_v20 }
  0x3f   : > { %v553_v26 = vadd.f32 %v533_v19, %v464_v21 }
  0x41   : > { %v727_v27 = vpack.c.bf16 %v553_v26, %v552_v24 }
  0x43   : > { %v764_v33 = vpop.eup %763  ;;  %738 = vst [vmem:[%s930_s12 + $0x10] sm:$0xff] %v727_v27  }
  0x44   : > { %v766_v35 = vpop.eup %765  ;;  %v457_v36 = vadd.f32 1.0, %v764_v33 }
  0x45   : > { %v458_v37 = vadd.f32 1.0, %v766_v35 }
  0x46   : > { %v465_v39 = vmul.f32 %v457_v36, %v401_v30 }
  0x47   : > { %v466_v41 = vmul.f32 %v458_v37, %v402_v34 }
  0x48   : > { %v554_v22 = vadd.f32 %v536_v38, %v465_v39 }
  0x49   : > { %v555_v42 = vadd.f32 %v539_v40, %v466_v41 }
  0x4b   : > { %v732_v43 = vpack.c.bf16 %v555_v42, %v554_v22 }
  0x4d   : > { %739 = vst [vmem:[%s930_s12 + $0x18] sm:$0xff] %v732_v43  }
  0x4e PF: > { %s15_s18 = sadd.s32 1, %s773_s18  }
  0x4f   : > { %p12_p4 = scmp.ge.s32.totalorder %s15_s18, 18  }
  0x51   :  { %14 = sbr.rel (!%p12_p4) target bundleno = 1 (0x1), region = 78 }

// kernel: swin_stage_forward.17
= control target key start
LH: loop header
LB: loop body
LE: loop exit
PB: predicated region body
PF: predicated region fallthrough
CT: control target
= control target key end

     0   :  { %s1212_s12 = smov 0   ;;  %s1420_s0 = inlined_call_operand.vmem [shape: bf16[8,2,4,2,4,256], index: 0, kind: input, shape index: {}]   ;;  %s1421_s1 = inlined_call_operand.vmem [shape: bf16[128,128], index: 1, kind: input, shape index: {}]   ;;  %s1422_s2 = inlined_call_operand.vmem [shape: f32[1,128], index: 2, kind: input, shape index: {}]   ;;  %s1423_s3 = inlined_call_operand.vmem [shape: f32[8,4,4,128], index: 3, kind: output, shape index: {}]  }
   0x1 LB: > { %s1000_s13 = sadd.s32 4294967295, %s1190_s12   ;;  %p1004_p0 = scmp.ge.s32.totalorder %s1190_s12, 1  ;;  %s1190_s12 = sphi %s1212_s12, %s13_s12  }
   0x2   : > { %p139_p1 = scmp.lt.s32.totalorder %s1190_s12, 3 }
   0x4   : > { %p140_p2 = pnand %p1004_p0, %p139_p1 }
   0x5   : > { %s1005_s16 = sshll.u32 (!%p140_p2), %s1000_s13, 2 }
   0x6   : > { %143 = sbr.rel (%p140_p2) target bundleno = 244 (0xf4), region = 32  ;;  %p166_p3 = scmp.lt.s32.totalorder (!%p140_p2), %s1005_s16, 7 }
   0xb   : > { %v1150_v0 = vld [vmem:[%s1421_s1 + $0x38] sm:$0xff]  ;;  %v1149_v1 = vld [vmem:[%s1421_s1 + $0x30] sm:$0xff]  ;;  %s1425_s16 = smov (!%p166_p3, %s1005_s16), 7  ;;  %v1148_v2 = vld [vmem:[%s1421_s1 + $0x28] sm:$0xff] }
   0xc   : > { %873 = vmatpush.bf16.msra.mxu0 %v1150_v0  ;;  %1151 = vmatpush.bf16.msra.mxu1 %v1150_v0  ;;  %s1141_s19 = sshll.u32 %s1425_s16, 6  ;;  %v1147_v6 = vld [vmem:[%s1421_s1 + $0x20] sm:$0xff]  ;;  %v1146_v31 = vld [vmem:[%s1421_s1 + $0x18] sm:$0xff]  ;;  %s1142_s8 = sshll.u32 %s1425_s16, 4 }
   0xd   : > { %1152 = vmatpush.bf16.msra.mxu2 %v1150_v0  ;;  %1153 = vmatpush.bf16.msra.mxu3 %v1150_v0  ;;  %s1235_s24 = scalar_lea.vmem %s1420_s0, %s1141_s19  ;;  %s1399_s14 = scalar_lea.vmem %s1423_s3, %s1142_s8 }
   0xe   : > { %v179_v3 = vld [vmem:[%s1235_s24] sm:$0x3]  ;;  %v180_v4 = vld [vmem:[%s1235_s24 + $0x8] sm:$0x3]  ;;  %v181_v5 = vld [vmem:[%s1235_s24 + $0x10] sm:$0x3] }
   0xf   : > { %v182_v7 = vld [vmem:[%s1235_s24 + $0x18] sm:$0x3]  ;;  %v187_v8 = vld [vmem:[%s1235_s24 + $0x80] sm:$0x3]  ;;  %v188_v9 = vld [vmem:[%s1235_s24 + $0x88] sm:$0x3]  ;;  %v211_v10 = vunpack.c.l.bf16 %v179_v3  ;;  %v212_v14 = vunpack.c.l.bf16 %v180_v4  ;;  %v213_v15 = vunpack.c.l.bf16 %v181_v5 }
  0x10   : > { %874 = vmatpush.bf16.msra.mxu0 %v1149_v1  ;;  %1154 = vmatpush.bf16.msra.mxu1 %v1149_v1  ;;  %v189_v11 = vld [vmem:[%s1235_s24 + $0x90] sm:$0x3]  ;;  %v190_v12 = vld [vmem:[%s1235_s24 + $0x98] sm:$0x3]  ;;  %v195_v13 = vld [vmem:[%s1235_s24 + $0x2] sm:$0x3]  ;;  %v214_v16 = vunpack.c.l.bf16 %v182_v7  ;;  %v219_v20 = vunpack.c.l.bf16 %v187_v8  ;;  %v220_v21 = vunpack.c.l.bf16 %v188_v9 }
  0x11   : > { %1155 = vmatpush.bf16.msra.mxu2 %v1149_v1  ;;  %1156 = vmatpush.bf16.msra.mxu3 %v1149_v1  ;;  %v196_v17 = vld [vmem:[%s1235_s24 + $0xa] sm:$0x3]  ;;  %v197_v18 = vld [vmem:[%s1235_s24 + $0x12] sm:$0x3]  ;;  %v198_v19 = vld [vmem:[%s1235_s24 + $0x1a] sm:$0x3]  ;;  %v221_v22 = vunpack.c.l.bf16 %v189_v11  ;;  %v227_v23 = vunpack.c.l.bf16 %v195_v13  ;;  %v222_v27 = vunpack.c.l.bf16 %v190_v12 }
  0x12   : > { %v203_v24 = vld [vmem:[%s1235_s24 + $0x82] sm:$0x3]  ;;  %v204_v25 = vld [vmem:[%s1235_s24 + $0x8a] sm:$0x3]  ;;  %v205_v26 = vld [vmem:[%s1235_s24 + $0x92] sm:$0x3]  ;;  %v228_v28 = vunpack.c.l.bf16 %v196_v17  ;;  %v229_v29 = vunpack.c.l.bf16 %v197_v18  ;;  %v230_v30 = vunpack.c.l.bf16 %v198_v19 }
  0x13   : > { %v206_v32 = vld [vmem:[%s1235_s24 + $0x9a] sm:$0x3]  ;;  %v235_v33 = vunpack.c.l.bf16 %v203_v24  ;;  %v236_v34 = vunpack.c.l.bf16 %v204_v25  ;;  %v237_v35 = vunpack.c.l.bf16 %v205_v26  ;;  %v243_v36 = vmax.f32 %v211_v10, %v227_v23  ;;  %v1011_v37 = vld [vmem:[%s1235_s24 + $0x4] sm:$0x3]  ;;  %v1012_v38 = vld [vmem:[%s1235_s24 + $0xc] sm:$0x3] }
  0x14   : > { %875 = vmatpush.bf16.msra.mxu0 %v1148_v2  ;;  %1157 = vmatpush.bf16.msra.mxu1 %v1148_v2  ;;  %v238_v39 = vunpack.c.l.bf16 %v206_v32  ;;  %v244_v40 = vmax.f32 %v212_v14, %v228_v28  ;;  %v245_v41 = vmax.f32 %v213_v15, %v229_v29  ;;  %v246_v42 = vmax.f32 %v214_v16, %v230_v30  ;;  %v1013_v43 = vld [vmem:[%s1235_s24 + $0x14] sm:$0x3]  ;;  %v1014_v44 = vld [vmem:[%s1235_s24 + $0x1c] sm:$0x3]  ;;  %v1019_v45 = vld [vmem:[%s1235_s24 + $0x84] sm:$0x3] }
  0x15   : > { %1158 = vmatpush.bf16.msra.mxu2 %v1148_v2  ;;  %1159 = vmatpush.bf16.msra.mxu3 %v1148_v2  ;;  %v251_v46 = vmax.f32 %v219_v20, %v235_v33  ;;  %v252_v47 = vmax.f32 %v220_v21, %v236_v34  ;;  %v253_v48 = vmax.f32 %v221_v22, %v237_v35  ;;  %v1020_v49 = vld [vmem:[%s1235_s24 + $0x8c] sm:$0x3]  ;;  %v1021_v50 = vld [vmem:[%s1235_s24 + $0x94] sm:$0x3]  ;;  %v1022_v51 = vld [vmem:[%s1235_s24 + $0x9c] sm:$0x3]  ;;  %v308_v52 = vunpack.c.l.bf16 %v1011_v37 }
  0x16   : > { %v254_v53 = vmax.f32 %v222_v27, %v238_v39  ;;  %v309_v54 = vunpack.c.l.bf16 %v1012_v38  ;;  %v310_v55 = vunpack.c.l.bf16 %v1013_v43  ;;  %v311_v56 = vunpack.c.l.bf16 %v1014_v44  ;;  %v1027_v57 = vld [vmem:[%s1235_s24 + $0x6] sm:$0x3]  ;;  %v1028_v58 = vld [vmem:[%s1235_s24 + $0xe] sm:$0x3]  ;;  %v1029_v63 = vld [vmem:[%s1235_s24 + $0x16] sm:$0x3] }
  0x17   : > { %v316_v59 = vunpack.c.l.bf16 %v1019_v45  ;;  %v317_v60 = vunpack.c.l.bf16 %v1020_v49  ;;  %v318_v61 = vunpack.c.l.bf16 %v1021_v50  ;;  %v319_v62 = vunpack.c.l.bf16 %v1022_v51  ;;  %v1030_v0 = vld [vmem:[%s1235_s24 + $0x1e] sm:$0x3]  ;;  %v1035_v1 = vld [vmem:[%s1235_s24 + $0x86] sm:$0x3]  ;;  %v1037_v7 = vld [vmem:[%s1235_s24 + $0x96] sm:$0x3] }
  0x18   : > { %876 = vmatpush.bf16.msra.mxu0 %v1147_v6  ;;  %1160 = vmatpush.bf16.msra.mxu1 %v1147_v6  ;;  %v324_v2 = vmax.f32 %v243_v36, %v308_v52  ;;  %v325_v3 = vmax.f32 %v244_v40, %v309_v54  ;;  %v326_v4 = vmax.f32 %v245_v41, %v310_v55  ;;  %v1038_v8 = vld [vmem:[%s1235_s24 + $0x9e] sm:$0x3]  ;;  %v1145_v9 = vld [vmem:[%s1421_s1 + $0x10] sm:$0xff]  ;;  %v388_v13 = vunpack.c.l.bf16 %v1027_v57  ;;  %v1043_v18 = vld [vmem:[%s1235_s24 + $0x20] sm:$0x3] }
  0x19   : > { %1161 = vmatpush.bf16.msra.mxu2 %v1147_v6  ;;  %1162 = vmatpush.bf16.msra.mxu3 %v1147_v6  ;;  %v327_v5 = vmax.f32 %v246_v42, %v311_v56  ;;  %v1036_v6 = vld [vmem:[%s1235_s24 + $0x8e] sm:$0x3]  ;;  %v332_v10 = vmax.f32 %v251_v46, %v316_v59  ;;  %v333_v11 = vmax.f32 %v252_v47, %v317_v60  ;;  %v389_v15 = vunpack.c.l.bf16 %v1028_v58  ;;  %v1044_v19 = vld [vmem:[%s1235_s24 + $0x28] sm:$0x3]  ;;  %v1045_v24 = vld [vmem:[%s1235_s24 + $0x30] sm:$0x3] }
  0x1a   : > { %v334_v12 = vmax.f32 %v253_v48, %v318_v61  ;;  %v335_v14 = vmax.f32 %v254_v53, %v319_v62  ;;  %v390_v16 = vunpack.c.l.bf16 %v1029_v63  ;;  %v391_v17 = vunpack.c.l.bf16 %v1030_v0  ;;  %v1046_v25 = vld [vmem:[%s1235_s24 + $0x38] sm:$0x3]  ;;  %v1051_v26 = vld [vmem:[%s1235_s24 + $0xa0] sm:$0x3]  ;;  %v1053_v32 = vld [vmem:[%s1235_s24 + $0xb0] sm:$0x3] }
  0x1b   : > { %v396_v20 = vunpack.c.l.bf16 %v1035_v1  ;;  %v397_v21 = vunpack.c.l.bf16 %v1036_v6  ;;  %v398_v22 = vunpack.c.l.bf16 %v1037_v7  ;;  %v399_v23 = vunpack.c.l.bf16 %v1038_v8  ;;  %v1054_v33 = vld [vmem:[%s1235_s24 + $0xb8] sm:$0x3]  ;;  %v1144_v34 = vld [vmem:[%s1421_s1 + $0x8] sm:$0xff]  ;;  %v1059_v43 = vld [vmem:[%s1235_s24 + $0x22] sm:$0x3] }
  0x1c   : > { %877 = vmatpush.bf16.msra.mxu0 %v1146_v31  ;;  %1163 = vmatpush.bf16.msra.mxu1 %v1146_v31  ;;  %v404_v27 = vmax.f32 %v324_v2, %v388_v13  ;;  %v405_v28 = vmax.f32 %v325_v3, %v389_v15  ;;  %v406_v29 = vmax.f32 %v326_v4, %v390_v16  ;;  %v469_v38 = vunpack.c.l.bf16 %v1043_v18  ;;  %v1060_v44 = vld [vmem:[%s1235_s24 + $0x2a] sm:$0x3]  ;;  %v1061_v49 = vld [vmem:[%s1235_s24 + $0x32] sm:$0x3]  ;;  %v1062_v50 = vld [vmem:[%s1235_s24 + $0x3a] sm:$0x3] }
  0x1d   : > { %1164 = vmatpush.bf16.msra.mxu2 %v1146_v31  ;;  %1165 = vmatpush.bf16.msra.mxu3 %v1146_v31  ;;  %v407_v30 = vmax.f32 %v327_v5, %v391_v17  ;;  %v1052_v31 = vld [vmem:[%s1235_s24 + $0xa8] sm:$0x3]  ;;  %v412_v35 = vmax.f32 %v332_v10, %v396_v20  ;;  %v413_v36 = vmax.f32 %v333_v11, %v397_v21  ;;  %v470_v40 = vunpack.c.l.bf16 %v1044_v19  ;;  %v1067_v51 = vld [vmem:[%s1235_s24 + $0xa2] sm:$0x3]  ;;  %v1068_v56 = vld [vmem:[%s1235_s24 + $0xaa] sm:$0x3] }
  0x1e   : > { %v414_v37 = vmax.f32 %v334_v12, %v398_v22  ;;  %v415_v39 = vmax.f32 %v335_v14, %v399_v23  ;;  %v471_v41 = vunpack.c.l.bf16 %v1045_v24  ;;  %v472_v42 = vunpack.c.l.bf16 %v1046_v25  ;;  %v1069_v57 = vld [vmem:[%s1235_s24 + $0xb2] sm:$0x3]  ;;  %v1070_v58 = vld [vmem:[%s1235_s24 + $0xba] sm:$0x3]  ;;  %v1143_v59 = vld [vmem:[%s1421_s1] sm:$0xff] }
  0x1f   : > { %v477_v45 = vunpack.c.l.bf16 %v1051_v26  ;;  %v478_v46 = vunpack.c.l.bf16 %v1052_v31  ;;  %v479_v47 = vunpack.c.l.bf16 %v1053_v32  ;;  %v480_v48 = vunpack.c.l.bf16 %v1054_v33  ;;  %v1075_v4 = vld [vmem:[%s1235_s24 + $0x24] sm:$0x3]  ;;  %v1076_v5 = vld [vmem:[%s1235_s24 + $0x2c] sm:$0x3]  ;;  %v1077_v10 = vld [vmem:[%s1235_s24 + $0x34] sm:$0x3] }
  0x20   : > { %878 = vmatpush.bf16.msra.mxu0 %v1145_v9  ;;  %1166 = vmatpush.bf16.msra.mxu1 %v1145_v9  ;;  %v485_v52 = vmax.f32 %v404_v27, %v469_v38  ;;  %v486_v53 = vmax.f32 %v405_v28, %v470_v40  ;;  %v487_v54 = vmax.f32 %v406_v29, %v471_v41  ;;  %v549_v63 = vunpack.c.l.bf16 %v1059_v43  ;;  %v1078_v11 = vld [vmem:[%s1235_s24 + $0x3c] sm:$0x3]  ;;  %v1083_v12 = vld [vmem:[%s1235_s24 + $0xa4] sm:$0x3]  ;;  %v1084_v17 = vld [vmem:[%s1235_s24 + $0xac] sm:$0x3] }
  0x21   : > { %1167 = vmatpush.bf16.msra.mxu2 %v1145_v9  ;;  %1168 = vmatpush.bf16.msra.mxu3 %v1145_v9  ;;  %v488_v55 = vmax.f32 %v407_v30, %v472_v42  ;;  %v493_v60 = vmax.f32 %v412_v35, %v477_v45  ;;  %v494_v61 = vmax.f32 %v413_v36, %v478_v46  ;;  %v550_v1 = vunpack.c.l.bf16 %v1060_v44  ;;  %v1085_v18 = vld [vmem:[%s1235_s24 + $0xb4] sm:$0x3]  ;;  %v1086_v19 = vld [vmem:[%s1235_s24 + $0xbc] sm:$0x3]  ;;  %v1091_v28 = vld [vmem:[%s1235_s24 + $0x26] sm:$0x3] }
  0x22   : > { %v495_v62 = vmax.f32 %v414_v37, %v479_v47  ;;  %v496_v0 = vmax.f32 %v415_v39, %v480_v48  ;;  %v551_v2 = vunpack.c.l.bf16 %v1061_v49  ;;  %v552_v3 = vunpack.c.l.bf16 %v1062_v50  ;;  %v1092_v33 = vld [vmem:[%s1235_s24 + $0x2e] sm:$0x3]  ;;  %v1094_v35 = vld [vmem:[%s1235_s24 + $0x3e] sm:$0x3]  ;;  %v1099_v40 = vld [vmem:[%s1235_s24 + $0xa6] sm:$0x3] }
  0x23   : > { %v557_v6 = vunpack.c.l.bf16 %v1067_v51  ;;  %v558_v7 = vunpack.c.l.bf16 %v1068_v56  ;;  %v559_v8 = vunpack.c.l.bf16 %v1069_v57  ;;  %v560_v9 = vunpack.c.l.bf16 %v1070_v58  ;;  %v1100_v41 = vld [vmem:[%s1235_s24 + $0xae] sm:$0x3]  ;;  %v1101_v42 = vld [vmem:[%s1235_s24 + $0xb6] sm:$0x3]  ;;  %v1102_v43 = vld [vmem:[%s1235_s24 + $0xbe] sm:$0x3] }
  0x24   : > { %879 = vmatpush.bf16.msra.mxu0 %v1144_v34  ;;  %1169 = vmatpush.bf16.msra.mxu1 %v1144_v34  ;;  %v565_v13 = vmax.f32 %v485_v52, %v549_v63  ;;  %v566_v14 = vmax.f32 %v486_v53, %v550_v1  ;;  %v567_v15 = vmax.f32 %v487_v54, %v551_v2  ;;  %v630_v23 = vunpack.c.l.bf16 %v1075_v4  ;;  %v183_v56 = vld [vmem:[%s1235_s24 + $0x40] sm:$0x3]  ;;  %v186_v63 = vld [vmem:[%s1235_s24 + $0x58] sm:$0x3] }
  0x25   : > { %1170 = vmatpush.bf16.msra.mxu2 %v1144_v34  ;;  %1171 = vmatpush.bf16.msra.mxu3 %v1144_v34  ;;  %v568_v16 = vmax.f32 %v488_v55, %v552_v3  ;;  %v573_v20 = vmax.f32 %v493_v60, %v557_v6  ;;  %v574_v21 = vmax.f32 %v494_v61, %v558_v7  ;;  %v631_v25 = vunpack.c.l.bf16 %v1076_v5  ;;  %v1093_v34 = vld [vmem:[%s1235_s24 + $0x36] sm:$0x3]  ;;  %v184_v61 = vld [vmem:[%s1235_s24 + $0x48] sm:$0x3]  ;;  %v199_v3 = vld [vmem:[%s1235_s24 + $0x42] sm:$0x3] }
  0x26   : > { %v575_v22 = vmax.f32 %v495_v62, %v559_v8  ;;  %v576_v24 = vmax.f32 %v496_v0, %v560_v9  ;;  %v632_v26 = vunpack.c.l.bf16 %v1077_v10  ;;  %v633_v27 = vunpack.c.l.bf16 %v1078_v11  ;;  %v185_v62 = vld [vmem:[%s1235_s24 + $0x50] sm:$0x3]  ;;  %v200_v5 = vld [vmem:[%s1235_s24 + $0x4a] sm:$0x3]  ;;  %v201_v6 = vld [vmem:[%s1235_s24 + $0x52] sm:$0x3] }
  0x27   : > { %v638_v29 = vunpack.c.l.bf16 %v1083_v12  ;;  %v639_v30 = vunpack.c.l.bf16 %v1084_v17  ;;  %v640_v31 = vunpack.c.l.bf16 %v1085_v18  ;;  %v641_v32 = vunpack.c.l.bf16 %v1086_v19  ;;  %v202_v7 = vld [vmem:[%s1235_s24 + $0x5a] sm:$0x3] }
  0x28   : > { %880 = vmatpush.bf16.msra.mxu0 %v1143_v59  ;;  %1172 = vmatpush.bf16.msra.mxu1 %v1143_v59  ;;  %v646_v36 = vmax.f32 %v565_v13, %v630_v23  ;;  %v647_v37 = vmax.f32 %v566_v14, %v631_v25  ;;  %v648_v38 = vmax.f32 %v567_v15, %v632_v26  ;;  %v710_v44 = vunpack.c.l.bf16 %v1091_v28  ;;  %v1017_v23 = vld [vmem:[%s1235_s24 + $0x54] sm:$0x3]  ;;  %v192_v25 = vld [vmem:[%s1235_s24 + $0xc8] sm:$0x3]  ;;  %v207_v26 = vld [vmem:[%s1235_s24 + $0xc2] sm:$0x3] }
  0x29   : > { %1173 = vmatpush.bf16.msra.mxu2 %v1143_v59  ;;  %1174 = vmatpush.bf16.msra.mxu3 %v1143_v59  ;;  %v649_v39 = vmax.f32 %v568_v16, %v633_v27  ;;  %v711_v45 = vunpack.c.l.bf16 %v1092_v33  ;;  %v712_v46 = vunpack.c.l.bf16 %v1093_v34  ;;  %v713_v47 = vunpack.c.l.bf16 %v1094_v35  ;;  %v191_v16 = vld [vmem:[%s1235_s24 + $0xc0] sm:$0x3]  ;;  %v208_v27 = vld [vmem:[%s1235_s24 + $0xca] sm:$0x3] }
  0x2a   : > { %v654_v48 = vmax.f32 %v573_v20, %v638_v29  ;;  %v655_v49 = vmax.f32 %v574_v21, %v639_v30  ;;  %v656_v50 = vmax.f32 %v575_v22, %v640_v31  ;;  %v657_v51 = vmax.f32 %v576_v24, %v641_v32  ;;  %v1015_v21 = vld [vmem:[%s1235_s24 + $0x44] sm:$0x3]  ;;  %v1016_v22 = vld [vmem:[%s1235_s24 + $0x4c] sm:$0x3]  ;;  %v1018_v24 = vld [vmem:[%s1235_s24 + $0x5c] sm:$0x3] }
  0x2b   : > { %v726_v52 = vmax.f32 %v646_v36, %v710_v44  ;;  %v727_v53 = vmax.f32 %v647_v37, %v711_v45  ;;  %v728_v54 = vmax.f32 %v648_v38, %v712_v46  ;;  %v729_v55 = vmax.f32 %v649_v39, %v713_v47  ;;  %v193_v36 = vld [vmem:[%s1235_s24 + $0xd0] sm:$0x3]  ;;  %v194_v37 = vld [vmem:[%s1235_s24 + $0xd8] sm:$0x3]  ;;  %v209_v38 = vld [vmem:[%s1235_s24 + $0xd2] sm:$0x3] }
  0x2c   : > { %v718_v57 = vunpack.c.l.bf16 %v1099_v40  ;;  %v719_v58 = vunpack.c.l.bf16 %v1100_v41  ;;  %v720_v59 = vunpack.c.l.bf16 %v1101_v42  ;;  %v721_v60 = vunpack.c.l.bf16 %v1102_v43  ;;  %v210_v39 = vld [vmem:[%s1235_s24 + $0xda] sm:$0x3]  ;;  %v1031_v44 = vld [vmem:[%s1235_s24 + $0x46] sm:$0x3] }
  0x2d   : > { %v742_v0 = vpack.c.bf16 %v726_v52, %v726_v52  ;;  %v743_v1 = vpack.c.bf16 %v727_v53, %v727_v53  ;;  %v744_v2 = vpack.c.bf16 %v728_v54, %v728_v54  ;;  %v745_v4 = vpack.c.bf16 %v729_v55, %v729_v55  ;;  %v1023_v52 = vld [vmem:[%s1235_s24 + $0xc4] sm:$0x3]  ;;  %v1024_v53 = vld [vmem:[%s1235_s24 + $0xcc] sm:$0x3] }
  0x2e   : > { %v215_v8 = vunpack.c.l.bf16 %v183_v56  ;;  %v216_v9 = vunpack.c.l.bf16 %v184_v61  ;;  %v217_v10 = vunpack.c.l.bf16 %v185_v62  ;;  %v218_v11 = vunpack.c.l.bf16 %v186_v63  ;;  %v1025_v62 = vld [vmem:[%s1235_s24 + $0xd4] sm:$0x3]  ;;  %v1026_v63 = vld [vmem:[%s1235_s24 + $0xdc] sm:$0x3] }
  0x2f   : > { %779 = vst [vmem:[#allocation1] ss:$4 sm:$0xff] %v742_v0  ;;  %v734_v12 = vmax.f32 %v654_v48, %v718_v57  ;;  %v1324_v13 = vmax.f32 %v655_v49, %v719_v58  ;;  %v1326_v14 = vmax.f32 %v656_v50, %v720_v59  ;;  %v1328_v15 = vmax.f32 %v657_v51, %v721_v60  ;;  %v1032_v49 = vld [vmem:[%s1235_s24 + $0x4e] sm:$0x3]  ;;  %v1033_v50 = vld [vmem:[%s1235_s24 + $0x56] sm:$0x3] }
  0x30   : > { %782 = vst [vmem:[#allocation1 + $0x1] ss:$4 sm:$0xff] %v743_v1  ;;  %v231_v17 = vunpack.c.l.bf16 %v199_v3  ;;  %v232_v18 = vunpack.c.l.bf16 %v200_v5  ;;  %v233_v19 = vunpack.c.l.bf16 %v201_v6  ;;  %v234_v20 = vunpack.c.l.bf16 %v202_v7  ;;  %v1034_v51 = vld [vmem:[%s1235_s24 + $0x5e] sm:$0x3]  ;;  %v1047_v0 = vld [vmem:[%s1235_s24 + $0x60] sm:$0x3] }
  0x31   : > { %785 = vst [vmem:[#allocation1 + $0x2] ss:$4 sm:$0xff] %v744_v2  ;;  %v750_v32 = vpack.c.bf16 %v734_v12, %v734_v12  ;;  %v751_v33 = vpack.c.bf16 %v1324_v13, %v1324_v13  ;;  %v752_v34 = vpack.c.bf16 %v1326_v14, %v1326_v14  ;;  %v753_v35 = vpack.c.bf16 %v1328_v15, %v1328_v15  ;;  %v1048_v6 = vld [vmem:[%s1235_s24 + $0x68] sm:$0x3]  ;;  %v1050_v12 = vld [vmem:[%s1235_s24 + $0x78] sm:$0x3] }
  0x32   : > { %788 = vst [vmem:[#allocation1 + $0x3] ss:$4 sm:$0xff] %v745_v4  ;;  %v247_v28 = vmax.f32 %v215_v8, %v231_v17  ;;  %v248_v29 = vmax.f32 %v216_v9, %v232_v18  ;;  %v249_v30 = vmax.f32 %v217_v10, %v233_v19  ;;  %v250_v31 = vmax.f32 %v218_v11, %v234_v20  ;;  %v1049_v11 = vld [vmem:[%s1235_s24 + $0x70] sm:$0x3]  ;;  %v1039_v13 = vld [vmem:[%s1235_s24 + $0xc6] sm:$0x3] }
  0x33   : > { %v312_v40 = vunpack.c.l.bf16 %v1015_v21  ;;  %v313_v41 = vunpack.c.l.bf16 %v1016_v22  ;;  %v314_v42 = vunpack.c.l.bf16 %v1017_v23  ;;  %v315_v43 = vunpack.c.l.bf16 %v1018_v24  ;;  %v1040_v14 = vld [vmem:[%s1235_s24 + $0xce] sm:$0x3]  ;;  %v1041_v23 = vld [vmem:[%s1235_s24 + $0xd6] sm:$0x3]  ;;  %v1042_v24 = vld [vmem:[%s1235_s24 + $0xde] sm:$0x3] }
  0x34   : > { %v223_v45 = vunpack.c.l.bf16 %v191_v16  ;;  %v224_v46 = vunpack.c.l.bf16 %v192_v25  ;;  %v239_v47 = vunpack.c.l.bf16 %v207_v26  ;;  %v240_v48 = vunpack.c.l.bf16 %v208_v27 }
  0x35   : > { %v328_v54 = vmax.f32 %v247_v28, %v312_v40  ;;  %v329_v55 = vmax.f32 %v248_v29, %v313_v41  ;;  %v330_v56 = vmax.f32 %v249_v30, %v314_v42  ;;  %v331_v57 = vmax.f32 %v250_v31, %v315_v43  ;;  %v1063_v29 = vld [vmem:[%s1235_s24 + $0x62] sm:$0x3] }
  0x36   : > { %v225_v58 = vunpack.c.l.bf16 %v193_v36  ;;  %v226_v59 = vunpack.c.l.bf16 %v194_v37  ;;  %v241_v60 = vunpack.c.l.bf16 %v209_v38  ;;  %v242_v61 = vunpack.c.l.bf16 %v210_v39  ;;  %v1065_v36 = vld [vmem:[%s1235_s24 + $0x72] sm:$0x3]  ;;  %v1066_v37 = vld [vmem:[%s1235_s24 + $0x7a] sm:$0x3]  ;;  %v1055_v38 = vld [vmem:[%s1235_s24 + $0xe0] sm:$0x3] }
  0x37   : > { %v392_v2 = vunpack.c.l.bf16 %v1031_v44  ;;  %v393_v3 = vunpack.c.l.bf16 %v1032_v49  ;;  %v394_v4 = vunpack.c.l.bf16 %v1033_v50  ;;  %v395_v5 = vunpack.c.l.bf16 %v1034_v51  ;;  %v1056_v39 = vld [vmem:[%s1235_s24 + $0xe8] sm:$0x3] }
  0x38   : > { %v255_v7 = vmax.f32 %v223_v45, %v239_v47  ;;  %v256_v8 = vmax.f32 %v224_v46, %v240_v48  ;;  %v320_v9 = vunpack.c.l.bf16 %v1023_v52  ;;  %v321_v10 = vunpack.c.l.bf16 %v1024_v53  ;;  %v1057_v47 = vld [vmem:[%s1235_s24 + $0xf0] sm:$0x3]  ;;  %v1058_v48 = vld [vmem:[%s1235_s24 + $0xf8] sm:$0x3]  ;;  %v1079_v53 = vld [vmem:[%s1235_s24 + $0x64] sm:$0x3] }
  0x39   : > { %v801_v1 = vld.sshfl [vmem:[#allocation1] sm:$0xff pattern:$0x73625140]  ;;  %v408_v15 = vmax.f32 %v328_v54, %v392_v2  ;;  %v409_v16 = vmax.f32 %v329_v55, %v393_v3  ;;  %v410_v17 = vmax.f32 %v330_v56, %v394_v4  ;;  %v411_v18 = vmax.f32 %v331_v57, %v395_v5 }
  0x3a   : > { %804 = vst [vmem:[#allocation1] ss:$4 sm:$0xff] %v750_v32  ;;  %881 = vmatmul.bf16.vlgmr.msra.gmra.mxu0 %v801_v1  ;;  %v257_v19 = vmax.f32 %v225_v58, %v241_v60  ;;  %v258_v20 = vmax.f32 %v226_v59, %v242_v61  ;;  %v322_v21 = vunpack.c.l.bf16 %v1025_v62  ;;  %v323_v22 = vunpack.c.l.bf16 %v1026_v63  ;;  %v1080_v58 = vld [vmem:[%s1235_s24 + $0x6c] sm:$0x3]  ;;  %v1081_v59 = vld [vmem:[%s1235_s24 + $0x74] sm:$0x3] }
  0x3b   : > { %806 = vst [vmem:[#allocation1 + $0x1] ss:$4 sm:$0xff] %v751_v33  ;;  %v473_v25 = vunpack.c.l.bf16 %v1047_v0  ;;  %v474_v26 = vunpack.c.l.bf16 %v1048_v6  ;;  %v475_v27 = vunpack.c.l.bf16 %v1049_v11  ;;  %v476_v28 = vunpack.c.l.bf16 %v1050_v12  ;;  %v1082_v60 = vld [vmem:[%s1235_s24 + $0x7c] sm:$0x3]  ;;  %v1071_v61 = vld [vmem:[%s1235_s24 + $0xe2] sm:$0x3] }
  0x3c   : > { %808 = vst [vmem:[#allocation1 + $0x2] ss:$4 sm:$0xff] %v752_v34  ;;  %v336_v30 = vmax.f32 %v255_v7, %v320_v9  ;;  %v337_v31 = vmax.f32 %v256_v8, %v321_v10  ;;  %v400_v32 = vunpack.c.l.bf16 %v1039_v13  ;;  %v401_v33 = vunpack.c.l.bf16 %v1040_v14  ;;  %v1064_v34 = vld [vmem:[%s1235_s24 + $0x6a] sm:$0x3]  ;;  %v1073_v8 = vld [vmem:[%s1235_s24 + $0xf2] sm:$0x3] }
  0x3d   : > { %810 = vst [vmem:[#allocation1 + $0x3] ss:$4 sm:$0xff] %v753_v35  ;;  %v489_v40 = vmax.f32 %v408_v15, %v473_v25  ;;  %v490_v35 = vmax.f32 %v409_v16, %v474_v26  ;;  %v491_v41 = vmax.f32 %v410_v17, %v475_v27  ;;  %v492_v42 = vmax.f32 %v411_v18, %v476_v28  ;;  %v1072_v62 = vld [vmem:[%s1235_s24 + $0xea] sm:$0x3]  ;;  %v1074_v9 = vld [vmem:[%s1235_s24 + $0xfa] sm:$0x3] }
  0x3e   : > { %v338_v43 = vmax.f32 %v257_v19, %v322_v21  ;;  %v339_v44 = vmax.f32 %v258_v20, %v323_v22  ;;  %v402_v45 = vunpack.c.l.bf16 %v1041_v23  ;;  %v403_v46 = vunpack.c.l.bf16 %v1042_v24  ;;  %v1095_v14 = vld [vmem:[%s1235_s24 + $0x66] sm:$0x3]  ;;  %v1096_v19 = vld [vmem:[%s1235_s24 + $0x6e] sm:$0x3]  ;;  %v1097_v20 = vld [vmem:[%s1235_s24 + $0x76] sm:$0x3] }
  0x3f   : > { %v553_v49 = vunpack.c.l.bf16 %v1063_v29  ;;  %v554_v50 = vunpack.c.l.bf16 %v1064_v34  ;;  %v555_v51 = vunpack.c.l.bf16 %v1065_v36  ;;  %v556_v52 = vunpack.c.l.bf16 %v1066_v37  ;;  %v1098_v21 = vld [vmem:[%s1235_s24 + $0x7e] sm:$0x3]  ;;  %v1087_v22 = vld [vmem:[%s1235_s24 + $0xe4] sm:$0x3]  ;;  %v1088_v23 = vld [vmem:[%s1235_s24 + $0xec] sm:$0x3] }
  0x40   : > { %v416_v54 = vmax.f32 %v336_v30, %v400_v32  ;;  %v417_v55 = vmax.f32 %v337_v31, %v401_v33  ;;  %v481_v56 = vunpack.c.l.bf16 %v1055_v38  ;;  %v482_v57 = vunpack.c.l.bf16 %v1056_v39  ;;  %v1089_v32 = vld [vmem:[%s1235_s24 + $0xf4] sm:$0x3] }
  0x41   : > { %v569_v63 = vmax.f32 %v489_v40, %v553_v49  ;;  %v570_v0 = vmax.f32 %v490_v35, %v554_v50  ;;  %v571_v1 = vmax.f32 %v491_v41, %v555_v51  ;;  %v572_v2 = vmax.f32 %v492_v42, %v556_v52  ;;  %v1090_v40 = vld [vmem:[%s1235_s24 + $0xfc] sm:$0x3]  ;;  %v1103_v42 = vld [vmem:[%s1235_s24 + $0xe6] sm:$0x3]  ;;  %v1104_v50 = vld [vmem:[%s1235_s24 + $0xee] sm:$0x3] }
  0x42   : > { %v418_v3 = vmax.f32 %v338_v43, %v402_v45  ;;  %v419_v4 = vmax.f32 %v339_v44, %v403_v46  ;;  %v483_v5 = vunpack.c.l.bf16 %v1057_v47  ;;  %v484_v6 = vunpack.c.l.bf16 %v1058_v48  ;;  %v1105_v52 = vld [vmem:[%s1235_s24 + $0xf6] sm:$0x3] }
  0x43   : > { %v634_v10 = vunpack.c.l.bf16 %v1079_v53  ;;  %v635_v11 = vunpack.c.l.bf16 %v1080_v58  ;;  %v636_v12 = vunpack.c.l.bf16 %v1081_v59  ;;  %v637_v13 = vunpack.c.l.bf16 %v1082_v60 }
  0x44   : > { %v819_v7 = vld.sshfl [vmem:[#allocation1] sm:$0xff pattern:$0x73625140]  ;;  %v497_v15 = vmax.f32 %v416_v54, %v481_v56  ;;  %v498_v16 = vmax.f32 %v417_v55, %v482_v57  ;;  %v561_v17 = vunpack.c.l.bf16 %v1071_v61  ;;  %v562_v18 = vunpack.c.l.bf16 %v1072_v62  ;;  %v1106_v57 = vld [vmem:[%s1235_s24 + $0xfe] sm:$0x3] }
  0x45   : > { %891 = vmatmul.bf16.vlgmr.msra.gmra.mxu2 %v819_v7  ;;  %v650_v24 = vmax.f32 %v569_v63, %v634_v10  ;;  %v651_v25 = vmax.f32 %v570_v0, %v635_v11  ;;  %v652_v26 = vmax.f32 %v571_v1, %v636_v12  ;;  %v653_v27 = vmax.f32 %v572_v2, %v637_v13  ;;  %v1183_v12 = vld [vmem:[%s1422_s2] ss:$0 sm:$0xff] }
  0x46   : > { %v499_v28 = vmax.f32 %v418_v3, %v483_v5  ;;  %v500_v29 = vmax.f32 %v419_v4, %v484_v6  ;;  %v563_v30 = vunpack.c.l.bf16 %v1073_v8  ;;  %v564_v31 = vunpack.c.l.bf16 %v1074_v9 }
  0x47   : > { %v714_v33 = vunpack.c.l.bf16 %v1095_v14  ;;  %v715_v34 = vunpack.c.l.bf16 %v1096_v19  ;;  %v716_v36 = vunpack.c.l.bf16 %v1097_v20  ;;  %v717_v37 = vunpack.c.l.bf16 %v1098_v21 }
  0x48   : > { %v577_v38 = vmax.f32 %v497_v15, %v561_v17  ;;  %v578_v39 = vmax.f32 %v498_v16, %v562_v18  ;;  %v642_v35 = vunpack.c.l.bf16 %v1087_v22  ;;  %v643_v41 = vunpack.c.l.bf16 %v1088_v23 }
  0x49   : > { %v730_v43 = vmax.f32 %v650_v24, %v714_v33  ;;  %v731_v44 = vmax.f32 %v651_v25, %v715_v34  ;;  %v732_v45 = vmax.f32 %v652_v26, %v716_v36  ;;  %v733_v46 = vmax.f32 %v653_v27, %v717_v37 }
  0x4a   : > { %v579_v47 = vmax.f32 %v499_v28, %v563_v30  ;;  %v580_v48 = vmax.f32 %v500_v29, %v564_v31  ;;  %v644_v49 = vunpack.c.l.bf16 %v1089_v32  ;;  %v645_v51 = vunpack.c.l.bf16 %v1090_v40 }
  0x4b   : > { %v746_v53 = vpack.c.bf16 %v730_v43, %v730_v43  ;;  %v747_v54 = vpack.c.bf16 %v731_v44, %v731_v44  ;;  %v748_v55 = vpack.c.bf16 %v732_v45, %v732_v45  ;;  %v658_v56 = vmax.f32 %v577_v38, %v642_v35 }
  0x4c   : > { %v722_v58 = vunpack.c.l.bf16 %v1103_v42  ;;  %v749_v59 = vpack.c.bf16 %v733_v46, %v733_v46  ;;  %v659_v60 = vmax.f32 %v578_v39, %v643_v41  ;;  %v723_v61 = vunpack.c.l.bf16 %v1104_v50 }
  0x4d   : > { %791 = vst [vmem:[#allocation1 + $0x20] ss:$4 sm:$0xff] %v746_v53  ;;  %v660_v62 = vmax.f32 %v579_v47, %v644_v49  ;;  %v724_v63 = vunpack.c.l.bf16 %v1105_v52  ;;  %v661_v0 = vmax.f32 %v580_v48, %v645_v51  ;;  %v725_v1 = vunpack.c.l.bf16 %v1106_v57 }
  0x4e   : > { %794 = vst [vmem:[#allocation1 + $0x21] ss:$4 sm:$0xff] %v747_v54  ;;  %v738_v2 = vmax.f32 %v658_v56, %v722_v58  ;;  %v739_v3 = vmax.f32 %v659_v60, %v723_v61 }
  0x4f   : > { %797 = vst [vmem:[#allocation1 + $0x22] ss:$4 sm:$0xff] %v748_v55  ;;  %v740_v4 = vmax.f32 %v660_v62, %v724_v63  ;;  %v741_v5 = vmax.f32 %v661_v0, %v725_v1 }
  0x50   : > { %800 = vst [vmem:[#allocation1 + $0x23] ss:$4 sm:$0xff] %v749_v59  ;;  %v754_v6 = vpack.c.bf16 %v738_v2, %v738_v2  ;;  %v755_v7 = vpack.c.bf16 %v739_v3, %v739_v3 }
  0x51   : > { %v756_v8 = vpack.c.bf16 %v740_v4, %v740_v4  ;;  %v757_v9 = vpack.c.bf16 %v741_v5, %v741_v5 }
  0x57   : > { %v802_v10 = vld.sshfl [vmem:[#allocation1 + $0x20] sm:$0xff pattern:$0x73625140] }
  0x58   : > { %812 = vst [vmem:[#allocation1 + $0x20] ss:$4 sm:$0xff] %v754_v6  ;;  %886 = vmatmul.bf16.vlgmr.msra.gmra.mxu1 %v802_v10 }
  0x59   : > { %814 = vst [vmem:[#allocation1 + $0x21] ss:$4 sm:$0xff] %v755_v7 }
  0x5a   : > { %816 = vst [vmem:[#allocation1 + $0x22] ss:$4 sm:$0xff] %v756_v8 }
  0x5b   : > { %818 = vst [vmem:[#allocation1 + $0x23] ss:$4 sm:$0xff] %v757_v9 }
  0x62   : > { %v820_v11 = vld.sshfl [vmem:[#allocation1 + $0x20] sm:$0xff pattern:$0x73625140] }
  0x63   : > { %896 = vmatmul.bf16.vlgmr.msra.gmra.mxu3 %v820_v11 }
  0xb7   : > { %v882_v13 = vpop.f32.mrf.mxu0 }
  0xb8   : > { %v883_v14 = vadd.f32 %v1183_v12, %v882_v13 }
  0xba   : > { %v910_v15 = vrot.slane %v883_v14, 4  ;;  %926 = vst [vmem:[%s1399_s14] sm:$0xf] %v883_v14 }
  0xbc   : > { %927 = vst [vmem:[%s1399_s14 + $0x4] sm:$0xf] %v910_v15 }
  0xbf   : > { %v884_v16 = vpop.f32.mrf.mxu0 }
  0xc0   : > { %v885_v17 = vadd.f32 %v1183_v12, %v884_v16 }
  0xc2   : > { %v911_v18 = vrot.slane %v885_v17, 4  ;;  %928 = vst [vmem:[%s1399_s14 + $0x8] sm:$0xf] %v885_v17 }
  0xc4   : > { %929 = vst [vmem:[%s1399_s14 + $0xc] sm:$0xf] %v911_v18 }
  0xc8   : > { %v892_v19 = vpop.f32.mrf.mxu2 }
  0xc9   : > { %v893_v20 = vadd.f32 %v1183_v12, %v892_v19 }
  0xcb   : > { %v914_v23 = vrot.slane %v893_v20, 4  ;;  %934 = vst [vmem:[%s1399_s14 + $0x20] sm:$0xf] %v893_v20 }
  0xcd   : > { %935 = vst [vmem:[%s1399_s14 + $0x24] sm:$0xf] %v914_v23 }
  0xd0   : > { %v894_v25 = vpop.f32.mrf.mxu2 }
  0xd1   : > { %v895_v26 = vadd.f32 %v1183_v12, %v894_v25 }
  0xd3   : > { %v915_v29 = vrot.slane %v895_v26, 4  ;;  %936 = vst [vmem:[%s1399_s14 + $0x28] sm:$0xf] %v895_v26 }
  0xd5   : > { %v887_v21 = vpop.f32.mrf.mxu1  ;;  %937 = vst [vmem:[%s1399_s14 + $0x2c] sm:$0xf] %v915_v29 }
  0xd6   : > { %v888_v22 = vadd.f32 %v1183_v12, %v887_v21 }
  0xd8   : > { %v912_v24 = vrot.slane %v888_v22, 4  ;;  %930 = vst [vmem:[%s1399_s14 + $0x10] sm:$0xf] %v888_v22 }
  0xda   : > { %931 = vst [vmem:[%s1399_s14 + $0x14] sm:$0xf] %v912_v24 }
  0xdd   : > { %v889_v27 = vpop.f32.mrf.mxu1 }
  0xde   : > { %v890_v28 = vadd.f32 %v1183_v12, %v889_v27 }
  0xe0   : > { %v913_v30 = vrot.slane %v890_v28, 4  ;;  %932 = vst [vmem:[%s1399_s14 + $0x18] sm:$0xf] %v890_v28 }
  0xe2   : > { %933 = vst [vmem:[%s1399_s14 + $0x1c] sm:$0xf] %v913_v30 }
  0xe6   : > { %v897_v31 = vpop.f32.mrf.mxu3 }
  0xe7   : > { %v898_v32 = vadd.f32 %v1183_v12, %v897_v31 }
  0xe9   : > { %v916_v33 = vrot.slane %v898_v32, 4  ;;  %938 = vst [vmem:[%s1399_s14 + $0x30] sm:$0xf] %v898_v32 }
  0xeb   : > { %939 = vst [vmem:[%s1399_s14 + $0x34] sm:$0xf] %v916_v33 }
  0xee   : > { %v899_v34 = vpop.f32.mrf.mxu3 }
  0xef   : > { %v900_v36 = vadd.f32 %v1183_v12, %v899_v34 }
  0xf1   : > { %v917_v37 = vrot.slane %v900_v36, 4  ;;  %940 = vst [vmem:[%s1399_s14 + $0x38] sm:$0xf] %v900_v36 }
  0xf3   : > { %941 = vst [vmem:[%s1399_s14 + $0x3c] sm:$0xf] %v917_v37 }
  0xf4 PF: > { %s13_s12 = sadd.s32 1, %s1190_s12  }
  0xf5   : > { %p10_p4 = scmp.ge.s32.totalorder %s13_s12, 4  }
  0xf7   :  { %12 = sbr.rel (!%p10_p4) target bundleno = 1 (0x1), region = 72 }

// kernel: swin_stage_forward.9
= control target key start
LH: loop header
LB: loop body
LE: loop exit
PB: predicated region body
PF: predicated region fallthrough
CT: control target
= control target key end

     0   :  { %s5808_s21 = smov 0   ;;  %s5810_s22 = smov 0   ;;  %s7542_s0 = inlined_call_operand.vmem [shape: bf16[16,10,10,128], index: 0, kind: input, shape index: {}, may-alias: {0,1,2}]   ;;  %s7543_s1 = inlined_call_operand.vmem [shape: bf16[16,10,10,128], index: 1, kind: input, shape index: {}, may-alias: {0,1,2}]   ;;  %s7544_s2 = inlined_call_operand.vmem [shape: bf16[16,10,10,128], index: 2, kind: input, shape index: {}, may-alias: {0,1,2}]   ;;  %s7545_s3 = inlined_call_operand.vmem [shape: bf16[9,384,128], index: 3, kind: input, shape index: {}]   ;;  %s7546_s4 = inlined_call_operand.vmem [shape: f32[1,128], index: 4, kind: input, shape index: {}]   ;;  %s7547_s5 = inlined_call_operand.vmem [shape: bf16[16,8,8,128], index: 5, kind: output, shape index: {0}]   ;;  %s7548_s6 = inlined_call_operand.vmem [shape: f32[16,2,128], index: 6, kind: output, shape index: {1}]  }
   0x1   :  { %s5812_s23 = smov 0   ;;  %s5814_s24 = smov 0  }
   0x2   :  { %s5816_s25 = smov 0  }
   0x3 LB: > { %s26_s26 = sadd.s32 1, %s5763_s23  ;;  %s29_s27 = sadd.s32 1, %s5767_s24  ;;  %s5771_s25 = sphi %s5816_s25, %s17_s25   ;;  %s5767_s24 = sphi %s5814_s24, %s7568_s24   ;;  %s5763_s23 = sphi %s5812_s23, %s7567_s23   ;;  %s5759_s22 = sphi %s5810_s22, %s7566_s22   ;;  %s5755_s21 = sphi %s5808_s21, %s7565_s21  }
   0x4   : > { %p27_p0 = scmp.ge.s32.totalorder %s26_s26, 8  ;;  %p4128_p1 = scmp.ge.s32.totalorder %s5771_s25, 1 }
   0x5   : > { %p335_p2 = scmp.lt.s32.totalorder %s5771_s25, 17 }
   0x6   : > { %s7570_s26 = smov (%p27_p0, %s26_s26), 0  ;;  %s7572_s27 = smov (!%p27_p0, %s29_s27), %s5767_s24 }
   0x7   : > { %p336_p3 = pnand %p4128_p1, %p335_p2  ;;  %p31_p4 = scmp.ge.s32.totalorder %s7572_s27, 2 }
   0x9   : > { %s7574_s27 = smov (%p31_p4, %s7572_s27), 0  ;;  %339 = sbr.rel (%p336_p3) target bundleno = 636 (0x27c), region = 40 }
   0xe   : > { %v5457_v0 = vld [vmem:[%s7545_s3 + $0xf8] sm:$0xff]  ;;  %s5847_s8 = sadd.s32 4294967295, %s5755_s21  ;;  %v5456_v3 = vld [vmem:[%s7545_s3 + $0xf0] sm:$0xff]  ;;  %s5864_s18 = sshll.u32 %s5759_s22, 3  ;;  %v5455_v6 = vld [vmem:[%s7545_s3 + $0xe8] sm:$0xff] }
   0xf   : > { %v5473_v1 = vld [vmem:[%s7545_s3 + $0x178] sm:$0xff]  ;;  %p404_p5 = scmp.lt.s32.totalorder %s5847_s8, 7  ;;  %p4129_p6 = scmp.gt.s32.totalorder %s5847_s8, 0  ;;  %990 = vmatpush.bf16.msra.mxu0 %v5457_v0  ;;  %5665 = vmatpush.bf16.msra.mxu3 %v5457_v0  ;;  %v5472_v4 = vld [vmem:[%s7545_s3 + $0x170] sm:$0xff]  ;;  %v5471_v7 = vld [vmem:[%s7545_s3 + $0x168] sm:$0xff] }
  0x10   : > { %v5465_v2 = vld [vmem:[%s7545_s3 + $0x138] sm:$0xff]  ;;  %1048 = vmatpush.bf16.msra.mxu2 %v5473_v1  ;;  %v5464_v5 = vld [vmem:[%s7545_s3 + $0x130] sm:$0xff]  ;;  %v5463_v8 = vld [vmem:[%s7545_s3 + $0x128] sm:$0xff]  ;;  %p496_p7 = scmp.ge.s32.totalorder %s5847_s8, 0  ;;  %p497_p9 = scmp.le.s32.totalorder %s5847_s8, 7 }
  0x11   : > { %1019 = vmatpush.bf16.msra.mxu1 %v5465_v2  ;;  %s405_s17 = scalar_select %p404_p5, %s5847_s8, 7  ;;  %v5454_v9 = vld [vmem:[%s7545_s3 + $0xe0] sm:$0xff]  ;;  %v5453_v12 = vld [vmem:[%s7545_s3 + $0xd8] sm:$0xff]  ;;  %v5452_v15 = vld [vmem:[%s7545_s3 + $0xd0] sm:$0xff] }
  0x12   : > { %v5470_v10 = vld [vmem:[%s7545_s3 + $0x160] sm:$0xff]  ;;  %p498_p10 = pnand %p497_p9, %p496_p7  ;;  %v5469_v13 = vld [vmem:[%s7545_s3 + $0x158] sm:$0xff]  ;;  %v5468_v16 = vld [vmem:[%s7545_s3 + $0x150] sm:$0xff]  ;;  %p422_p12 = scmp.lt.s32.totalorder %s5755_s21, 7 }
  0x13   : > { %s7576_s17 = smov (!%p4129_p6, %s405_s17), 0  ;;  %991 = vmatpush.bf16.msra.mxu0 %v5456_v3  ;;  %5666 = vmatpush.bf16.msra.mxu3 %v5456_v3  ;;  %v5462_v11 = vld [vmem:[%s7545_s3 + $0x120] sm:$0xff]  ;;  %v5461_v14 = vld [vmem:[%s7545_s3 + $0x118] sm:$0xff]  ;;  %v5460_v17 = vld [vmem:[%s7545_s3 + $0x110] sm:$0xff]  ;;  %p4136_p13 = scmp.gt.s32.totalorder %s5755_s21, 0 }
  0x14   : > { %1049 = vmatpush.bf16.msra.mxu2 %v5472_v4  ;;  %s409_s22 = sadd.s32 %s7576_s17, %s5864_s18  ;;  %v5451_v18 = vld [vmem:[%s7545_s3 + $0xc8] sm:$0xff]  ;;  %v5450_v27 = vld [vmem:[%s7545_s3 + $0xc0] sm:$0xff]  ;;  %v5441_v36 = vld [vmem:[%s7545_s3 + $0x78] sm:$0xff] }
  0x15   : > { %1020 = vmatpush.bf16.msra.mxu1 %v5464_v5  ;;  %p410_p8 = scmp.lt.s32.totalorder %s409_s22, 15  ;;  %v5467_v19 = vld [vmem:[%s7545_s3 + $0x148] sm:$0xff]  ;;  %v5466_v33 = vld [vmem:[%s7545_s3 + $0x140] sm:$0xff]  ;;  %v5433_v41 = vld [vmem:[%s7545_s3 + $0x38] sm:$0xff] }
  0x16   : > { %s4155_s15 = scalar_select %p498_p10, 0, 1  ;;  %v5459_v20 = vld [vmem:[%s7545_s3 + $0x108] sm:$0xff]  ;;  %v5458_v42 = vld [vmem:[%s7545_s3 + $0x100] sm:$0xff]  ;;  %v5481_v44 = vld [vmem:[%s7545_s3 + $0x1b8] sm:$0xff] }
  0x17   : > { %992 = vmatpush.bf16.msra.mxu0 %v5455_v6  ;;  %5667 = vmatpush.bf16.msra.mxu3 %v5455_v6  ;;  %s7578_s22 = smov (!%p410_p8, %s409_s22), 15  ;;  %v5449_v45 = vld [vmem:[%s7545_s3 + $0xb8] sm:$0xff]  ;;  %v5440_v57 = vld [vmem:[%s7545_s3 + $0x70] sm:$0xff] }
  0x18   : > { %1050 = vmatpush.bf16.msra.mxu2 %v5471_v7  ;;  %s5689_s29 = smul.u32 80, %s7578_s22  ;;  %s501_s30 = scvt.s32.f32 %s4155_s15  ;;  %v5432_v62 = vld [vmem:[%s7545_s3 + $0x30] sm:$0xff] }
  0x19   : > { %1021 = vmatpush.bf16.msra.mxu1 %v5463_v8  ;;  %v5480_v3 = vld [vmem:[%s7545_s3 + $0x1b0] sm:$0xff]  ;;  %s423_s10 = scalar_select %p422_p12, %s5755_s21, 7 }
  0x1a   : > { %s504_s7 = sshrl.u32 %s501_s30, 16  ;;  %p503_p11 = scmp.ne.f32.partialorder %s501_s30, %s501_s30 }
  0x1b   : > { %993 = vmatpush.bf16.msra.mxu0 %v5454_v9  ;;  %5668 = vmatpush.bf16.msra.mxu3 %v5454_v9  ;;  %s505_s11 = sand.u32 1, %s504_s7  ;;  %s5908_s16 = scalar_lea.vmem %s7542_s0, %s5689_s29 }
  0x1c   : > { %1051 = vmatpush.bf16.msra.mxu2 %v5470_v10  ;;  %s506_s17 = sadd.s32 32767, %s505_s11  ;;  %v477_v21 = vld [vmem:[%s5908_s16 + $0x8] sm:$0xf]  ;;  %v479_v22 = vld [vmem:[%s5908_s16 + $0x10] sm:$0xf]  ;;  %s7582_s10 = smov (!%p4136_p13, %s423_s10), 0 }
  0x1d   : > { %1022 = vmatpush.bf16.msra.mxu1 %v5462_v11  ;;  %s507_s19 = sadd.s32 %s506_s17, %s501_s30  ;;  %v485_v23 = vld [vmem:[%s5908_s16 + $0x28] sm:$0xf]  ;;  %v487_v24 = vld [vmem:[%s5908_s16 + $0x30] sm:$0xf]  ;;  %v478_v25 = vld [vmem:[%s5908_s16 + $0xc] sm:$0x1]  ;;  %v518_v28 = vunpack.c.l.bf16 %v477_v21  ;;  %v520_v29 = vunpack.c.l.bf16 %v479_v22  ;;  %s427_s28 = sadd.s32 %s7582_s10, %s5864_s18 }
  0x1e   : > { %s508_s7 = sand.u32 4294901760, %s507_s19  ;;  %v480_v26 = vld [vmem:[%s5908_s16 + $0x14] sm:$0x1]  ;;  %v526_v30 = vunpack.c.l.bf16 %v485_v23  ;;  %v481_v31 = vld [vmem:[%s5908_s16 + $0x18] sm:$0xf]  ;;  %v528_v35 = vunpack.c.l.bf16 %v487_v24  ;;  %v519_v37 = vunpack.c.l.bf16 %v478_v25  ;;  %p428_p0 = scmp.lt.s32.totalorder %s427_s28, 15 }
  0x1f   : > { %994 = vmatpush.bf16.msra.mxu0 %v5453_v12  ;;  %5669 = vmatpush.bf16.msra.mxu3 %v5453_v12  ;;  %s7580_s7 = smov (%p503_p11, %s508_s7), 2143289344  ;;  %v483_v32 = vld [vmem:[%s5908_s16 + $0x20] sm:$0xf]  ;;  %v521_v38 = vunpack.c.l.bf16 %v480_v26  ;;  %v5938_v39 = vld [vmem:[%s5908_s16 + $0x38] sm:$0xf]  ;;  %v522_v46 = vunpack.c.l.bf16 %v481_v31  ;;  %v5448_v11 = vld [vmem:[%s7545_s3 + $0xb0] sm:$0xff] }
  0x20   : > { %1052 = vmatpush.bf16.msra.mxu2 %v5469_v13  ;;  %s511_s11 = sshrl.u32 %s7580_s7, 16  ;;  %v5949_v43 = vld [vmem:[%s5908_s16 + $0x40] sm:$0xf]  ;;  %v524_v47 = vunpack.c.l.bf16 %v483_v32  ;;  %v482_v48 = vld [vmem:[%s5908_s16 + $0x1c] sm:$0x1]  ;;  %v530_v52 = vunpack.c.l.bf16 %v5938_v39  ;;  %v5447_v32 = vld [vmem:[%s7545_s3 + $0xa8] sm:$0xff] }
  0x21   : > { %1023 = vmatpush.bf16.msra.mxu1 %v5461_v14  ;;  %s512_s13 = sshll.u32 %s511_s11, 16  ;;  %v5963_v53 = vld [vmem:[%s5908_s16 + $0x24] sm:$0x1]  ;;  %v532_v58 = vunpack.c.l.bf16 %v5949_v43  ;;  %v523_v63 = vunpack.c.l.bf16 %v482_v48  ;;  %v5980_v5 = vld [vmem:[%s5908_s16] sm:$0xf]  ;;  %s7584_s28 = smov (!%p428_p0, %s427_s28), 15 }
  0x22   : > { %s513_s30 = sor.u32 %s512_s13, %s511_s11  ;;  %v525_v4 = vunpack.c.l.bf16 %v5963_v53  ;;  %v5983_v6 = vld [vmem:[%s5908_s16 + $0x4] sm:$0x1]  ;;  %v516_v21 = vunpack.c.l.bf16 %v5980_v5  ;;  %s5690_s17 = smul.u32 80, %s7584_s28 }
  0x23   : > { %995 = vmatpush.bf16.msra.mxu0 %v5452_v15  ;;  %5670 = vmatpush.bf16.msra.mxu3 %v5452_v15  ;;  %v514_v34 = vstv %s513_s30  ;;  %v5439_v15 = vld [vmem:[%s7545_s3 + $0x68] sm:$0xff]  ;;  %v517_v22 = vunpack.c.l.bf16 %v5983_v6  ;;  %v5478_v53 = vld [vmem:[%s7545_s3 + $0x1a0] sm:$0xff]  ;;  %s6703_s19 = sadd.s32 1, %s5755_s21 }
  0x24   : > { %1053 = vmatpush.bf16.msra.mxu2 %v5468_v16  ;;  %v5940_v40 = vunpack.c.l.bf16 %v514_v34  ;;  %s6345_s28 = scalar_lea.vmem %s7543_s1, %s5690_s17  ;;  %p2737_p1 = scmp.ge.s32.totalorder %s6703_s19, 0 }
  0x25   : > { %1024 = vmatpush.bf16.msra.mxu1 %v5460_v17  ;;  %v486_v17 = vld [vmem:[%s5908_s16 + $0x2c] sm:$0x1]  ;;  %p2738_p2 = scmp.le.s32.totalorder %s6703_s19, 7  ;;  %p440_p4 = scmp.lt.s32.totalorder %s6703_s19, 7 }
  0x26   : > { %v539_v49 = vmul.f32 %v5940_v40, %v518_v28  ;;  %v541_v50 = vmul.f32 %v5940_v40, %v520_v29  ;;  %v547_v51 = vmul.f32 %v5940_v40, %v526_v30  ;;  %v549_v54 = vmul.f32 %v5940_v40, %v528_v35  ;;  %v488_v28 = vld [vmem:[%s5908_s16 + $0x34] sm:$0x1]  ;;  %p4143_p5 = scmp.gt.s32.totalorder %s6703_s19, 0 }
  0x27   : > { %996 = vmatpush.bf16.msra.mxu0 %v5451_v18  ;;  %5671 = vmatpush.bf16.msra.mxu3 %v5451_v18  ;;  %v540_v55 = vmul.f32 %v5940_v40, %v519_v37  ;;  %v542_v56 = vmul.f32 %v5940_v40, %v521_v38  ;;  %v543_v10 = vmul.f32 %v5940_v40, %v522_v46  ;;  %v5438_v38 = vld [vmem:[%s7545_s3 + $0x60] sm:$0xff]  ;;  %p6733_p3 = pnand %p2738_p2, %p2737_p1 }
  0x28   : > { %1054 = vmatpush.bf16.msra.mxu2 %v5467_v19  ;;  %v559_v59 = vpack.c.bf16 %v539_v49, %v539_v49  ;;  %v561_v60 = vpack.c.bf16 %v541_v50, %v541_v50  ;;  %v567_v61 = vpack.c.bf16 %v547_v51, %v547_v51  ;;  %v569_v0 = vpack.c.bf16 %v549_v54, %v549_v54  ;;  %v5431_v19 = vld [vmem:[%s7545_s3 + $0x28] sm:$0xff]  ;;  %s441_s8 = scalar_select %p440_p4, %s6703_s19, 7 }
  0x29   : > { %1025 = vmatpush.bf16.msra.mxu1 %v5459_v20  ;;  %v560_v1 = vpack.c.bf16 %v540_v55, %v540_v55  ;;  %v562_v2 = vpack.c.bf16 %v542_v56, %v542_v56  ;;  %v545_v16 = vmul.f32 %v5940_v40, %v524_v47  ;;  %v563_v20 = vpack.c.bf16 %v543_v10, %v543_v10  ;;  %s4972_s20 = scalar_select %p6733_p3, 0, 1 }
  0x2a   : > { %v5985_v7 = vunpack.c.l.b16 %v559_v59  ;;  %v5987_v8 = vunpack.c.l.b16 %v561_v60  ;;  %v5989_v9 = vunpack.c.l.b16 %v567_v61  ;;  %v5995_v12 = vunpack.c.l.b16 %v569_v0  ;;  %v5429_v60 = vld [vmem:[%s7545_s3 + $0x18] sm:$0xff]  ;;  %s7586_s8 = smov (!%p4143_p5, %s441_s8), 0 }
  0x2b   : > { %997 = vmatpush.bf16.msra.mxu0 %v5450_v27  ;;  %5672 = vmatpush.bf16.msra.mxu3 %v5450_v27  ;;  %v600_v13 = vunpack.c.l.b16 %v560_v1  ;;  %v602_v14 = vunpack.c.l.b16 %v562_v2  ;;  %v551_v26 = vmul.f32 %v5940_v40, %v530_v52  ;;  %v5479_v27 = vld [vmem:[%s7545_s3 + $0x1a8] sm:$0xff]  ;;  %v565_v29 = vpack.c.bf16 %v545_v16, %v545_v16  ;;  %v5436_v16 = vld [vmem:[%s7545_s3 + $0x50] sm:$0xff]  ;;  %s6770_s7 = scvt.s32.f32 %s4972_s20  ;;  %s445_s10 = sadd.s32 %s7586_s8, %s5864_s18 }
  0x2c   : > { %1055 = vmatpush.bf16.msra.mxu2 %v5466_v33  ;;  %v822_v18 = vpack.c.b16 %v5987_v8, %v5985_v7  ;;  %v828_v23 = vpack.c.b16 %v5995_v12, %v5989_v9  ;;  %v553_v30 = vmul.f32 %v5940_v40, %v532_v58  ;;  %v544_v31 = vmul.f32 %v5940_v40, %v523_v63  ;;  %p446_p7 = scmp.lt.s32.totalorder %s445_s10, 15 }
  0x2d   : > { %1026 = vmatpush.bf16.msra.mxu1 %v5458_v42  ;;  %v618_v24 = vpack.c.b16 %v600_v13, %v5985_v7  ;;  %v619_v25 = vpack.c.b16 %v602_v14, %v5987_v8  ;;  %v527_v33 = vunpack.c.l.bf16 %v486_v17  ;;  %v5430_v42 = vld [vmem:[%s7545_s3 + $0x20] sm:$0xff]  ;;  %v6029_v43 = vunpack.c.l.b16 %v563_v20  ;;  %v5477_v13 = vld [vmem:[%s7545_s3 + $0x198] sm:$0xff]  ;;  %s2745_s30 = sshrl.u32 %s6770_s7, 16  ;;  %p2744_p6 = scmp.ne.f32.partialorder %s6770_s7, %s6770_s7 }
  0x2e   : > { %998 = vmatmul.bf16.vlgmr.msra.gmra.mxu0 %v822_v18  ;;  %1008 = vmatmul.bf16.vlgmr.msra.gmra.mxu3 %v828_v23  ;;  %v571_v48 = vpack.c.bf16 %v551_v26, %v551_v26  ;;  %v573_v50 = vpack.c.bf16 %v553_v30, %v553_v30  ;;  %v546_v51 = vmul.f32 %v5940_v40, %v525_v4  ;;  %v6043_v56 = vunpack.c.l.b16 %v565_v29  ;;  %v5446_v4 = vld [vmem:[%s7545_s3 + $0xa0] sm:$0xff]  ;;  %s2746_s22 = sand.u32 1, %s2745_s30  ;;  %s7590_s10 = smov (!%p446_p7, %s445_s10), 15 }
  0x2f   : > { %1274 = vmatpush.bf16.msrb.mxu0 %v5441_v36  ;;  %1245 = vmatpush.bf16.msrb.mxu3 %v5433_v41  ;;  %v698_v34 = vrot.slane %v618_v24, 1  ;;  %v699_v35 = vrot.slane %v619_v25, 1  ;;  %v635_v36 = vshrl.u32 %v618_v24, 16  ;;  %v637_v37 = vshll.u32 %v618_v24, 16  ;;  %s2747_s9 = sadd.s32 32767, %s2746_s22  ;;  %s5691_s11 = smul.u32 80, %s7590_s10 }
  0x30   : > { %1533 = vmatpush.bf16.msrb.mxu2 %v5481_v44  ;;  %v642_v39 = vshrl.u32 %v619_v25, 16  ;;  %v644_v41 = vshll.u32 %v619_v25, 16  ;;  %v529_v44 = vunpack.c.l.bf16 %v488_v28  ;;  %v564_v52 = vpack.c.bf16 %v544_v31, %v544_v31  ;;  %v5445_v31 = vld [vmem:[%s7545_s3 + $0x98] sm:$0xff] }
  0x31   : > { %1303 = vmatpush.bf16.msrb.mxu1 %v5449_v45  ;;  %v6031_v45 = vunpack.c.l.b16 %v698_v34  ;;  %v6033_v46 = vunpack.c.l.b16 %v699_v35  ;;  %v639_v47 = vrot.slane %v637_v37, 1  ;;  %v537_v58 = vmul.f32 %v5940_v40, %v516_v21  ;;  %v5428_v21 = vld [vmem:[%s7545_s3 + $0x10] sm:$0xff]  ;;  %v5435_v34 = vld [vmem:[%s7545_s3 + $0x48] sm:$0xff]  ;;  %s6885_s17 = scalar_lea.vmem %s7544_s2, %s5691_s11 }
  0x32   : > { %v646_v49 = vrot.slane %v644_v41, 1  ;;  %v566_v61 = vpack.c.bf16 %v546_v51, %v546_v51  ;;  %v538_v63 = vmul.f32 %v5940_v40, %v517_v22  ;;  %v548_v2 = vmul.f32 %v5940_v40, %v527_v33  ;;  %v490_v51 = vld [vmem:[%s5908_s16 + $0x3c] sm:$0x1] }
  0x33   : > { %1275 = vmatpush.bf16.msrb.mxu0 %v5440_v57  ;;  %1246 = vmatpush.bf16.msrb.mxu3 %v5432_v62  ;;  %v824_v54 = vpack.c.b16 %v6033_v46, %v6031_v45  ;;  %v6041_v55 = vor.u32 %v639_v47, %v635_v36  ;;  %v5437_v57 = vld [vmem:[%s7545_s3 + $0x58] sm:$0xff]  ;;  %v604_v62 = vunpack.c.l.b16 %v564_v52  ;;  %v557_v1 = vpack.c.bf16 %v537_v58, %v537_v58  ;;  %v5476_v36 = vld [vmem:[%s7545_s3 + $0x190] sm:$0xff]  ;;  %v5434_v52 = vld [vmem:[%s7545_s3 + $0x40] sm:$0xff] }
  0x34   : > { %1534 = vmatpush.bf16.msrb.mxu2 %v5480_v3  ;;  %v6049_v59 = vor.u32 %v646_v49, %v642_v39  ;;  %v550_v3 = vmul.f32 %v5940_v40, %v529_v44  ;;  %v606_v6 = vunpack.c.l.b16 %v566_v61  ;;  %v6066_v14 = vunpack.c.l.b16 %v571_v48  ;;  %v5497_v58 = vld [vmem:[%s7545_s3 + $0x238] sm:$0xff] }
  0x35   : > { %1304 = vmatpush.bf16.msrb.mxu1 %v5448_v11  ;;  %1056 = vmatmul.bf16.vlgmr.msra.gmra.mxu2 %v824_v54  ;;  %v709_v0 = vunpack.c.l.b16 %v6041_v55  ;;  %v620_v10 = vpack.c.b16 %v604_v62, %v6029_v43  ;;  %v558_v11 = vpack.c.bf16 %v538_v63, %v538_v63  ;;  %v6073_v17 = vunpack.c.l.b16 %v557_v1  ;;  %v492_v54 = vld [vmem:[%s5908_s16 + $0x44] sm:$0x1]  ;;  %v5489_v63 = vld [vmem:[%s7545_s3 + $0x1f8] sm:$0xff] }
  0x36   : > { %v711_v5 = vunpack.c.l.b16 %v6049_v59  ;;  %v621_v20 = vpack.c.b16 %v606_v6, %v6043_v56  ;;  %v568_v22 = vpack.c.bf16 %v548_v2, %v548_v2  ;;  %v570_v26 = vpack.c.bf16 %v550_v3, %v550_v3  ;;  %v5494_v55 = vld [vmem:[%s7545_s3 + $0x220] sm:$0xff]  ;;  %v5505_v59 = vld [vmem:[%s7545_s3 + $0x278] sm:$0xff] }
  0x37   : > { %1276 = vmatpush.bf16.msrb.mxu0 %v5439_v15  ;;  %1247 = vmatpush.bf16.msrb.mxu3 %v5431_v19  ;;  %v6068_v15 = vunpack.c.l.b16 %v573_v50  ;;  %v825_v19 = vpack.c.b16 %v6043_v56, %v6029_v43  ;;  %v700_v23 = vrot.slane %v620_v10, 1  ;;  %v651_v24 = vshll.u32 %v620_v10, 16 }
  0x38   : > { %1535 = vmatpush.bf16.msrb.mxu2 %v5479_v27  ;;  %v823_v18 = vpack.c.b16 %v711_v5, %v709_v0  ;;  %v598_v25 = vunpack.c.l.b16 %v558_v11  ;;  %v701_v27 = vrot.slane %v621_v20, 1  ;;  %v649_v28 = vshrl.u32 %v620_v10, 16  ;;  %v5496_v10 = vld [vmem:[%s7545_s3 + $0x230] sm:$0xff] }
  0x39   : > { %1305 = vmatpush.bf16.msrb.mxu1 %v5447_v32  ;;  %v656_v29 = vshrl.u32 %v621_v20, 16  ;;  %v658_v30 = vshll.u32 %v621_v20, 16  ;;  %v831_v32 = vpack.c.b16 %v6068_v15, %v6066_v14  ;;  %v653_v33 = vrot.slane %v651_v24, 1 }
  0x3a   : > { %1027 = vmatmul.bf16.vlgmr.msra.gmra.mxu1 %v823_v18  ;;  %v6094_v35 = vpack.c.b16 %v598_v25, %v6073_v17  ;;  %v608_v39 = vunpack.c.l.b16 %v568_v22  ;;  %v6102_v41 = vunpack.c.l.b16 %v700_v23  ;;  %v610_v47 = vunpack.c.l.b16 %v570_v26  ;;  %v5444_v18 = vld [vmem:[%s7545_s3 + $0x90] sm:$0xff]  ;;  %v5495_v25 = vld [vmem:[%s7545_s3 + $0x228] sm:$0xff] }
  0x3b   : > { %1277 = vmatpush.bf16.msrb.mxu0 %v5438_v38  ;;  %1248 = vmatpush.bf16.msrb.mxu3 %v5430_v42  ;;  %v660_v37 = vrot.slane %v658_v30, 1  ;;  %v5427_v38 = vld [vmem:[%s7545_s3 + $0x8] sm:$0xff]  ;;  %v6104_v42 = vunpack.c.l.b16 %v701_v27  ;;  %v6107_v48 = vor.u32 %v653_v33, %v649_v28  ;;  %v531_v1 = vunpack.c.l.bf16 %v490_v51  ;;  %v5493_v51 = vld [vmem:[%s7545_s3 + $0x218] sm:$0xff] }
  0x3c   : > { %1536 = vmatpush.bf16.msrb.mxu2 %v5478_v53  ;;  %v630_v44 = vshll.u32 %v6094_v35, 16  ;;  %v628_v50 = vshrl.u32 %v6094_v35, 16  ;;  %v622_v61 = vpack.c.b16 %v608_v39, %v5989_v9  ;;  %v623_v62 = vpack.c.b16 %v610_v47, %v5995_v12 }
  0x3d   : > { %1306 = vmatpush.bf16.msrb.mxu1 %v5446_v4  ;;  %v6109_v49 = vor.u32 %v660_v37, %v656_v29  ;;  %v713_v2 = vunpack.c.l.b16 %v6107_v48  ;;  %v533_v6 = vunpack.c.l.bf16 %v492_v54  ;;  %v552_v22 = vmul.f32 %v5940_v40, %v531_v1  ;;  %v5443_v37 = vld [vmem:[%s7545_s3 + $0x88] sm:$0xff] }
  0x3e   : > { %1003 = vmatmul.bf16.gmra.mxu0 %v825_v19  ;;  %1013 = vmatmul.bf16.gmra.mxu3 %v831_v32  ;;  %v632_v53 = vrot.slane %v630_v44, 1  ;;  %v665_v11 = vshll.u32 %v622_v61, 16  ;;  %v5475_v19 = vld [vmem:[%s7545_s3 + $0x188] sm:$0xff]  ;;  %v702_v24 = vrot.slane %v622_v61, 1  ;;  %v703_v26 = vrot.slane %v623_v62, 1 }
  0x3f   : > { %1278 = vmatpush.bf16.msrb.mxu0 %v5437_v57  ;;  %1249 = vmatpush.bf16.msrb.mxu3 %v5429_v60  ;;  %v5426_v57 = vld [vmem:[%s7545_s3] sm:$0xff]  ;;  %v827_v60 = vpack.c.b16 %v6104_v42, %v6102_v41  ;;  %v715_v3 = vunpack.c.l.b16 %v6109_v49  ;;  %v554_v23 = vmul.f32 %v5940_v40, %v533_v6  ;;  %v663_v27 = vshrl.u32 %v622_v61, 16  ;;  %v5513_v61 = vld [vmem:[%s7545_s3 + $0x2b8] sm:$0xff] }
  0x40   : > { %1537 = vmatpush.bf16.msrb.mxu2 %v5477_v13  ;;  %v633_v4 = vor.u32 %v632_v53, %v628_v50  ;;  %v672_v13 = vshll.u32 %v623_v62, 16  ;;  %v667_v28 = vrot.slane %v665_v11, 1  ;;  %v670_v29 = vshrl.u32 %v623_v62, 16  ;;  %v5486_v50 = vld [vmem:[%s7545_s3 + $0x1e0] sm:$0xff] }
  0x41   : > { %1307 = vmatpush.bf16.msrb.mxu1 %v5445_v31  ;;  %v826_v20 = vpack.c.b16 %v715_v3, %v713_v2  ;;  %v572_v32 = vpack.c.bf16 %v552_v22, %v552_v22  ;;  %v574_v33 = vpack.c.bf16 %v554_v23, %v554_v23  ;;  %v6171_v39 = vunpack.c.l.b16 %v703_v26  ;;  %v5504_v26 = vld [vmem:[%s7545_s3 + $0x270] sm:$0xff]  ;;  %v5510_v49 = vld [vmem:[%s7545_s3 + $0x2a0] sm:$0xff] }
  0x42   : > { %v674_v31 = vrot.slane %v672_v13, 1  ;;  %v1080_v48 = vpack.c.b16 %v6029_v43, %v5987_v8  ;;  %v5484_v8 = vld [vmem:[%s7545_s3 + $0x1d0] sm:$0xff]  ;;  %v5491_v43 = vld [vmem:[%s7545_s3 + $0x208] sm:$0xff] }
  0x43   : > { %1279 = vmatpush.bf16.msrb.mxu0 %v5436_v16  ;;  %1250 = vmatpush.bf16.msrb.mxu3 %v5428_v21  ;;  %v5488_v16 = vld [vmem:[%s7545_s3 + $0x1f0] sm:$0xff]  ;;  %v707_v21 = vunpack.c.l.b16 %v633_v4  ;;  %v612_v44 = vunpack.c.l.b16 %v572_v32  ;;  %v614_v47 = vunpack.c.l.b16 %v574_v33  ;;  %v6201_v4 = vpack.c.b16 %v713_v2, %v711_v5  ;;  %v5490_v32 = vld [vmem:[%s7545_s3 + $0x200] sm:$0xff] }
  0x44   : > { %1538 = vmatpush.bf16.msrb.mxu2 %v5476_v36  ;;  %v1077_v36 = vpack.c.b16 %v5985_v7, %v6073_v17  ;;  %v6173_v7 = vor.u32 %v667_v28, %v663_v27  ;;  %v6175_v17 = vor.u32 %v674_v31, %v670_v29  ;;  %v6214_v5 = vpack.c.b16 %v6066_v14, %v5995_v12  ;;  %v5512_v2 = vld [vmem:[%s7545_s3 + $0x2b0] sm:$0xff]  ;;  %v5511_v27 = vld [vmem:[%s7545_s3 + $0x2a8] sm:$0xff] }
  0x45   : > { %1061 = vmatmul.bf16.gmra.mxu2 %v827_v60  ;;  %1308 = vmatpush.bf16.msrb.mxu1 %v5444_v18  ;;  %v1078_v30 = vpack.c.b16 %v709_v0, %v707_v21  ;;  %v6169_v0 = vunpack.c.l.b16 %v702_v24  ;;  %v5442_v60 = vld [vmem:[%s7545_s3 + $0x80] sm:$0xff]  ;;  %v6245_v28 = vpack.c.b16 %v6102_v41, %v6033_v46  ;;  %v5483_v31 = vld [vmem:[%s7545_s3 + $0x1c8] sm:$0xff]  ;;  %v1083_v41 = vpack.c.b16 %v5989_v9, %v6043_v56  ;;  %v5529_v9 = vld [vmem:[%s7545_s3 + $0x338] sm:$0xff] }
  0x46   : > { %v717_v53 = vunpack.c.l.b16 %v6173_v7  ;;  %v719_v54 = vunpack.c.l.b16 %v6175_v17  ;;  %v5503_v46 = vld [vmem:[%s7545_s3 + $0x268] sm:$0xff]  ;;  %v697_v33 = vrot.slane %v6094_v35, 1  ;;  %v5520_v7 = vld [vmem:[%s7545_s3 + $0x2f0] sm:$0xff] }
  0x47   : > { %1280 = vmatpush.bf16.msrb.mxu0 %v5435_v34  ;;  %1251 = vmatpush.bf16.msrb.mxu3 %v5427_v38  ;;  %v5487_v34 = vld [vmem:[%s7545_s3 + $0x1e8] sm:$0xff]  ;;  %v5474_v38 = vld [vmem:[%s7545_s3 + $0x180] sm:$0xff]  ;;  %v6283_v35 = vpack.c.b16 %v6169_v0, %v6104_v42  ;;  %v5528_v42 = vld [vmem:[%s7545_s3 + $0x330] sm:$0xff] }
  0x48   : > { %1539 = vmatpush.bf16.msrb.mxu2 %v5475_v19  ;;  %v829_v62 = vpack.c.b16 %v719_v54, %v717_v53  ;;  %v5485_v19 = vld [vmem:[%s7545_s3 + $0x1d8] sm:$0xff]  ;;  %v708_v56 = vunpack.c.l.b16 %v697_v33  ;;  %v5527_v17 = vld [vmem:[%s7545_s3 + $0x328] sm:$0xff] }
  0x49   : > { %1309 = vmatpush.bf16.msrb.mxu1 %v5443_v37  ;;  %v1634_v33 = vld [vmem:[%s6345_s28 + $0x18] sm:$0xf] }
  0x4a   : > { %1032 = vmatmul.bf16.gmra.mxu1 %v826_v20  ;;  %v5492_v20 = vld [vmem:[%s7545_s3 + $0x210] sm:$0xff]  ;;  %v1079_v37 = vpack.c.b16 %v6031_v45, %v708_v56  ;;  %v5501_v45 = vld [vmem:[%s7545_s3 + $0x258] sm:$0xff] }
  0x4b   : > { %1281 = vmatpush.bf16.msrb.mxu0 %v5434_v52  ;;  %1252 = vmatpush.bf16.msrb.mxu3 %v5426_v57  ;;  %v830_v52 = vpack.c.b16 %v6171_v39, %v6169_v0  ;;  %v624_v57 = vpack.c.b16 %v612_v44, %v6066_v14  ;;  %v5508_v0 = vld [vmem:[%s7545_s3 + $0x290] sm:$0xff] }
  0x4c   : > { %1540 = vmatpush.bf16.msrb.mxu2 %v5474_v38  ;;  %v5500_v44 = vld [vmem:[%s7545_s3 + $0x250] sm:$0xff] }
  0x4d   : > { %1310 = vmatpush.bf16.msrb.mxu1 %v5442_v60  ;;  %v704_v6 = vrot.slane %v624_v57, 1  ;;  %v677_v11 = vshrl.u32 %v624_v57, 16 }
  0x4e   : > { %1282 = vmatmul.bf16.vlgmr.msrb.gmra.mxu0 %v1078_v30  ;;  %1253 = vmatmul.bf16.vlgmr.msrb.gmra.mxu3 %v1077_v36  ;;  %v6251_v30 = vpack.c.b16 %v717_v53, %v715_v3  ;;  %v5482_v3 = vld [vmem:[%s7545_s3 + $0x1c0] sm:$0xff]  ;;  %v5509_v36 = vld [vmem:[%s7545_s3 + $0x298] sm:$0xff] }
  0x4f   : > { %1591 = vmatpush.bf16.msra.mxu0 %v5497_v58  ;;  %1562 = vmatpush.bf16.msra.mxu3 %v5489_v63  ;;  %v625_v58 = vpack.c.b16 %v614_v47, %v6068_v15  ;;  %v679_v63 = vshll.u32 %v624_v57, 16  ;;  %v6221_v21 = vunpack.c.l.b16 %v704_v6  ;;  %v5507_v47 = vld [vmem:[%s7545_s3 + $0x288] sm:$0xff]  ;;  %v5506_v53 = vld [vmem:[%s7545_s3 + $0x280] sm:$0xff] }
  0x50   : > { %2040 = vmatpush.bf16.msra.mxu2 %v5513_v61  ;;  %v5518_v57 = vld [vmem:[%s7545_s3 + $0x2e0] sm:$0xff]  ;;  %v494_v61 = vld [vmem:[%s5908_s16 + $0x4c] sm:$0x1] }
  0x51   : > { %v686_v1 = vshll.u32 %v625_v58, 16  ;;  %v681_v13 = vrot.slane %v679_v63, 1  ;;  %2011 = vmatpush.bf16.msra.mxu1 %v5505_v59  ;;  %v1629_v63 = vld [vmem:[%s6345_s28 + $0x4] sm:$0x1]  ;;  %v1631_v6 = vld [vmem:[%s6345_s28 + $0xc] sm:$0x1]  ;;  %v1088_v56 = vpack.c.b16 %v6221_v21, %v6171_v39 }
  0x52   : > { %v5515_v39 = vld [vmem:[%s7545_s3 + $0x2c8] sm:$0xff] }
  0x53   : > { %1592 = vmatpush.bf16.msra.mxu0 %v5496_v10  ;;  %1563 = vmatpush.bf16.msra.mxu3 %v5488_v16  ;;  %v705_v10 = vrot.slane %v625_v58, 1  ;;  %v684_v16 = vshrl.u32 %v625_v58, 16  ;;  %v688_v18 = vrot.slane %v686_v1, 1  ;;  %v682_v23 = vor.u32 %v681_v13, %v677_v11  ;;  %v5525_v58 = vld [vmem:[%s7545_s3 + $0x318] sm:$0xff] }
  0x54   : > { %2041 = vmatpush.bf16.msra.mxu2 %v5512_v2  ;;  %v535_v11 = vunpack.c.l.bf16 %v494_v61  ;;  %v5535_v61 = vld [vmem:[%s7545_s3 + $0x368] sm:$0xff] }
  0x55   : > { %1066 = vmatmul.bf16.gmra.mxu2 %v830_v52  ;;  %v6223_v22 = vunpack.c.l.b16 %v705_v10  ;;  %v6226_v12 = vor.u32 %v688_v18, %v684_v16  ;;  %v721_v24 = vunpack.c.l.b16 %v682_v23  ;;  %2012 = vmatpush.bf16.msra.mxu1 %v5504_v26  ;;  %v5499_v52 = vld [vmem:[%s7545_s3 + $0x248] sm:$0xff]  ;;  %v5498_v10 = vld [vmem:[%s7545_s3 + $0x240] sm:$0xff]  ;;  %v1669_v16 = vunpack.c.l.b16 %v1629_v63  ;;  %v5537_v26 = vld [vmem:[%s7545_s3 + $0x378] sm:$0xff] }
  0x56   : > { %v556_v2 = vmul.f32 %v5940_v40, %v535_v11  ;;  %v5542_v63 = vld [vmem:[%s7545_s3 + $0x3a0] sm:$0xff] }
  0x57   : > { %1593 = vmatpush.bf16.msra.mxu0 %v5495_v25  ;;  %1564 = vmatpush.bf16.msra.mxu3 %v5487_v34  ;;  %v833_v14 = vpack.c.b16 %v6223_v22, %v6221_v21  ;;  %v771_v25 = vunpack.c.l.b16 %v6226_v12  ;;  %v5502_v34 = vld [vmem:[%s7545_s3 + $0x260] sm:$0xff]  ;;  %v6291_v38 = vpack.c.b16 %v721_v24, %v719_v54  ;;  %v493_v54 = vld [vmem:[%s5908_s16 + $0x48] sm:$0xf]  ;;  %s2748_s16 = sadd.s32 %s2747_s9, %s6770_s7 }
  0x58   : > { %2042 = vmatpush.bf16.msra.mxu2 %v5511_v27  ;;  %v534_v60 = vunpack.c.l.bf16 %v493_v54  ;;  %v5544_v27 = vld [vmem:[%s7545_s3 + $0x3b0] sm:$0xff]  ;;  %v5522_v21 = vld [vmem:[%s7545_s3 + $0x300] sm:$0xff]  ;;  %s2749_s14 = sand.u32 4294901760, %s2748_s16 }
  0x59   : > { %v832_v29 = vpack.c.b16 %v771_v25, %v721_v24  ;;  %2013 = vmatpush.bf16.msra.mxu1 %v5503_v46  ;;  %s7588_s14 = smov (%p2744_p6, %s2749_s14), 2143289344 }
  0x5a   : > { %1037 = vmatmul.bf16.gmra.mxu1 %v829_v62  ;;  %v6349_v62 = vld [vmem:[%s6345_s28] sm:$0xf]  ;;  %v555_v1 = vmul.f32 %v5940_v40, %v534_v60  ;;  %s2752_s29 = sshrl.u32 %s7588_s14, 16 }
  0x5b   : > { %1594 = vmatpush.bf16.msra.mxu0 %v5494_v55  ;;  %1565 = vmatpush.bf16.msra.mxu3 %v5486_v50  ;;  %v5521_v55 = vld [vmem:[%s7545_s3 + $0x2f8] sm:$0xff]  ;;  %v5519_v50 = vld [vmem:[%s7545_s3 + $0x2e8] sm:$0xff]  ;;  %v1668_v13 = vunpack.c.l.b16 %v6349_v62  ;;  %s2753_s14 = sshll.u32 %s2752_s29, 16 }
  0x5c   : > { %2043 = vmatpush.bf16.msra.mxu2 %v5510_v49  ;;  %v575_v59 = vpack.c.bf16 %v555_v1, %v555_v1  ;;  %v5541_v62 = vld [vmem:[%s7545_s3 + $0x398] sm:$0xff]  ;;  %s2754_s20 = sor.u32 %s2753_s14, %s2752_s29 }
  0x5d   : > { %2014 = vmatpush.bf16.msra.mxu1 %v5502_v34  ;;  %v6375_v23 = vpack.c.b16 %v1669_v16, %v1668_v13 }
  0x5e   : > { %1287 = vmatmul.bf16.gmra.mxu0 %v6201_v4  ;;  %1258 = vmatmul.bf16.gmra.mxu3 %v1080_v48 }
  0x5f   : > { %1595 = vmatpush.bf16.msra.mxu0 %v5493_v51  ;;  %1566 = vmatpush.bf16.msra.mxu3 %v5485_v19  ;;  %v5526_v51 = vld [vmem:[%s7545_s3 + $0x320] sm:$0xff]  ;;  %v1671_v19 = vunpack.c.l.b16 %v1631_v6  ;;  %v1701_v24 = vshll.u32 %v6375_v23, 16  ;;  %v5561_v6 = vld [vmem:[%s7545_s3 + $0x438] sm:$0xff] }
  0x60   : > { %2044 = vmatpush.bf16.msra.mxu2 %v5509_v36 }
  0x61   : > { %2015 = vmatpush.bf16.msra.mxu1 %v5501_v45  ;;  %v1703_v46 = vrot.slane %v1701_v24, 1  ;;  %v5543_v45 = vld [vmem:[%s7545_s3 + $0x3a8] sm:$0xff] }
  0x63   : > { %1596 = vmatpush.bf16.msra.mxu0 %v5492_v20  ;;  %1567 = vmatpush.bf16.msra.mxu3 %v5484_v8  ;;  %v5545_v20 = vld [vmem:[%s7545_s3 + $0x3b8] sm:$0xff] }
  0x64   : > { %2045 = vmatpush.bf16.msra.mxu2 %v5508_v0 }
  0x65   : > { %1071 = vmatmul.bf16.gmra.mxu2 %v833_v14  ;;  %2016 = vmatpush.bf16.msra.mxu1 %v5500_v44  ;;  %v576_v14 = vpack.c.bf16 %v556_v2, %v556_v2  ;;  %v1638_v2 = vld [vmem:[%s6345_s28 + $0x28] sm:$0xf] }
  0x67   : > { %1597 = vmatpush.bf16.msra.mxu0 %v5491_v43  ;;  %1568 = vmatpush.bf16.msra.mxu3 %v5483_v31  ;;  %v615_v43 = vunpack.c.l.b16 %v575_v59  ;;  %v616_v31 = vunpack.c.l.b16 %v576_v14 }
  0x68   : > { %2046 = vmatpush.bf16.msra.mxu2 %v5507_v47 }
  0x69   : > { %2017 = vmatpush.bf16.msra.mxu1 %v5499_v52  ;;  %v626_v34 = vpack.c.b16 %v616_v31, %v615_v43  ;;  %v6460_v31 = vunpack.c.l.b16 %v1638_v2 }
  0x6a   : > { %1042 = vmatmul.bf16.gmra.mxu1 %v832_v29  ;;  %v5516_v29 = vld [vmem:[%s7545_s3 + $0x2d0] sm:$0xff] }
  0x6b   : > { %1598 = vmatpush.bf16.msra.mxu0 %v5490_v32  ;;  %1569 = vmatpush.bf16.msra.mxu3 %v5482_v3  ;;  %v1699_v32 = vshrl.u32 %v6375_v23, 16  ;;  %v1633_v3 = vld [vmem:[%s6345_s28 + $0x14] sm:$0x1]  ;;  %v693_v44 = vshll.u32 %v626_v34, 16  ;;  %v691_v54 = vshrl.u32 %v626_v34, 16 }
  0x6c   : > { %2047 = vmatpush.bf16.msra.mxu2 %v5506_v53  ;;  %v5514_v53 = vld [vmem:[%s7545_s3 + $0x2c0] sm:$0xff] }
  0x6d   : > { %2018 = vmatpush.bf16.msra.mxu1 %v5498_v10  ;;  %v1704_v0 = vor.u32 %v1703_v46, %v1699_v32  ;;  %v5534_v46 = vld [vmem:[%s7545_s3 + $0x360] sm:$0xff] }
  0x6e   : > { %1292 = vmatmul.bf16.gmra.mxu0 %v6251_v30  ;;  %1263 = vmatmul.bf16.gmra.mxu3 %v1083_v41 }
  0x6f   : > { %2325 = vmatpush.bf16.msrb.mxu0 %v5529_v9  ;;  %2069 = vmatpush.bf16.msrb.mxu3 %v5521_v55  ;;  %v1635_v9 = vld [vmem:[%s6345_s28 + $0x1c] sm:$0x1] }
  0x70   : > { %v1675_v55 = vunpack.c.l.b16 %v1635_v9  ;;  %v5560_v9 = vld [vmem:[%s7545_s3 + $0x430] sm:$0xff] }
  0x73   : > { %2326 = vmatpush.bf16.msrb.mxu0 %v5528_v42  ;;  %2070 = vmatpush.bf16.msrb.mxu3 %v5520_v7  ;;  %v5536_v42 = vld [vmem:[%s7545_s3 + $0x370] sm:$0xff] }
  0x75   : > { %1541 = vmatmul.bf16.vlgmr.msrb.gmra.mxu2 %v1080_v48  ;;  %v5524_v48 = vld [vmem:[%s7545_s3 + $0x310] sm:$0xff] }
  0x76   : > { %2383 = vmatpush.bf16.msrb.mxu2 %v5545_v20 }
  0x77   : > { %2327 = vmatpush.bf16.msrb.mxu0 %v5527_v17  ;;  %2071 = vmatpush.bf16.msrb.mxu3 %v5519_v50 }
  0x7a   : > { %1311 = vmatmul.bf16.vlgmr.msrb.gmra.mxu1 %v1079_v37  ;;  %2384 = vmatpush.bf16.msrb.mxu2 %v5544_v27  ;;  %v6407_v37 = vunpack.c.l.b16 %v1634_v33  ;;  %v5553_v33 = vld [vmem:[%s7545_s3 + $0x3f8] sm:$0xff] }
  0x7b   : > { %2328 = vmatpush.bf16.msrb.mxu0 %v5526_v51  ;;  %2072 = vmatpush.bf16.msrb.mxu3 %v5518_v57  ;;  %v1778_v51 = vunpack.c.l.b16 %v1704_v0  ;;  %v695_v57 = vrot.slane %v693_v44, 1 }
  0x7c   : > { %2354 = vmatpush.bf16.msrb.mxu1 %v5537_v26  ;;  %v6427_v50 = vpack.c.b16 %v1675_v55, %v6407_v37 }
  0x7d   : > { %v696_v11 = vor.u32 %v695_v57, %v691_v54  ;;  %v5552_v54 = vld [vmem:[%s7545_s3 + $0x3f0] sm:$0xff]  ;;  %v5559_v57 = vld [vmem:[%s7545_s3 + $0x428] sm:$0xff] }
  0x7e   : > { %1297 = vmatmul.bf16.gmra.mxu0 %v6291_v38  ;;  %1268 = vmatmul.bf16.gmra.mxu3 %v6214_v5  ;;  %v1722_v60 = vshll.u32 %v6427_v50, 16  ;;  %v1720_v20 = vshrl.u32 %v6427_v50, 16 }
  0x7f   : > { %2329 = vmatpush.bf16.msrb.mxu0 %v5525_v58  ;;  %2385 = vmatpush.bf16.msrb.mxu2 %v5543_v45  ;;  %v1332_v26 = vunpack.c.l.b16 %v696_v11 }
  0x80   : > { %2355 = vmatpush.bf16.msrb.mxu1 %v5536_v42  ;;  %v1724_v59 = vrot.slane %v1722_v60, 1  ;;  %v1768_v60 = vrot.slane %v6375_v23, 1  ;;  %v1643_v23 = vld [vmem:[%s6345_s28 + $0x3c] sm:$0x1] }
  0x83   : > { %2330 = vmatpush.bf16.msrb.mxu0 %v5524_v48  ;;  %2386 = vmatpush.bf16.msrb.mxu2 %v5542_v63  ;;  %v1637_v48 = vld [vmem:[%s6345_s28 + $0x24] sm:$0x1] }
  0x84   : > { %2356 = vmatpush.bf16.msrb.mxu1 %v5535_v61 }
  0x85   : > { %1546 = vmatmul.bf16.gmra.mxu2 %v1083_v41 }
  0x87   : > { %2387 = vmatpush.bf16.msrb.mxu2 %v5541_v62  ;;  %v5551_v62 = vld [vmem:[%s7545_s3 + $0x3e8] sm:$0xff] }
  0x88   : > { %2357 = vmatpush.bf16.msrb.mxu1 %v5534_v46 }
  0x8a   : > { %1316 = vmatmul.bf16.gmra.mxu1 %v6245_v28 }
  0x8e   : > { %1599 = vmatmul.bf16.vlgmr.msra.gmra.mxu0 %v6245_v28  ;;  %1570 = vmatmul.bf16.vlgmr.msra.gmra.mxu3 %v6201_v4  ;;  %v1630_v4 = vld [vmem:[%s6345_s28 + $0x8] sm:$0xf]  ;;  %v1383_v28 = vpack.c.b16 %v615_v43, %v6068_v15  ;;  %v1632_v15 = vld [vmem:[%s6345_s28 + $0x10] sm:$0xf]  ;;  %v1639_v43 = vld [vmem:[%s6345_s28 + $0x2c] sm:$0x1] }
  0x8f   : > { %v6360_v18 = vunpack.c.l.b16 %v1630_v4  ;;  %v6405_v36 = vunpack.c.l.b16 %v1632_v15  ;;  %v706_v4 = vrot.slane %v626_v34, 1  ;;  %v1679_v32 = vunpack.c.l.b16 %v1639_v43 }
  0x90   : > { %v1384_v34 = vpack.c.b16 %v1332_v26, %v771_v25 }
  0x91   : > { %v6378_v8 = vpack.c.b16 %v1671_v19, %v6360_v18  ;;  %v1843_v14 = vpack.c.b16 %v6360_v18, %v1668_v13  ;;  %v1333_v24 = vunpack.c.l.b16 %v706_v4  ;;  %v6489_v55 = vpack.c.b16 %v1679_v32, %v6460_v31 }
  0x92   : > { %v6525_v11 = vpack.c.b16 %v6407_v37, %v6405_v36  ;;  %v2157_v46 = vpack.c.b16 %v6405_v36, %v6360_v18 }
  0x93   : > { %v1708_v40 = vshll.u32 %v6378_v8, 16  ;;  %v1706_v41 = vshrl.u32 %v6378_v8, 16  ;;  %v1736_v25 = vshll.u32 %v6489_v55, 16  ;;  %v1769_v61 = vrot.slane %v6378_v8, 1 }
  0x94   : > { %v1734_v4 = vshrl.u32 %v6489_v55, 16  ;;  %v1779_v8 = vunpack.c.l.b16 %v1768_v60  ;;  %v5550_v60 = vld [vmem:[%s7545_s3 + $0x3e0] sm:$0xff] }
  0x95   : > { %1551 = vmatmul.bf16.gmra.mxu2 %v6214_v5  ;;  %v5517_v5 = vld [vmem:[%s7545_s3 + $0x2d8] sm:$0xff]  ;;  %v1710_v49 = vrot.slane %v1708_v40, 1 }
  0x96   : > { %2073 = vmatpush.bf16.msrb.mxu3 %v5517_v5  ;;  %v1636_v5 = vld [vmem:[%s6345_s28 + $0x20] sm:$0xf] }
  0x97   : > { %v6415_v7 = vor.u32 %v1710_v49, %v1706_v41  ;;  %v6458_v27 = vunpack.c.l.b16 %v1636_v5  ;;  %v6470_v41 = vor.u32 %v1724_v59, %v1720_v20  ;;  %v6530_v59 = vunpack.c.l.b16 %v1769_v61  ;;  %v5557_v61 = vld [vmem:[%s7545_s3 + $0x418] sm:$0xff] }
  0x99   : > { %v1780_v52 = vunpack.c.l.b16 %v6415_v7  ;;  %v1784_v42 = vunpack.c.l.b16 %v6470_v41  ;;  %v5566_v7 = vld [vmem:[%s7545_s3 + $0x460] sm:$0xff]  ;;  %v5571_v41 = vld [vmem:[%s7545_s3 + $0x488] sm:$0xff] }
  0x9a   : > { %1321 = vmatmul.bf16.gmra.mxu1 %v6283_v35  ;;  %2074 = vmatpush.bf16.msrb.mxu3 %v5516_v29 }
  0x9e   : > { %1604 = vmatmul.bf16.gmra.mxu0 %v6283_v35  ;;  %1575 = vmatmul.bf16.gmra.mxu3 %v6251_v30  ;;  %v5523_v30 = vld [vmem:[%s7545_s3 + $0x308] sm:$0xff]  ;;  %v1673_v35 = vunpack.c.l.b16 %v1633_v3  ;;  %v1385_v3 = vpack.c.b16 %v1333_v24, %v6223_v22 }
  0x9f   : > { %2331 = vmatpush.bf16.msrb.mxu0 %v5523_v30  ;;  %2075 = vmatpush.bf16.msrb.mxu3 %v5515_v39  ;;  %v1677_v30 = vunpack.c.l.b16 %v1637_v48  ;;  %v5539_v24 = vld [vmem:[%s7545_s3 + $0x388] sm:$0xff] }
  0xa0   : > { %v6424_v47 = vpack.c.b16 %v1673_v35, %v6405_v36 }
  0xa1   : > { %v6486_v35 = vpack.c.b16 %v1677_v30, %v6458_v27 }
  0xa2   : > { %v1715_v58 = vshll.u32 %v6424_v47, 16  ;;  %v1713_v16 = vshrl.u32 %v6424_v47, 16 }
  0xa3   : > { %2332 = vmatpush.bf16.msrb.mxu0 %v5522_v21  ;;  %2076 = vmatpush.bf16.msrb.mxu3 %v5514_v53  ;;  %v1729_v12 = vshll.u32 %v6486_v35, 16  ;;  %v5533_v21 = vld [vmem:[%s7545_s3 + $0x358] sm:$0xff]  ;;  %v1727_v63 = vshrl.u32 %v6486_v35, 16 }
  0xa4   : > { %v1717_v19 = vrot.slane %v1715_v58, 1  ;;  %2358 = vmatpush.bf16.msrb.mxu1 %v5533_v21 }
  0xa5   : > { %1556 = vmatmul.bf16.gmra.mxu2 %v1383_v28 }
  0xa6   : > { %v6468_v13 = vor.u32 %v1717_v19, %v1713_v16  ;;  %v1641_v16 = vld [vmem:[%s6345_s28 + $0x34] sm:$0x1]  ;;  %v1642_v19 = vld [vmem:[%s6345_s28 + $0x38] sm:$0xf] }
  0xa7   : > { %2650 = vmatpush.bf16.msra.mxu0 %v5561_v6  ;;  %2621 = vmatpush.bf16.msra.mxu3 %v5553_v33  ;;  %v1738_v6 = vrot.slane %v1736_v25, 1  ;;  %v1681_v26 = vunpack.c.l.b16 %v1641_v16  ;;  %v5538_v25 = vld [vmem:[%s7545_s3 + $0x380] sm:$0xff] }
  0xa8   : > { %v1782_v22 = vunpack.c.l.b16 %v6468_v13 }
  0xa9   : > { %v6534_v43 = vor.u32 %v1738_v6, %v1734_v4  ;;  %v1770_v4 = vrot.slane %v6424_v47, 1  ;;  %v1771_v6 = vrot.slane %v6427_v50, 1  ;;  %v6603_v47 = vpack.c.b16 %v6460_v31, %v6458_v27 }
  0xaa   : > { %1326 = vmatmul.bf16.gmra.mxu1 %v1088_v56  ;;  %v6505_v44 = vpack.c.b16 %v1784_v42, %v1782_v22 }
  0xab   : > { %v999_v17 = vpop.f32.mrf.mxu0  ;;  %2651 = vmatpush.bf16.msra.mxu0 %v5560_v9  ;;  %2622 = vmatpush.bf16.msra.mxu3 %v5552_v54  ;;  %v1845_v9 = vpack.c.b16 %v6530_v59, %v1779_v8  ;;  %v6605_v8 = vunpack.c.l.b16 %v1770_v4 }
  0xae   : > { %1609 = vmatmul.bf16.gmra.mxu0 %v1088_v56  ;;  %1580 = vmatmul.bf16.gmra.mxu3 %v6291_v38  ;;  %v1844_v38 = vpack.c.b16 %v1780_v52, %v1778_v51 }
  0xaf   : > { %2652 = vmatpush.bf16.msra.mxu0 %v5559_v57  ;;  %2623 = vmatpush.bf16.msra.mxu3 %v5551_v62 }
  0xb1   : > { %v6444_v1 = vpop.f32.mrf.mxu3 }
  0xb3   : > { %v1001_v10 = vpop.f32.mrf.mxu0  ;;  %2624 = vmatpush.bf16.msra.mxu3 %v5550_v60 }
  0xb5   : > { %2048 = vmatmul.bf16.vlgmr.msra.gmra.mxu2 %v1844_v38  ;;  %v1731_v38 = vrot.slane %v1729_v12, 1  ;;  %v5531_v12 = vld [vmem:[%s7545_s3 + $0x348] sm:$0xff] }
  0xb7   : > { %v1028_v40 = vpop.f32.mrf.mxu1  ;;  %v6532_v2 = vor.u32 %v1731_v38, %v1727_v63 }
  0xb8   : > { %v1029_v28 = vadd.f32 %v1028_v40, %v999_v17  ;;  %v1057_v29 = vpop.f32.mrf.mxu2  ;;  %v5540_v17 = vld [vmem:[%s7545_s3 + $0x390] sm:$0xff] }
  0xb9   : > { %v6474_v15 = vpop.f32.mrf.mxu3  ;;  %2388 = vmatpush.bf16.msrb.mxu2 %v5540_v17 }
  0xba   : > { %v6472_v49 = vadd.f32 %v1057_v29, %v1029_v28  ;;  %2019 = vmatmul.bf16.vlgmr.msra.gmra.mxu1 %v1843_v14  ;;  %v5532_v14 = vld [vmem:[%s7545_s3 + $0x350] sm:$0xff]  ;;  %v6544_v28 = vunpack.c.l.b16 %v1642_v19  ;;  %v1683_v29 = vunpack.c.l.b16 %v1643_v23 }
  0xbb   : > { %v1004_v56 = vpop.f32.mrf.mxu0  ;;  %2359 = vmatpush.bf16.msrb.mxu1 %v5532_v14 }
  0xbc   : > { %v6566_v36 = vpack.c.b16 %v1683_v29, %v6544_v28 }
  0xbd   : > { %2389 = vmatpush.bf16.msrb.mxu2 %v5539_v24  ;;  %v5577_v24 = vld [vmem:[%s7545_s3 + $0x4b8] sm:$0xff] }
  0xbe   : > { %1614 = vmatmul.bf16.gmra.mxu0 %v1385_v3  ;;  %1585 = vmatmul.bf16.gmra.mxu3 %v1384_v34  ;;  %v5558_v3 = vld [vmem:[%s7545_s3 + $0x420] sm:$0xff]  ;;  %v1788_v34 = vunpack.c.l.b16 %v6534_v43  ;;  %v1750_v54 = vshll.u32 %v6566_v36, 16  ;;  %v1748_v19 = vshrl.u32 %v6566_v36, 16 }
  0xbf   : > { %v1030_v45 = vpop.f32.mrf.mxu1  ;;  %2653 = vmatpush.bf16.msra.mxu0 %v5558_v3  ;;  %2360 = vmatpush.bf16.msrb.mxu1 %v5531_v12  ;;  %v2160_v3 = vpack.c.b16 %v6458_v27, %v6407_v37 }
  0xc0   : > { %v1031_v0 = vadd.f32 %v1030_v45, %v1001_v10  ;;  %v1059_v39 = vpop.f32.mrf.mxu2  ;;  %v1640_v10 = vld [vmem:[%s6345_s28 + $0x30] sm:$0xf]  ;;  %v1752_v23 = vrot.slane %v1750_v54, 1 }
  0xc1   : > { %v6509_v53 = vpop.f32.mrf.mxu3  ;;  %v6542_v40 = vunpack.c.l.b16 %v1640_v10  ;;  %2390 = vmatpush.bf16.msrb.mxu2 %v5538_v25  ;;  %v5576_v54 = vld [vmem:[%s7545_s3 + $0x4b0] sm:$0xff] }
  0xc2   : > { %v6507_v51 = vadd.f32 %v1059_v39, %v1031_v0  ;;  %v6615_v29 = vor.u32 %v1752_v23, %v1748_v19 }
  0xc3   : > { %v1006_v58 = vpop.f32.mrf.mxu0  ;;  %v6563_v18 = vpack.c.b16 %v1681_v26, %v6542_v40  ;;  %2654 = vmatpush.bf16.msra.mxu0 %v5557_v61  ;;  %v6667_v19 = vpack.c.b16 %v6544_v28, %v6542_v40 }
  0xc4   : > { %v1792_v27 = vunpack.c.l.b16 %v6615_v29 }
  0xc5   : > { %2053 = vmatmul.bf16.gmra.mxu2 %v6505_v44  ;;  %v1743_v17 = vshll.u32 %v6563_v18, 16  ;;  %v1741_v10 = vshrl.u32 %v6563_v18, 16 }
  0xc6   : > { %3181 = vmatpush.bf16.msra.mxu2 %v5577_v24 }
  0xc7   : > { %v1033_v20 = vpop.f32.mrf.mxu1  ;;  %v1745_v16 = vrot.slane %v1743_v17, 1  ;;  %v5569_v17 = vld [vmem:[%s7545_s3 + $0x478] sm:$0xff] }
  0xc8   : > { %v1034_v5 = vadd.f32 %v1033_v20, %v1004_v56  ;;  %v1062_v48 = vpop.f32.mrf.mxu2  ;;  %v1786_v56 = vunpack.c.l.b16 %v6532_v2  ;;  %v5583_v2 = vld [vmem:[%s7545_s3 + $0x4e8] sm:$0xff] }
  0xc9   : > { %v6549_v32 = vpop.f32.mrf.mxu3  ;;  %v6613_v26 = vor.u32 %v1745_v16, %v1741_v10  ;;  %v1773_v10 = vrot.slane %v6489_v55, 1  ;;  %v5568_v55 = vld [vmem:[%s7545_s3 + $0x470] sm:$0xff] }
  0xca   : > { %v6546_v30 = vadd.f32 %v1062_v48, %v1034_v5  ;;  %2024 = vmatmul.bf16.gmra.mxu1 %v6525_v11  ;;  %v6578_v21 = vpack.c.b16 %v1788_v34, %v1786_v56  ;;  %v6607_v5 = vunpack.c.l.b16 %v1771_v6  ;;  %3182 = vmatpush.bf16.msra.mxu2 %v5576_v54  ;;  %v1772_v6 = vrot.slane %v6486_v35, 1 }
  0xcb   : > { %v1283_v33 = vpop.f32.mrf.mxu0  ;;  %v1790_v37 = vunpack.c.l.b16 %v6613_v26  ;;  %v2159_v54 = vpack.c.b16 %v6605_v8, %v6530_v59  ;;  %v2158_v59 = vpack.c.b16 %v1782_v22, %v1780_v52  ;;  %v5573_v52 = vld [vmem:[%s7545_s3 + $0x498] sm:$0xff] }
  0xcd   : > { %v6652_v60 = vpack.c.b16 %v1792_v27, %v1790_v37 }
  0xce   : > { %2333 = vmatmul.bf16.vlgmr.msrb.gmra.mxu0 %v2157_v46  ;;  %2077 = vmatmul.bf16.vlgmr.msrb.gmra.mxu3 %v1845_v9 }
  0xcf   : > { %v1035_v45 = vpop.f32.mrf.mxu1 }
  0xd0   : > { %v1036_v0 = vadd.f32 %v1035_v45, %v1006_v58  ;;  %v1064_v39 = vpop.f32.mrf.mxu2 }
  0xd1   : > { %v1254_v58 = vpop.f32.mrf.mxu3 }
  0xd2   : > { %v6582_v57 = vadd.f32 %v1064_v39, %v1036_v0  ;;  %v1255_v63 = vadd.f32 %v1254_v58, %v6472_v49  ;;  %v5530_v49 = vld [vmem:[%s7545_s3 + $0x340] sm:$0xff]  ;;  %v6631_v0 = vpack.c.b16 %v6607_v5, %v6605_v8  ;;  %v5548_v58 = vld [vmem:[%s7545_s3 + $0x3d0] sm:$0xff] }
  0xd3   : > { %v1285_v38 = vpop.f32.mrf.mxu0  ;;  %2361 = vmatpush.bf16.msrb.mxu1 %v5530_v49  ;;  %v6669_v49 = vunpack.c.l.b16 %v1772_v6  ;;  %v1644_v6 = vld [vmem:[%s6345_s28 + $0x40] sm:$0xf] }
  0xd4   : > { %v6596_v20 = vadd.f32 %v1283_v33, %v1255_v63  ;;  %v5556_v33 = vld [vmem:[%s7545_s3 + $0x410] sm:$0xff]  ;;  %v6731_v8 = vunpack.c.l.b16 %v1644_v6  ;;  %v5563_v6 = vld [vmem:[%s7545_s3 + $0x448] sm:$0xff] }
  0xd5   : > { %2058 = vmatmul.bf16.gmra.mxu2 %v6578_v21  ;;  %2655 = vmatpush.bf16.msra.mxu0 %v5556_v33 }
  0xd6   : > { %v2166_v22 = vpack.c.b16 %v6731_v8, %v6544_v28 }
  0xd7   : > { %v1038_v50 = vpop.f32.mrf.mxu1  ;;  %2679 = vmatpush.bf16.msra.mxu1 %v5569_v17  ;;  %v5593_v17 = vld [vmem:[%s7545_s3 + $0x538] sm:$0xff] }
  0xd8   : > { %v1039_v48 = vadd.f32 %v1038_v50, %v6444_v1  ;;  %v1067_v14 = vpop.f32.mrf.mxu2  ;;  %v5549_v1 = vld [vmem:[%s7545_s3 + $0x3d8] sm:$0xff]  ;;  %v6671_v50 = vunpack.c.l.b16 %v1773_v10 }
  0xd9   : > { %v1256_v62 = vpop.f32.mrf.mxu3  ;;  %2625 = vmatpush.bf16.msra.mxu3 %v5549_v1 }
  0xda   : > { %v6617_v46 = vadd.f32 %v1067_v14, %v1039_v48  ;;  %2029 = vmatmul.bf16.gmra.mxu1 %v6603_v47  ;;  %v1257_v9 = vadd.f32 %v1256_v62, %v6507_v51  ;;  %v5575_v48 = vld [vmem:[%s7545_s3 + $0x4a8] sm:$0xff]  ;;  %v2163_v62 = vpack.c.b16 %v6542_v40, %v6460_v31  ;;  %v5546_v40 = vld [vmem:[%s7545_s3 + $0x3c0] sm:$0xff] }
  0xdb   : > { %v1288_v45 = vpop.f32.mrf.mxu0  ;;  %3183 = vmatpush.bf16.msra.mxu2 %v5575_v48  ;;  %2680 = vmatpush.bf16.msra.mxu1 %v5568_v55 }
  0xdc   : > { %v6635_v39 = vadd.f32 %v1285_v38, %v1257_v9  ;;  %v6694_v9 = vpack.c.b16 %v6671_v50, %v6669_v49 }
  0xdd   : > { %2626 = vmatpush.bf16.msra.mxu3 %v5548_v58 }
  0xde   : > { %2338 = vmatmul.bf16.gmra.mxu0 %v2160_v3  ;;  %2082 = vmatmul.bf16.gmra.mxu3 %v6631_v0  ;;  %v5554_v3 = vld [vmem:[%s7545_s3 + $0x400] sm:$0xff] }
  0xdf   : > { %v1040_v12 = vpop.f32.mrf.mxu1 }
  0xe0   : > { %v1041_v25 = vadd.f32 %v1040_v12, %v6474_v15  ;;  %v1069_v51 = vpop.f32.mrf.mxu2  ;;  %v5555_v15 = vld [vmem:[%s7545_s3 + $0x408] sm:$0xff] }
  0xe1   : > { %v1259_v63 = vpop.f32.mrf.mxu3  ;;  %2656 = vmatpush.bf16.msra.mxu0 %v5555_v15 }
  0xe2   : > { %v6657_v61 = vadd.f32 %v1069_v51, %v1041_v25  ;;  %v1260_v38 = vadd.f32 %v1259_v63, %v6546_v30  ;;  %v5567_v25 = vld [vmem:[%s7545_s3 + $0x468] sm:$0xff]  ;;  %v5574_v51 = vld [vmem:[%s7545_s3 + $0x4a0] sm:$0xff] }
  0xe3   : > { %v1290_v4 = vpop.f32.mrf.mxu0  ;;  %2681 = vmatpush.bf16.msra.mxu1 %v5567_v25  ;;  %3184 = vmatpush.bf16.msra.mxu2 %v5574_v51 }
  0xe4   : > { %v6663_v16 = vadd.f32 %v1288_v45, %v1260_v38  ;;  %v1774_v38 = vrot.slane %v6563_v18, 1 }
  0xe5   : > { %2063 = vmatmul.bf16.gmra.mxu2 %v6652_v60  ;;  %2657 = vmatpush.bf16.msra.mxu0 %v5554_v3  ;;  %v5565_v3 = vld [vmem:[%s7545_s3 + $0x458] sm:$0xff] }
  0xe7   : > { %v1043_v23 = vpop.f32.mrf.mxu1  ;;  %3185 = vmatpush.bf16.msra.mxu2 %v5573_v52  ;;  %2682 = vmatpush.bf16.msra.mxu1 %v5566_v7 }
  0xe8   : > { %v1044_v30 = vadd.f32 %v1043_v23, %v6509_v53  ;;  %v1072_v35 = vpop.f32.mrf.mxu2  ;;  %v5547_v53 = vld [vmem:[%s7545_s3 + $0x3c8] sm:$0xff] }
  0xe9   : > { %v1261_v24 = vpop.f32.mrf.mxu3  ;;  %2627 = vmatpush.bf16.msra.mxu3 %v5547_v53  ;;  %3239 = vmatpush.bf16.msrb.mxu0 %v5593_v17  ;;  %v5564_v17 = vld [vmem:[%s7545_s3 + $0x450] sm:$0xff] }
  0xea   : > { %v6680_v14 = vadd.f32 %v1072_v35, %v1044_v30  ;;  %2034 = vmatmul.bf16.gmra.mxu1 %v6667_v19  ;;  %v1262_v1 = vadd.f32 %v1261_v24, %v6582_v57  ;;  %v5592_v35 = vld [vmem:[%s7545_s3 + $0x530] sm:$0xff] }
  0xeb   : > { %v1293_v33 = vpop.f32.mrf.mxu0  ;;  %2683 = vmatpush.bf16.msra.mxu1 %v5565_v3  ;;  %v5581_v3 = vld [vmem:[%s7545_s3 + $0x4d8] sm:$0xff] }
  0xec   : > { %v6696_v31 = vadd.f32 %v1290_v4, %v1262_v1  ;;  %v1775_v4 = vrot.slane %v6566_v36, 1  ;;  %v5572_v1 = vld [vmem:[%s7545_s3 + $0x490] sm:$0xff] }
  0xed   : > { %2628 = vmatpush.bf16.msra.mxu3 %v5546_v40  ;;  %3240 = vmatpush.bf16.msrb.mxu0 %v5592_v35  ;;  %v2162_v40 = vpack.c.b16 %v6669_v49, %v6607_v5  ;;  %v2161_v5 = vpack.c.b16 %v1786_v56, %v1784_v42  ;;  %v5590_v56 = vld [vmem:[%s7545_s3 + $0x520] sm:$0xff] }
  0xee   : > { %2343 = vmatmul.bf16.gmra.mxu0 %v2163_v62  ;;  %2087 = vmatmul.bf16.gmra.mxu3 %v6694_v9  ;;  %v6739_v36 = vunpack.c.l.b16 %v1775_v4 }
  0xef   : > { %v1045_v45 = vpop.f32.mrf.mxu1  ;;  %3186 = vmatpush.bf16.msra.mxu2 %v5572_v1  ;;  %2684 = vmatpush.bf16.msra.mxu1 %v5564_v17  ;;  %v5608_v17 = vld [vmem:[%s7545_s3 + $0x5b0] sm:$0xff] }
  0xf0   : > { %v1046_v57 = vadd.f32 %v1045_v45, %v6549_v32  ;;  %v1074_v12 = vpop.f32.mrf.mxu2 }
  0xf1   : > { %v1264_v32 = vpop.f32.mrf.mxu3 }
  0xf2   : > { %v6717_v58 = vadd.f32 %v1074_v12, %v1046_v57  ;;  %v1265_v15 = vadd.f32 %v1264_v32, %v6617_v46  ;;  %v6737_v46 = vunpack.c.l.b16 %v1774_v38  ;;  %v1645_v32 = vld [vmem:[%s6345_s28 + $0x44] sm:$0x1] }
  0xf3   : > { %v1295_v63 = vpop.f32.mrf.mxu0  ;;  %3187 = vmatpush.bf16.msra.mxu2 %v5571_v41  ;;  %2685 = vmatpush.bf16.msra.mxu1 %v5563_v6  ;;  %v1647_v41 = vld [vmem:[%s6345_s28 + $0x4c] sm:$0x1] }
  0xf4   : > { %v6725_v10 = vadd.f32 %v1293_v33, %v1265_v15  ;;  %v6765_v24 = vpack.c.b16 %v6739_v36, %v6737_v46  ;;  %v5584_v33 = vld [vmem:[%s7545_s3 + $0x4f0] sm:$0xff] }
  0xf5   : > { %2391 = vmatmul.bf16.vlgmr.msrb.gmra.mxu2 %v2159_v54 }
  0xf7   : > { %v1312_v18 = vpop.f32.mrf.mxu1 }
  0xf8   : > { %v6742_v23 = vadd.f32 %v1312_v18, %v6596_v20  ;;  %v6744_v30 = vpop.f32.mrf.mxu2  ;;  %v5585_v20 = vld [vmem:[%s7545_s3 + $0x4f8] sm:$0xff] }
  0xf9   : > { %v1266_v13 = vpop.f32.mrf.mxu3  ;;  %3210 = vmatpush.bf16.msrb.mxu3 %v5585_v20 }
  0xfa   : > { %2362 = vmatmul.bf16.vlgmr.msrb.gmra.mxu1 %v2158_v59  ;;  %v1267_v55 = vadd.f32 %v1266_v13, %v6657_v61  ;;  %v5570_v59 = vld [vmem:[%s7545_s3 + $0x480] sm:$0xff] }
  0xfb   : > { %v1298_v48 = vpop.f32.mrf.mxu0  ;;  %3188 = vmatpush.bf16.msra.mxu2 %v5570_v59 }
  0xfc   : > { %v6767_v28 = vadd.f32 %v1295_v63, %v1267_v55  ;;  %v1685_v63 = vunpack.c.l.b16 %v1645_v32 }
  0xfd   : > { %3211 = vmatpush.bf16.msrb.mxu3 %v5584_v33 }
  0xfe   : > { %2348 = vmatmul.bf16.gmra.mxu0 %v2166_v22  ;;  %2092 = vmatmul.bf16.gmra.mxu3 %v6765_v24  ;;  %v1696_v7 = vpack.c.b16 %v1685_v63, %v6731_v8  ;;  %v2164_v22 = vpack.c.b16 %v1790_v37, %v1788_v34 }
  0xff   : > { %v1314_v62 = vpop.f32.mrf.mxu1 }
 0x100   : > { %v6774_v61 = vadd.f32 %v1314_v62, %v6635_v39  ;;  %v6776_v53 = vpop.f32.mrf.mxu2  ;;  %v5591_v39 = vld [vmem:[%s7545_s3 + $0x528] sm:$0xff]  ;;  %v1757_v20 = vshll.u32 %v1696_v7, 16  ;;  %v1776_v43 = vrot.slane %v1696_v7, 1  ;;  %v1755_v26 = vshrl.u32 %v1696_v7, 16 }
 0x101   : > { %v1269_v45 = vpop.f32.mrf.mxu3  ;;  %3241 = vmatpush.bf16.msrb.mxu0 %v5591_v39  ;;  %3212 = vmatpush.bf16.msrb.mxu3 %v5583_v2 }
 0x102   : > { %v1270_v57 = vadd.f32 %v1269_v45, %v6680_v14  ;;  %v1759_v37 = vrot.slane %v1757_v20, 1  ;;  %v2718_v45 = vld [vmem:[%s6885_s17 + $0x8] sm:$0xf] }
 0x103   : > { %v1300_v12 = vpop.f32.mrf.mxu0 }
 0x104   : > { %v6796_v25 = vadd.f32 %v1298_v48, %v1270_v57  ;;  %v6890_v39 = vor.u32 %v1759_v37, %v1755_v26  ;;  %v2755_v57 = vstv %s2754_s20 }
 0x105   : > { %2396 = vmatmul.bf16.gmra.mxu2 %v2162_v40  ;;  %3242 = vmatpush.bf16.msrb.mxu0 %v5590_v56  ;;  %v6887_v40 = vunpack.c.l.b16 %v1776_v43 }
 0x106   : > { %v2106_v63 = vunpack.c.l.b16 %v6890_v39 }
 0x107   : > { %v1317_v49 = vpop.f32.mrf.mxu1 }
 0x108   : > { %v6803_v51 = vadd.f32 %v1317_v49, %v6663_v16  ;;  %v6805_v14 = vpop.f32.mrf.mxu2  ;;  %v5601_v49 = vld [vmem:[%s7545_s3 + $0x578] sm:$0xff] }
 0x109   : > { %v1271_v42 = vpop.f32.mrf.mxu3 }
 0x10a   : > { %2367 = vmatmul.bf16.gmra.mxu1 %v2161_v5  ;;  %v1272_v16 = vadd.f32 %v1271_v42, %v6717_v58 }
 0x10b   : > { %v1600_v54 = vpop.f32.mrf.mxu0 }
 0x10c   : > { %v6823_v15 = vadd.f32 %v1300_v12, %v1272_v16  ;;  %v6895_v12 = vld [vmem:[%s6345_s28 + $0x48] sm:$0xf]  ;;  %v2759_v16 = vunpack.c.l.bf16 %v2718_v45  ;;  %v2720_v45 = vld [vmem:[%s6885_s17 + $0x10] sm:$0xf] }
 0x10e   : > { %2658 = vmatmul.bf16.vlgmr.msra.gmra.mxu0 %v6505_v44  ;;  %2629 = vmatmul.bf16.vlgmr.msra.gmra.mxu3 %v6525_v11  ;;  %v5582_v44 = vld [vmem:[%s7545_s3 + $0x4e0] sm:$0xff]  ;;  %v2165_v11 = vpack.c.b16 %v6737_v46, %v6671_v50 }
 0x10f   : > { %v1319_v38 = vpop.f32.mrf.mxu1  ;;  %3213 = vmatpush.bf16.msrb.mxu3 %v5582_v44  ;;  %v5562_v46 = vld [vmem:[%s7545_s3 + $0x440] sm:$0xff] }
 0x110   : > { %v6830_v58 = vadd.f32 %v1319_v38, %v6696_v31  ;;  %v6832_v4 = vpop.f32.mrf.mxu2  ;;  %v5589_v31 = vld [vmem:[%s7545_s3 + $0x518] sm:$0xff]  ;;  %2686 = vmatpush.bf16.msra.mxu1 %v5562_v46  ;;  %v1687_v38 = vunpack.c.l.b16 %v1647_v41  ;;  %v2717_v44 = vld [vmem:[%s6885_s17 + $0x4] sm:$0x1]  ;;  %v5600_v46 = vld [vmem:[%s7545_s3 + $0x570] sm:$0xff] }
 0x111   : > { %v1571_v18 = vpop.f32.mrf.mxu3  ;;  %3243 = vmatpush.bf16.msrb.mxu0 %v5589_v31 }
 0x112   : > { %v1572_v52 = vadd.f32 %v1571_v18, %v6744_v30  ;;  %v5609_v30 = vld [vmem:[%s7545_s3 + $0x5b8] sm:$0xff] }
 0x113   : > { %v1602_v13 = vpop.f32.mrf.mxu0  ;;  %3524 = vmatpush.bf16.msrb.mxu2 %v5609_v30  ;;  %3214 = vmatpush.bf16.msrb.mxu3 %v5581_v3 }
 0x114   : > { %v1601_v50 = vadd.f32 %v1600_v54, %v1572_v52  ;;  %v6915_v54 = vunpack.c.l.bf16 %v2755_v57  ;;  %3495 = vmatpush.bf16.msrb.mxu1 %v5601_v49  ;;  %v2167_v52 = vpack.c.b16 %v2106_v63, %v1792_v27  ;;  %v2722_v49 = vld [vmem:[%s6885_s17 + $0x18] sm:$0xf] }
 0x115   : > { %2401 = vmatmul.bf16.gmra.mxu2 %v2165_v11  ;;  %v2719_v11 = vld [vmem:[%s6885_s17 + $0xc] sm:$0x1] }
 0x116   : > { %v6868_v55 = vadd.f32 %v1601_v50, %v6742_v23  ;;  %v5588_v23 = vld [vmem:[%s7545_s3 + $0x510] sm:$0xff]  ;;  %v2780_v7 = vmul.f32 %v6915_v54, %v2759_v16  ;;  %v2758_v50 = vunpack.c.l.bf16 %v2717_v44  ;;  %v2760_v20 = vunpack.c.l.bf16 %v2719_v11 }
 0x117   : > { %v1322_v35 = vpop.f32.mrf.mxu1  ;;  %3244 = vmatpush.bf16.msrb.mxu0 %v5588_v23  ;;  %3525 = vmatpush.bf16.msrb.mxu2 %v5608_v17  ;;  %v2721_v44 = vld [vmem:[%s6885_s17 + $0x14] sm:$0x1] }
 0x118   : > { %v6871_v48 = vadd.f32 %v1322_v35, %v6725_v10  ;;  %v6873_v62 = vpop.f32.mrf.mxu2  ;;  %v2800_v43 = vpack.c.bf16 %v2780_v7, %v2780_v7  ;;  %3496 = vmatpush.bf16.msrb.mxu1 %v5600_v46  ;;  %v2779_v23 = vmul.f32 %v6915_v54, %v2758_v50 }
 0x119   : > { %v1573_v34 = vpop.f32.mrf.mxu3 }
 0x11a   : > { %2372 = vmatmul.bf16.gmra.mxu1 %v2164_v22  ;;  %v1574_v10 = vadd.f32 %v1573_v34, %v6776_v53  ;;  %v2716_v53 = vld [vmem:[%s6885_s17] sm:$0xf]  ;;  %v5607_v22 = vld [vmem:[%s7545_s3 + $0x5a8] sm:$0xff]  ;;  %v2799_v41 = vpack.c.bf16 %v2779_v23, %v2779_v23 }
 0x11b   : > { %v1605_v1 = vpop.f32.mrf.mxu0  ;;  %v2757_v56 = vunpack.c.l.bf16 %v2716_v53  ;;  %3526 = vmatpush.bf16.msrb.mxu2 %v5607_v22  ;;  %v6962_v53 = vunpack.c.l.b16 %v2800_v43  ;;  %v2762_v22 = vunpack.c.l.bf16 %v2721_v44 }
 0x11c   : > { %v1603_v33 = vadd.f32 %v1602_v13, %v1574_v10  ;;  %v2781_v10 = vmul.f32 %v6915_v54, %v2760_v20  ;;  %v2839_v11 = vunpack.c.l.b16 %v2799_v41 }
 0x11d   : > { %v2778_v18 = vmul.f32 %v6915_v54, %v2757_v56 }
 0x11e   : > { %2663 = vmatmul.bf16.gmra.mxu0 %v6578_v21  ;;  %2634 = vmatmul.bf16.gmra.mxu3 %v6603_v47  ;;  %v6906_v21 = vadd.f32 %v1603_v33, %v6774_v61  ;;  %v2168_v47 = vpack.c.b16 %v6887_v40, %v6739_v36  ;;  %v5580_v61 = vld [vmem:[%s7545_s3 + $0x4d0] sm:$0xff]  ;;  %v1686_v36 = vunpack.c.l.b16 %v6895_v12  ;;  %v2801_v56 = vpack.c.bf16 %v2781_v10, %v2781_v10 }
 0x11f   : > { %v1324_v5 = vpop.f32.mrf.mxu1  ;;  %3215 = vmatpush.bf16.msrb.mxu3 %v5580_v61  ;;  %v2798_v30 = vpack.c.bf16 %v2778_v18, %v2778_v18  ;;  %v2783_v10 = vmul.f32 %v6915_v54, %v2762_v22 }
 0x120   : > { %v6909_v42 = vadd.f32 %v1324_v5, %v6767_v28  ;;  %v6911_v2 = vpop.f32.mrf.mxu2  ;;  %v5587_v28 = vld [vmem:[%s7545_s3 + $0x508] sm:$0xff]  ;;  %v6936_v13 = vpack.c.b16 %v1687_v38, %v1686_v36  ;;  %v5625_v38 = vld [vmem:[%s7545_s3 + $0x638] sm:$0xff]  ;;  %v2841_v7 = vunpack.c.l.b16 %v2801_v56 }
 0x121   : > { %v1576_v32 = vpop.f32.mrf.mxu3  ;;  %3245 = vmatpush.bf16.msrb.mxu0 %v5587_v28  ;;  %v2838_v33 = vunpack.c.l.b16 %v2798_v30  ;;  %v2761_v28 = vunpack.c.l.bf16 %v2720_v45  ;;  %v5624_v45 = vld [vmem:[%s7545_s3 + $0x630] sm:$0xff]  ;;  %v2803_v56 = vpack.c.bf16 %v2783_v10, %v2783_v10 }
 0x122   : > { %v1577_v6 = vadd.f32 %v1576_v32, %v6805_v14  ;;  %v1764_v26 = vshll.u32 %v6936_v13, 16  ;;  %v1762_v57 = vshrl.u32 %v6936_v13, 16  ;;  %v2763_v32 = vunpack.c.l.bf16 %v2722_v49 }
 0x123   : > { %v1607_v59 = vpop.f32.mrf.mxu0  ;;  %v6995_v30 = vpack.c.b16 %v2839_v11, %v2838_v33 }
 0x124   : > { %v1606_v31 = vadd.f32 %v1605_v1, %v1577_v6  ;;  %v1766_v5 = vrot.slane %v1764_v26, 1  ;;  %v2784_v46 = vmul.f32 %v6915_v54, %v2763_v32  ;;  %v5605_v26 = vld [vmem:[%s7545_s3 + $0x598] sm:$0xff] }
 0x125   : > { %2406 = vmatmul.bf16.gmra.mxu2 %v2168_v47  ;;  %v5599_v47 = vld [vmem:[%s7545_s3 + $0x568] sm:$0xff]  ;;  %v2871_v39 = vshll.u32 %v6995_v30, 16  ;;  %v5597_v32 = vld [vmem:[%s7545_s3 + $0x558] sm:$0xff] }
 0x126   : > { %v6945_v29 = vadd.f32 %v1606_v31, %v6803_v51  ;;  %v5579_v51 = vld [vmem:[%s7545_s3 + $0x4c8] sm:$0xff]  ;;  %3497 = vmatpush.bf16.msrb.mxu1 %v5599_v47  ;;  %v2804_v23 = vpack.c.bf16 %v2784_v46, %v2784_v46  ;;  %v2724_v47 = vld [vmem:[%s6885_s17 + $0x20] sm:$0xf] }
 0x127   : > { %v1327_v14 = vpop.f32.mrf.mxu1  ;;  %3216 = vmatpush.bf16.msrb.mxu3 %v5579_v51  ;;  %v2873_v12 = vrot.slane %v2871_v39, 1 }
 0x128   : > { %v6948_v27 = vadd.f32 %v1327_v14, %v6796_v25  ;;  %v6950_v35 = vpop.f32.mrf.mxu2  ;;  %v5586_v25 = vld [vmem:[%s7545_s3 + $0x500] sm:$0xff]  ;;  %v2782_v14 = vmul.f32 %v6915_v54, %v2761_v28  ;;  %v7030_v41 = vunpack.c.l.b16 %v2804_v23  ;;  %v2727_v23 = vld [vmem:[%s6885_s17 + $0x2c] sm:$0x1] }
 0x129   : > { %v1578_v34 = vpop.f32.mrf.mxu3  ;;  %3246 = vmatpush.bf16.msrb.mxu0 %v5586_v25 }
 0x12a   : > { %2377 = vmatmul.bf16.gmra.mxu1 %v2167_v52  ;;  %v1579_v37 = vadd.f32 %v1578_v34, %v6832_v4  ;;  %v5578_v4 = vld [vmem:[%s7545_s3 + $0x4c0] sm:$0xff]  ;;  %v2723_v52 = vld [vmem:[%s6885_s17 + $0x1c] sm:$0x1]  ;;  %v6998_v34 = vpack.c.b16 %v2841_v7, %v6962_v53  ;;  %v5616_v7 = vld [vmem:[%s7545_s3 + $0x5f0] sm:$0xff] }
 0x12b   : > { %v1610_v3 = vpop.f32.mrf.mxu0  ;;  %3217 = vmatpush.bf16.msrb.mxu3 %v5578_v4 }
 0x12c   : > { %v1608_v1 = vadd.f32 %v1607_v59, %v1579_v37  ;;  %v2802_v37 = vpack.c.bf16 %v2782_v14, %v2782_v14  ;;  %v2939_v46 = vrot.slane %v6998_v34, 1 }
 0x12d   : > { %3791 = vmatpush.bf16.msra.mxu0 %v5625_v38  ;;  %v5604_v38 = vld [vmem:[%s7545_s3 + $0x590] sm:$0xff] }
 0x12e   : > { %2668 = vmatmul.bf16.gmra.mxu0 %v6652_v60  ;;  %2639 = vmatmul.bf16.gmra.mxu3 %v6667_v19  ;;  %v5606_v60 = vld [vmem:[%s7545_s3 + $0x5a0] sm:$0xff]  ;;  %v3013_v19 = vpack.c.b16 %v6962_v53, %v2838_v33  ;;  %v6988_v6 = vadd.f32 %v1608_v1, %v6830_v58  ;;  %v2764_v58 = vunpack.c.l.bf16 %v2723_v52  ;;  %v5623_v52 = vld [vmem:[%s7545_s3 + $0x628] sm:$0xff] }
 0x12f   : > { %v1329_v17 = vpop.f32.mrf.mxu1  ;;  %3527 = vmatpush.bf16.msrb.mxu2 %v5606_v60  ;;  %v2726_v60 = vld [vmem:[%s6885_s17 + $0x28] sm:$0xf] }
 0x130   : > { %v6979_v16 = vadd.f32 %v1329_v17, %v6823_v15  ;;  %v6981_v61 = vpop.f32.mrf.mxu2  ;;  %v1767_v15 = vor.u32 %v1766_v5, %v1762_v57  ;;  %v2785_v57 = vmul.f32 %v6915_v54, %v2764_v58  ;;  %v7028_v17 = vunpack.c.l.b16 %v2802_v37 }
 0x131   : > { %v1581_v59 = vpop.f32.mrf.mxu3  ;;  %3792 = vmatpush.bf16.msra.mxu0 %v5624_v45  ;;  %v2767_v44 = vunpack.c.l.bf16 %v2726_v60 }
 0x132   : > { %v1582_v31 = vadd.f32 %v1581_v59, %v6873_v62  ;;  %v2420_v20 = vunpack.c.l.b16 %v1767_v15  ;;  %v5598_v62 = vld [vmem:[%s7545_s3 + $0x560] sm:$0xff]  ;;  %v2765_v15 = vunpack.c.l.bf16 %v2724_v47 }
 0x133   : > { %v1612_v18 = vpop.f32.mrf.mxu0  ;;  %3498 = vmatpush.bf16.msrb.mxu1 %v5598_v62  ;;  %3528 = vmatpush.bf16.msrb.mxu2 %v5605_v26  ;;  %v2725_v26 = vld [vmem:[%s6885_s17 + $0x24] sm:$0x1]  ;;  %v2788_v37 = vmul.f32 %v6915_v54, %v2767_v44 }
 0x134   : > { %v1611_v50 = vadd.f32 %v1610_v3, %v1582_v31  ;;  %v2472_v33 = vpack.c.b16 %v2420_v20, %v2106_v63  ;;  %v2878_v63 = vshll.u32 %v6998_v34, 16  ;;  %v7046_v31 = vpack.c.b16 %v7030_v41, %v7028_v17 }
 0x135   : > { %3189 = vmatmul.bf16.vlgmr.msra.gmra.mxu2 %v3013_v19  ;;  %3793 = vmatpush.bf16.msra.mxu0 %v5623_v52  ;;  %v2808_v47 = vpack.c.bf16 %v2788_v37, %v2788_v37 }
 0x136   : > { %v7007_v51 = vadd.f32 %v1611_v50, %v6871_v48  ;;  %v5617_v48 = vld [vmem:[%s7545_s3 + $0x5f8] sm:$0xff]  ;;  %v2880_v19 = vrot.slane %v2878_v63, 1  ;;  %v2938_v50 = vrot.slane %v6995_v30, 1 }
 0x137   : > { %v2020_v43 = vpop.f32.mrf.mxu1  ;;  %3553 = vmatpush.bf16.msra.mxu3 %v5617_v48  ;;  %3499 = vmatpush.bf16.msrb.mxu1 %v5597_v32  ;;  %v2766_v48 = vunpack.c.l.bf16 %v2725_v26 }
 0x138   : > { %v2049_v25 = vpop.f32.mrf.mxu2  ;;  %3529 = vmatpush.bf16.msrb.mxu2 %v5604_v38 }
 0x139   : > { %v7009_v3 = vadd.f32 %v2049_v25, %v2020_v43  ;;  %v1583_v1 = vpop.f32.mrf.mxu3  ;;  %v2786_v25 = vmul.f32 %v6915_v54, %v2765_v15  ;;  %v7106_v15 = vunpack.c.l.b16 %v2808_v47 }
 0x13a   : > { %2687 = vmatmul.bf16.vlgmr.msra.gmra.mxu1 %v6631_v0  ;;  %v1584_v5 = vadd.f32 %v1583_v1, %v6911_v2  ;;  %v2471_v0 = vpack.c.b16 %v1686_v36, %v6731_v8  ;;  %v2805_v2 = vpack.c.bf16 %v2785_v57, %v2785_v57  ;;  %v2869_v8 = vshrl.u32 %v6995_v30, 16 }
 0x13b   : > { %v1615_v49 = vpop.f32.mrf.mxu0  ;;  %v2876_v36 = vshrl.u32 %v6998_v34, 16  ;;  %3554 = vmatpush.bf16.msra.mxu3 %v5616_v7  ;;  %v2949_v34 = vunpack.c.l.b16 %v2938_v50  ;;  %v7070_v1 = vunpack.c.l.b16 %v2939_v46  ;;  %v2730_v50 = vld [vmem:[%s6885_s17 + $0x38] sm:$0xf] }
 0x13c   : > { %v1613_v4 = vadd.f32 %v1612_v18, %v1584_v5  ;;  %v2843_v18 = vunpack.c.l.b16 %v2803_v56  ;;  %v2845_v22 = vunpack.c.l.b16 %v2805_v2  ;;  %v2874_v43 = vor.u32 %v2873_v12, %v2869_v8  ;;  %v5622_v12 = vld [vmem:[%s7545_s3 + $0x620] sm:$0xff] }
 0x13d   : > { %v7057_v62 = vor.u32 %v2880_v19, %v2876_v36  ;;  %v2787_v36 = vmul.f32 %v6915_v54, %v2766_v48  ;;  %3794 = vmatpush.bf16.msra.mxu0 %v5622_v12  ;;  %v2771_v48 = vunpack.c.l.bf16 %v2730_v50 }
 0x13e   : > { %2673 = vmatmul.bf16.gmra.mxu0 %v2472_v33  ;;  %2644 = vmatmul.bf16.gmra.mxu3 %v2471_v0  ;;  %v7064_v10 = vadd.f32 %v1613_v4, %v6909_v42  ;;  %v7073_v33 = vpack.c.b16 %v2845_v22, %v7030_v41  ;;  %v2948_v57 = vunpack.c.l.b16 %v2874_v43  ;;  %v5596_v42 = vld [vmem:[%s7545_s3 + $0x550] sm:$0xff]  ;;  %v2768_v0 = vunpack.c.l.bf16 %v2727_v23 }
 0x13f   : > { %v2022_v28 = vpop.f32.mrf.mxu1  ;;  %v2950_v5 = vunpack.c.l.b16 %v7057_v62  ;;  %v2806_v4 = vpack.c.bf16 %v2786_v25, %v2786_v25  ;;  %3500 = vmatpush.bf16.msrb.mxu1 %v5596_v42  ;;  %v2807_v46 = vpack.c.bf16 %v2787_v36, %v2787_v36 }
 0x140   : > { %v2051_v59 = vpop.f32.mrf.mxu2  ;;  %v2892_v8 = vshll.u32 %v7073_v33, 16  ;;  %v2789_v38 = vmul.f32 %v6915_v54, %v2768_v0  ;;  %v2941_v0 = vrot.slane %v7073_v33, 1 }
 0x141   : > { %v7042_v11 = vadd.f32 %v2051_v59, %v2022_v28  ;;  %v1586_v14 = vpop.f32.mrf.mxu3  ;;  %v3015_v28 = vpack.c.b16 %v7070_v1, %v2949_v34  ;;  %v3014_v32 = vpack.c.b16 %v2950_v5, %v2948_v57  ;;  %v7104_v59 = vunpack.c.l.b16 %v2806_v4 }
 0x142   : > { %v1587_v20 = vadd.f32 %v1586_v14, %v6950_v35  ;;  %v7068_v35 = vpack.c.b16 %v2843_v18, %v7028_v17  ;;  %v2894_v52 = vrot.slane %v2892_v8, 1  ;;  %v2728_v14 = vld [vmem:[%s6885_s17 + $0x30] sm:$0xf]  ;;  %v2809_v43 = vpack.c.bf16 %v2789_v38, %v2789_v38 }
 0x143   : > { %v1617_v58 = vpop.f32.mrf.mxu0  ;;  %v7123_v37 = vpack.c.b16 %v7106_v15, %v7104_v59  ;;  %v2769_v34 = vunpack.c.l.bf16 %v2728_v14 }
 0x144   : > { %v1616_v30 = vadd.f32 %v1615_v49, %v1587_v20  ;;  %v5603_v49 = vld [vmem:[%s7545_s3 + $0x588] sm:$0xff]  ;;  %v2885_v56 = vshll.u32 %v7068_v35, 16  ;;  %v2883_v18 = vshrl.u32 %v7068_v35, 16 }
 0x145   : > { %3194 = vmatmul.bf16.gmra.mxu2 %v7046_v31  ;;  %v5595_v20 = vld [vmem:[%s7545_s3 + $0x548] sm:$0xff] }
 0x146   : > { %v7083_v39 = vadd.f32 %v1616_v30, %v6948_v27  ;;  %3530 = vmatpush.bf16.msrb.mxu2 %v5603_v49  ;;  %v5615_v27 = vld [vmem:[%s7545_s3 + $0x5e8] sm:$0xff]  ;;  %v2887_v7 = vrot.slane %v2885_v56, 1  ;;  %3501 = vmatpush.bf16.msrb.mxu1 %v5595_v20  ;;  %v2940_v49 = vrot.slane %v7068_v35, 1  ;;  %v2849_v56 = vunpack.c.l.b16 %v2809_v43 }
 0x147   : > { %v2025_v45 = vpop.f32.mrf.mxu1  ;;  %3555 = vmatpush.bf16.msra.mxu3 %v5615_v27  ;;  %v2790_v35 = vmul.f32 %v6915_v54, %v2769_v34 }
 0x148   : > { %v2054_v63 = vpop.f32.mrf.mxu2  ;;  %v7127_v30 = vor.u32 %v2887_v7, %v2883_v18  ;;  %v7155_v36 = vunpack.c.l.b16 %v2940_v49  ;;  %v2863_v38 = vpack.c.b16 %v2849_v56, %v7106_v15 }
 0x149   : > { %v7085_v60 = vadd.f32 %v2054_v63, %v2025_v45  ;;  %v1588_v2 = vpop.f32.mrf.mxu3  ;;  %v5621_v45 = vld [vmem:[%s7545_s3 + $0x618] sm:$0xff]  ;;  %v2847_v63 = vunpack.c.l.b16 %v2807_v46  ;;  %v2810_v14 = vpack.c.bf16 %v2790_v35, %v2790_v35 }
 0x14a   : > { %2692 = vmatmul.bf16.gmra.mxu1 %v6694_v9  ;;  %v1589_v19 = vadd.f32 %v1588_v2, %v6981_v61  ;;  %v2890_v61 = vshrl.u32 %v7073_v33, 16  ;;  %3795 = vmatpush.bf16.msra.mxu0 %v5621_v45  ;;  %v2729_v2 = vld [vmem:[%s6885_s17 + $0x34] sm:$0x1]  ;;  %v2952_v27 = vunpack.c.l.b16 %v7127_v30  ;;  %v2792_v33 = vmul.f32 %v6915_v54, %v2771_v48 }
 0x14b   : > { %v7099_v9 = vpop.f32.mrf.mxu0  ;;  %v2906_v34 = vshll.u32 %v2863_v38, 16  ;;  %v5620_v45 = vld [vmem:[%s7545_s3 + $0x610] sm:$0xff]  ;;  %v7194_v49 = vunpack.c.l.b16 %v2810_v14 }
 0x14c   : > { %v1618_v44 = vadd.f32 %v1617_v58, %v1589_v19  ;;  %v5602_v58 = vld [vmem:[%s7545_s3 + $0x580] sm:$0xff]  ;;  %v7135_v42 = vor.u32 %v2894_v52, %v2890_v61  ;;  %v7157_v19 = vunpack.c.l.b16 %v2941_v0  ;;  %v7164_v61 = vld [vmem:[%s7545_s3 + $0x6b8] sm:$0xff]  ;;  %v2812_v50 = vpack.c.bf16 %v2792_v33, %v2792_v33 }
 0x14d   : > { %3531 = vmatpush.bf16.msrb.mxu2 %v5602_v58  ;;  %v1777_v0 = vrot.slane %v6936_v13, 1  ;;  %v7207_v13 = vld [vmem:[%s7545_s3 + $0x6b0] sm:$0xff] }
 0x14e   : > { %3247 = vmatmul.bf16.vlgmr.msrb.gmra.mxu0 %v3015_v28  ;;  %3218 = vmatmul.bf16.vlgmr.msrb.gmra.mxu3 %v3014_v32  ;;  %v7119_v26 = vadd.f32 %v1618_v44, %v6979_v16  ;;  %v5614_v16 = vld [vmem:[%s7545_s3 + $0x5e0] sm:$0xff]  ;;  %v2731_v28 = vld [vmem:[%s6885_s17 + $0x3c] sm:$0x1]  ;;  %v7551_v12 = vunpack.c.l.b16 %v7135_v42  ;;  %v2862_v32 = vpack.c.b16 %v2847_v63, %v7104_v59  ;;  %v2770_v44 = vunpack.c.l.bf16 %v2729_v2 }
 0x14f   : > { %v2027_v22 = vpop.f32.mrf.mxu1  ;;  %3556 = vmatpush.bf16.msra.mxu3 %v5614_v16  ;;  %v2772_v18 = vunpack.c.l.bf16 %v2731_v28  ;;  %v7177_v20 = vpack.c.b16 %v7157_v19, %v7155_v36  ;;  %v5613_v16 = vld [vmem:[%s7545_s3 + $0x5d8] sm:$0xff]  ;;  %v2904_v2 = vshrl.u32 %v2863_v38, 16  ;;  %v2908_v28 = vrot.slane %v2906_v34, 1  ;;  %3796 = vmatpush.bf16.msra.mxu0 %v5620_v45 }
 0x150   : > { %v2056_v25 = vpop.f32.mrf.mxu2  ;;  %v2899_v58 = vshll.u32 %v2862_v32, 16  ;;  %v2897_v63 = vshrl.u32 %v2862_v32, 16 }
 0x151   : > { %v7125_v23 = vadd.f32 %v2056_v25, %v2027_v22  ;;  %v2078_v57 = vpop.f32.mrf.mxu3  ;;  %v7173_v22 = vpack.c.b16 %v7551_v12, %v2952_v27  ;;  %3849 = vmatpush.bf16.msra.mxu2 %v7164_v61  ;;  %v2793_v48 = vmul.f32 %v6915_v54, %v2772_v18  ;;  %v7221_v34 = vor.u32 %v2908_v28, %v2904_v2 }
 0x152   : > { %v2079_v4 = vadd.f32 %v2078_v57, %v7009_v3  ;;  %v5594_v3 = vld [vmem:[%s7545_s3 + $0x540] sm:$0xff] }
 0x153   : > { %v7140_v47 = vpop.f32.mrf.mxu0  ;;  %3502 = vmatpush.bf16.msrb.mxu1 %v5594_v3  ;;  %7556 = vst [vmem:[#allocation2_spill] sm:$0xff] %v7173_v22  ;;  %3557 = vmatpush.bf16.msra.mxu3 %v5613_v16  ;;  %v5633_v3 = vld [vmem:[%s7545_s3 + $0x678] sm:$0xff]  ;;  %v5612_v16 = vld [vmem:[%s7545_s3 + $0x5d0] sm:$0xff] }
 0x154   : > { %v7146_v8 = vadd.f32 %v2079_v4, %v6868_v55  ;;  %v2901_v4 = vrot.slane %v2899_v58, 1 }
 0x155   : > { %3199 = vmatmul.bf16.gmra.mxu2 %v7123_v37 }
 0x156   : > { %v7215_v14 = vor.u32 %v2901_v4, %v2897_v63  ;;  %3850 = vmatpush.bf16.msra.mxu2 %v7207_v13 }
 0x157   : > { %v2030_v55 = vpop.f32.mrf.mxu1  ;;  %5673 = vmatpush.bf16.msra.mxu1 %v5633_v3  ;;  %3558 = vmatpush.bf16.msra.mxu3 %v5612_v16  ;;  %v5618_v16 = vld [vmem:[%s7545_s3 + $0x600] sm:$0xff] }
 0x158   : > { %v2059_v7 = vpop.f32.mrf.mxu2  ;;  %v7550_v4 = vunpack.c.l.b16 %v7215_v14 }
 0x159   : > { %v7166_v52 = vadd.f32 %v2059_v7, %v2030_v55  ;;  %v2080_v46 = vpop.f32.mrf.mxu3  ;;  %v2421_v7 = vunpack.c.l.b16 %v1777_v0 }
 0x15a   : > { %2697 = vmatmul.bf16.gmra.mxu1 %v6765_v24  ;;  %v2081_v43 = vadd.f32 %v2080_v46, %v7042_v11  ;;  %v2791_v24 = vmul.f32 %v6915_v54, %v2770_v44  ;;  %v7196_v11 = vunpack.c.l.b16 %v2812_v50  ;;  %v2942_v50 = vrot.slane %v2862_v32, 1  ;;  %v5619_v32 = vld [vmem:[%s7545_s3 + $0x608] sm:$0xff] }
 0x15b   : > { %v7181_v25 = vpop.f32.mrf.mxu0  ;;  %v2943_v46 = vrot.slane %v2863_v38, 1  ;;  %3797 = vmatpush.bf16.msra.mxu0 %v5619_v32 }
 0x15c   : > { %v7192_v57 = vadd.f32 %v2081_v43, %v6906_v21  ;;  %v2811_v35 = vpack.c.bf16 %v2791_v24, %v2791_v24  ;;  %v2813_v21 = vpack.c.bf16 %v2793_v48, %v2793_v48  ;;  %v7213_v44 = vpack.c.b16 %v7196_v11, %v7194_v49 }
 0x15d   : > { %v7234_v45 = vunpack.c.l.b16 %v2942_v50  ;;  %v7236_v0 = vunpack.c.l.b16 %v2943_v46 }
 0x15e   : > { %3252 = vmatmul.bf16.gmra.mxu0 %v7177_v20  ;;  %3223 = vmatmul.bf16.gmra.mxu3 %v7173_v22  ;;  %v2851_v24 = vunpack.c.l.b16 %v2811_v35  ;;  %v2853_v48 = vunpack.c.l.b16 %v2813_v21 }
 0x15f   : > { %v2032_v56 = vpop.f32.mrf.mxu1  ;;  %3798 = vmatpush.bf16.msra.mxu0 %v5618_v16 }
 0x160   : > { %v2061_v33 = vpop.f32.mrf.mxu2  ;;  %v2864_v2 = vpack.c.b16 %v2851_v24, %v7194_v49  ;;  %v2865_v28 = vpack.c.b16 %v2853_v48, %v7196_v11  ;;  %v5611_v48 = vld [vmem:[%s7545_s3 + $0x5c8] sm:$0xff] }
 0x161   : > { %v7209_v55 = vadd.f32 %v2061_v33, %v2032_v56  ;;  %v2083_v18 = vpop.f32.mrf.mxu3  ;;  %v7549_v56 = vunpack.c.l.b16 %v7221_v34  ;;  %3559 = vmatpush.bf16.msra.mxu3 %v5611_v48 }
 0x162   : > { %v2084_v58 = vadd.f32 %v2083_v18, %v7085_v60  ;;  %v2473_v60 = vpack.c.b16 %v2421_v7, %v6887_v40  ;;  %v5632_v40 = vld [vmem:[%s7545_s3 + $0x670] sm:$0xff]  ;;  %v7254_v18 = vpack.c.b16 %v7236_v0, %v7234_v45  ;;  %v2920_v24 = vshll.u32 %v2865_v28, 16 }
 0x163   : > { %v7219_v43 = vpop.f32.mrf.mxu0  ;;  %v7264_v46 = vpack.c.b16 %v7549_v56, %v7550_v4  ;;  %5674 = vmatpush.bf16.msra.mxu1 %v5632_v40  ;;  %v5610_v56 = vld [vmem:[%s7545_s3 + $0x5c0] sm:$0xff]  ;;  %3820 = vmatpush.bf16.msrb.mxu0 %v5633_v3  ;;  %v2944_v16 = vrot.slane %v2864_v2, 1  ;;  %v2945_v12 = vrot.slane %v2865_v28, 1 }
 0x164   : > { %v7231_v38 = vadd.f32 %v2084_v58, %v6945_v29  ;;  %v7248_v29 = vld [vmem:[%s7545_s3 + $0x6a8] sm:$0xff]  ;;  %7557 = vst [vmem:[#allocation3_spill] sm:$0xff] %v7254_v18  ;;  %v2913_v58 = vshll.u32 %v2864_v2, 16 }
 0x165   : > { %3204 = vmatmul.bf16.gmra.mxu2 %v7213_v44  ;;  %7558 = vst [vmem:[#allocation4_spill] sm:$0xff] %v7264_v46  ;;  %3560 = vmatpush.bf16.msra.mxu3 %v5610_v56  ;;  %v7305_v30 = vunpack.c.l.b16 %v2944_v16 }
 0x166   : > { %3851 = vmatpush.bf16.msra.mxu2 %v7248_v29 }
 0x167   : > { %v2035_v63 = vpop.f32.mrf.mxu1  ;;  %3821 = vmatpush.bf16.msrb.mxu0 %v5632_v40 }
 0x168   : > { %v2064_v35 = vpop.f32.mrf.mxu2 }
 0x169   : > { %v7250_v21 = vadd.f32 %v2064_v35, %v2035_v63  ;;  %v2085_v33 = vpop.f32.mrf.mxu3  ;;  %v2915_v63 = vrot.slane %v2913_v58, 1  ;;  %v2918_v35 = vshrl.u32 %v2865_v28, 16  ;;  %v3328_v58 = vpack.c.b16 %v2952_v27, %v2950_v5  ;;  %5681 = vmatpush.bf16.msrb.mxu3 %v7164_v61 }
 0x16a   : > { %2702 = vmatmul.bf16.gmra.mxu1 %v2473_v60  ;;  %v2086_v7 = vadd.f32 %v2085_v33, %v7125_v23  ;;  %v2911_v60 = vshrl.u32 %v2864_v2, 16  ;;  %v2922_v33 = vrot.slane %v2920_v24, 1  ;;  %v3327_v5 = vpack.c.b16 %v7028_v17, %v6962_v53  ;;  %v5630_v53 = vld [vmem:[%s7545_s3 + $0x660] sm:$0xff]  ;;  %v5637_v17 = vld [vmem:[%s7545_s3 + $0x698] sm:$0xff] }
 0x16b   : > { %v7258_v50 = vpop.f32.mrf.mxu0  ;;  %v7307_v27 = vunpack.c.l.b16 %v2945_v12 }
 0x16c   : > { %v7273_v23 = vadd.f32 %v2086_v7, %v6988_v6  ;;  %v5631_v6 = vld [vmem:[%s7545_s3 + $0x668] sm:$0xff]  ;;  %v5638_v7 = vld [vmem:[%s7545_s3 + $0x6a0] sm:$0xff]  ;;  %v7297_v3 = vor.u32 %v2922_v33, %v2918_v35 }
 0x16d   : > { %5675 = vmatpush.bf16.msra.mxu1 %v5631_v6  ;;  %3852 = vmatpush.bf16.msra.mxu2 %v5638_v7  ;;  %v7321_v2 = vpack.c.b16 %v7307_v27, %v7305_v30 }
 0x16e   : > { %3257 = vmatmul.bf16.gmra.mxu0 %v7254_v18  ;;  %3228 = vmatmul.bf16.gmra.mxu3 %v7264_v46  ;;  %v7295_v46 = vor.u32 %v2915_v63, %v2911_v60  ;;  %v2962_v56 = vunpack.c.l.b16 %v7297_v3 }
 0x16f   : > { %v2037_v32 = vpop.f32.mrf.mxu1  ;;  %5682 = vmatpush.bf16.msrb.mxu3 %v7207_v13  ;;  %3822 = vmatpush.bf16.msrb.mxu0 %v5631_v6  ;;  %v2732_v13 = vld [vmem:[%s6885_s17 + $0x40] sm:$0xf] }
 0x170   : > { %v2066_v4 = vpop.f32.mrf.mxu2  ;;  %v2773_v35 = vunpack.c.l.bf16 %v2732_v13 }
 0x171   : > { %v7290_v24 = vadd.f32 %v2066_v4, %v2037_v32  ;;  %v2088_v48 = vpop.f32.mrf.mxu3  ;;  %v2960_v4 = vunpack.c.l.b16 %v7295_v46  ;;  %3853 = vmatpush.bf16.msra.mxu2 %v5637_v17  ;;  %5676 = vmatpush.bf16.msra.mxu1 %v5630_v53  ;;  %v3333_v46 = vpack.c.b16 %v7194_v49, %v7106_v15  ;;  %v3332_v15 = vpack.c.b16 %v7234_v45, %v7157_v19 }
 0x172   : > { %v2089_v22 = vadd.f32 %v2088_v48, %v7166_v52  ;;  %v7560_v48 = vunpack.c.l.b16 %v7215_v14 }
 0x173   : > { %v7293_v18 = vpop.f32.mrf.mxu0  ;;  %v7332_v32 = vpack.c.b16 %v2962_v56, %v2960_v4  ;;  %5683 = vmatpush.bf16.msrb.mxu3 %v7248_v29  ;;  %3823 = vmatpush.bf16.msrb.mxu0 %v5630_v53  ;;  %v5629_v29 = vld [vmem:[%s7545_s3 + $0x658] sm:$0xff] }
 0x174   : > { %v7301_v62 = vadd.f32 %v2089_v22, %v7007_v51 }
 0x175   : > { %3532 = vmatmul.bf16.vlgmr.msrb.gmra.mxu2 %v3328_v58  ;;  %5677 = vmatpush.bf16.msra.mxu1 %v5629_v29 }
 0x177   : > { %v2363_v52 = vpop.f32.mrf.mxu1  ;;  %5684 = vmatpush.bf16.msrb.mxu3 %v5638_v7  ;;  %3824 = vmatpush.bf16.msrb.mxu0 %v5629_v29 }
 0x178   : > { %v2364_v61 = vadd.f32 %v2363_v52, %v7099_v9  ;;  %v2392_v51 = vpop.f32.mrf.mxu2  ;;  %v2733_v9 = vld [vmem:[%s6885_s17 + $0x44] sm:$0x1] }
 0x179   : > { %v2090_v22 = vpop.f32.mrf.mxu3 }
 0x17a   : > { %v2393_v12 = vadd.f32 %v2392_v51, %v2364_v61  ;;  %3503 = vmatmul.bf16.vlgmr.msrb.gmra.mxu1 %v3327_v5  ;;  %v2091_v28 = vadd.f32 %v2090_v22, %v7209_v55  ;;  %v2774_v55 = vunpack.c.l.bf16 %v2733_v9  ;;  %v2794_v5 = vmul.f32 %v6915_v54, %v2773_v35 }
 0x17b   : > { %v7326_v40 = vpop.f32.mrf.mxu0  ;;  %5685 = vmatpush.bf16.msrb.mxu3 %v5637_v17  ;;  %v3330_v22 = vpack.c.b16 %v7104_v59, %v7030_v41  ;;  %v3329_v41 = vpack.c.b16 %v7155_v36, %v7070_v1 }
 0x17c   : > { %v7336_v60 = vadd.f32 %v2393_v12, %v7146_v8  ;;  %v7339_v63 = vadd.f32 %v2091_v28, %v7064_v10  ;;  %v5636_v8 = vld [vmem:[%s7545_s3 + $0x690] sm:$0xff]  ;;  %v7559_v10 = vunpack.c.l.b16 %v7135_v42  ;;  %v2795_v52 = vmul.f32 %v6915_v54, %v2774_v55 }
 0x17d   : > { %3854 = vmatpush.bf16.msra.mxu2 %v5636_v8  ;;  %v2814_v14 = vpack.c.bf16 %v2794_v5, %v2794_v5  ;;  %v5628_v28 = vld [vmem:[%s7545_s3 + $0x650] sm:$0xff] }
 0x17e   : > { %3262 = vmatmul.bf16.gmra.mxu0 %v7321_v2  ;;  %3233 = vmatmul.bf16.gmra.mxu3 %v7332_v32  ;;  %v3331_v16 = vpack.c.b16 %v7560_v48, %v7559_v10  ;;  %v2815_v12 = vpack.c.bf16 %v2795_v52, %v2795_v52 }
 0x17f   : > { %v2365_v33 = vpop.f32.mrf.mxu1  ;;  %5686 = vmatpush.bf16.msrb.mxu3 %v5636_v8  ;;  %5678 = vmatpush.bf16.msra.mxu1 %v5628_v28 }
 0x180   : > { %v2366_v6 = vadd.f32 %v2365_v33, %v7140_v47  ;;  %v2394_v58 = vpop.f32.mrf.mxu2  ;;  %v2855_v17 = vunpack.c.l.b16 %v2815_v12  ;;  %3825 = vmatpush.bf16.msrb.mxu0 %v5628_v28 }
 0x181   : > { %v2093_v61 = vpop.f32.mrf.mxu3 }
 0x182   : > { %v2395_v47 = vadd.f32 %v2394_v58, %v2366_v6  ;;  %v2094_v51 = vadd.f32 %v2093_v61, %v7250_v21 }
 0x183   : > { %v7357_v53 = vpop.f32.mrf.mxu0 }
 0x184   : > { %v7360_v7 = vadd.f32 %v2395_v47, %v7192_v57  ;;  %v7363_v42 = vadd.f32 %v2094_v51, %v7083_v39  ;;  %v5635_v57 = vld [vmem:[%s7545_s3 + $0x688] sm:$0xff]  ;;  %v7374_v39 = vunpack.c.l.b16 %v2814_v14 }
 0x185   : > { %3537 = vmatmul.bf16.gmra.mxu2 %v3331_v16  ;;  %5687 = vmatpush.bf16.msrb.mxu3 %v5635_v57 }
 0x186   : > { %3855 = vmatpush.bf16.msra.mxu2 %v5635_v57  ;;  %v7386_v58 = vpack.c.b16 %v2855_v17, %v7374_v39 }
 0x187   : > { %v2368_v13 = vpop.f32.mrf.mxu1 }
 0x188   : > { %v2369_v9 = vadd.f32 %v2368_v13, %v7181_v25  ;;  %v2397_v21 = vpop.f32.mrf.mxu2 }
 0x189   : > { %v2095_v55 = vpop.f32.mrf.mxu3 }
 0x18a   : > { %v2398_v35 = vadd.f32 %v2397_v21, %v2369_v9  ;;  %3508 = vmatmul.bf16.gmra.mxu1 %v3330_v22  ;;  %v2096_v59 = vadd.f32 %v2095_v55, %v7290_v24  ;;  %v5627_v24 = vld [vmem:[%s7545_s3 + $0x648] sm:$0xff] }
 0x18b   : > { %v2659_v25 = vpop.f32.mrf.mxu0  ;;  %5679 = vmatpush.bf16.msra.mxu1 %v5627_v24  ;;  %3826 = vmatpush.bf16.msrb.mxu0 %v5627_v24  ;;  %v2734_v55 = vld [vmem:[%s6885_s17 + $0x48] sm:$0xf]  ;;  %v2735_v24 = vld [vmem:[%s6885_s17 + $0x4c] sm:$0x1]  ;;  %s459_s17 = sadd.s32 %s5755_s21, %s5864_s18 }
 0x18c   : > { %v7380_v33 = vadd.f32 %v2398_v35, %v7231_v38  ;;  %v7383_v6 = vadd.f32 %v2096_v59, %v7119_v26  ;;  %v5634_v38 = vld [vmem:[%s7545_s3 + $0x680] sm:$0xff]  ;;  %v7561_v26 = vunpack.c.l.b16 %v7221_v34  ;;  %v2925_v34 = vshrl.u32 %v7386_v58, 16  ;;  %p460_p8 = scmp.lt.s32.totalorder %s459_s17, 15 }
 0x18d   : > { %3856 = vmatpush.bf16.msra.mxu2 %v5634_v38  ;;  %5688 = vmatpush.bf16.msrb.mxu3 %v5634_v38  ;;  %v2776_v38 = vunpack.c.l.bf16 %v2735_v24 }
 0x18e   : > { %3799 = vmatmul.bf16.vlgmr.msra.gmra.mxu0 %v7046_v31  ;;  %3561 = vmatmul.bf16.vlgmr.msra.gmra.mxu3 %v3329_v41  ;;  %v3334_v8 = vpack.c.b16 %v2960_v4, %v7561_v26  ;;  %v2927_v31 = vshll.u32 %v7386_v58, 16  ;;  %v5626_v4 = vld [vmem:[%s7545_s3 + $0x640] sm:$0xff]  ;;  %s7592_s17 = smov (!%p460_p8, %s459_s17), 15 }
 0x18f   : > { %v2370_v29 = vpop.f32.mrf.mxu1  ;;  %5680 = vmatpush.bf16.msra.mxu1 %v5626_v4  ;;  %3827 = vmatpush.bf16.msrb.mxu0 %v5626_v4  ;;  %s5425_s14 = sshll.u32 %s7592_s17, 5  ;;  %s4154_s22 = sshll.u32 %s7592_s17, 1 }
 0x190   : > { %v2371_v1 = vadd.f32 %v2370_v29, %v7219_v43  ;;  %v2399_v36 = vpop.f32.mrf.mxu2  ;;  %v2929_v52 = vrot.slane %v2927_v31, 1  ;;  %s7510_s30 = scalar_lea.vmem %s7547_s5, %s5425_s14  ;;  %s472_s20 = scalar_lea.vmem %s7548_s6, %s4154_s22 }
 0x191   : > { %v2630_v48 = vpop.f32.mrf.mxu3 }
 0x192   : > { %v2400_v10 = vadd.f32 %v2399_v36, %v2371_v1  ;;  %v7401_v43 = vadd.f32 %v2659_v25, %v2630_v48  ;;  %v7413_v14 = vor.u32 %v2929_v52, %v2925_v34  ;;  %v2775_v25 = vunpack.c.l.bf16 %v2734_v55 }
 0x193   : > { %v2661_v16 = vpop.f32.mrf.mxu0 }
 0x194   : > { %v7404_v5 = vadd.f32 %v2400_v10, %v7273_v23 }
 0x195   : > { %3542 = vmatmul.bf16.gmra.mxu2 %v3334_v8 }
 0x197   : > { %v2373_v47 = vpop.f32.mrf.mxu1 }
 0x198   : > { %v2374_v61 = vadd.f32 %v2373_v47, %v7258_v50  ;;  %v2402_v51 = vpop.f32.mrf.mxu2  ;;  %v3276_v50 = vunpack.c.l.b16 %v7413_v14 }
 0x199   : > { %v2632_v12 = vpop.f32.mrf.mxu3 }
 0x19a   : > { %v2403_v23 = vadd.f32 %v2402_v51, %v2374_v61  ;;  %3513 = vmatmul.bf16.gmra.mxu1 %v3333_v46  ;;  %v7415_v22 = vadd.f32 %v2661_v16, %v2632_v12  ;;  %v3337_v57 = vpack.c.b16 %v3276_v50, %v2962_v56  ;;  %v7562_v51 = vld [vmem:[#allocation4_spill] sm:$0xff] }
 0x19b   : > { %v2664_v13 = vpop.f32.mrf.mxu0 }
 0x19c   : > { %v7420_v49 = vadd.f32 %v2403_v23, %v7301_v62 }
 0x19e   : > { %3804 = vmatmul.bf16.gmra.mxu0 %v7123_v37  ;;  %3566 = vmatmul.bf16.gmra.mxu3 %v3332_v15  ;;  %v3336_v37 = vpack.c.b16 %v7374_v39, %v7196_v11  ;;  %v2796_v11 = vmul.f32 %v6915_v54, %v2775_v25  ;;  %v7564_v25 = vld [vmem:[#allocation2_spill] sm:$0xff] }
 0x19f   : > { %v2375_v9 = vpop.f32.mrf.mxu1 }
 0x1a0   : > { %v2376_v21 = vadd.f32 %v2375_v9, %v7293_v18  ;;  %v2404_v28 = vpop.f32.mrf.mxu2  ;;  %v2816_v48 = vpack.c.bf16 %v2796_v11, %v2796_v11 }
 0x1a1   : > { %v2635_v19 = vpop.f32.mrf.mxu3 }
 0x1a2   : > { %v2405_v17 = vadd.f32 %v2404_v28, %v2376_v21  ;;  %v7429_v45 = vadd.f32 %v2664_v13, %v2635_v19  ;;  %v7563_v19 = vld [vmem:[#allocation3_spill] sm:$0xff] }
 0x1a3   : > { %v2666_v62 = vpop.f32.mrf.mxu0 }
 0x1a4   : > { %v7432_v35 = vadd.f32 %v2405_v17, %v7339_v63  ;;  %v3335_v63 = vpack.c.b16 %v7305_v30, %v7236_v0  ;;  %v2946_v0 = vrot.slane %v7386_v58, 1  ;;  %v2797_v30 = vmul.f32 %v6915_v54, %v2776_v38 }
 0x1a5   : > { %3547 = vmatmul.bf16.gmra.mxu2 %v3337_v57 }
 0x1a6   : > { %v3277_v46 = vunpack.c.l.b16 %v2946_v0  ;;  %v2817_v4 = vpack.c.bf16 %v2797_v30, %v2797_v30 }
 0x1a7   : > { %v2378_v18 = vpop.f32.mrf.mxu1 }
 0x1a8   : > { %v2379_v3 = vadd.f32 %v2378_v18, %v7326_v40  ;;  %v2407_v41 = vpop.f32.mrf.mxu2  ;;  %v2857_v13 = vunpack.c.l.b16 %v2817_v4 }
 0x1a9   : > { %v2637_v56 = vpop.f32.mrf.mxu3 }
 0x1aa   : > { %v2408_v59 = vadd.f32 %v2407_v41, %v2379_v3  ;;  %3518 = vmatmul.bf16.gmra.mxu1 %v3336_v37  ;;  %v7438_v29 = vadd.f32 %v2666_v62, %v2637_v56 }
 0x1ab   : > { %v2669_v1 = vpop.f32.mrf.mxu0 }
 0x1ac   : > { %v7443_v36 = vadd.f32 %v2408_v59, %v7363_v42 }
 0x1ae   : > { %3809 = vmatmul.bf16.gmra.mxu0 %v7213_v44  ;;  %3571 = vmatmul.bf16.gmra.mxu3 %v3335_v63  ;;  %v2856_v44 = vunpack.c.l.b16 %v2816_v48 }
 0x1af   : > { %v2380_v40 = vpop.f32.mrf.mxu1 }
 0x1b0   : > { %v2381_v26 = vadd.f32 %v2380_v40, %v7357_v53  ;;  %v2409_v8 = vpop.f32.mrf.mxu2  ;;  %v3641_v58 = vpack.c.b16 %v2856_v44, %v7374_v39  ;;  %v2867_v15 = vpack.c.b16 %v2857_v13, %v2856_v44 }
 0x1b1   : > { %v2640_v10 = vpop.f32.mrf.mxu3 }
 0x1b2   : > { %v2410_v31 = vadd.f32 %v2409_v8, %v2381_v26  ;;  %v2670_v16 = vadd.f32 %v2669_v1, %v2640_v10  ;;  %v2947_v28 = vrot.slane %v2867_v15, 1  ;;  %v2934_v39 = vshll.u32 %v2867_v15, 16 }
 0x1b3   : > { %v2671_v34 = vpop.f32.mrf.mxu0  ;;  %v2932_v3 = vshrl.u32 %v2867_v15, 16 }
 0x1b4   : > { %v7452_v42 = vadd.f32 %v2410_v31, %v7383_v6  ;;  %v3338_v6 = vpack.c.b16 %v3277_v46, %v7307_v27  ;;  %v3591_v62 = vunpack.c.l.b16 %v2947_v28  ;;  %v2936_v41 = vrot.slane %v2934_v39, 1 }
 0x1b5   : > { %3857 = vmatmul.bf16.vlgmr.msra.gmra.mxu2 %v7177_v20 }
 0x1b6   : > { %v3643_v56 = vpack.c.b16 %v3591_v62, %v3277_v46  ;;  %v2937_v1 = vor.u32 %v2936_v41, %v2932_v3 }
 0x1b7   : > { %v2688_v52 = vpop.f32.mrf.mxu1 }
 0x1b8   : > { %v2689_v53 = vadd.f32 %v2688_v52, %v7401_v43  ;;  %v3190_v47 = vpop.f32.mrf.mxu2 }
 0x1b9   : > { %v2642_v23 = vpop.f32.mrf.mxu3 }
 0x1ba   : > { %v2708_v61 = vadd.f32 %v2689_v53, %v7336_v60  ;;  %3833 = vmatmul.bf16.vlgmr.msra.gmra.mxu1 %v7562_v51  ;;  %v2672_v54 = vadd.f32 %v2671_v34, %v2642_v23 }
 0x1bb   : > { %v2674_v12 = vpop.f32.mrf.mxu0 }
 0x1be   : > { %3814 = vmatmul.bf16.gmra.mxu0 %v3641_v58  ;;  %3576 = vmatmul.bf16.gmra.mxu3 %v3338_v6 }
 0x1bf   : > { %v2690_v20 = vpop.f32.mrf.mxu1 }
 0x1c0   : > { %v2691_v9 = vadd.f32 %v2690_v20, %v7415_v22  ;;  %v3192_v43 = vpop.f32.mrf.mxu2 }
 0x1c1   : > { %v2645_v60 = vpop.f32.mrf.mxu3 }
 0x1c2   : > { %v2709_v21 = vadd.f32 %v2691_v9, %v7360_v7  ;;  %v2675_v57 = vadd.f32 %v2674_v12, %v2645_v60 }
 0x1c3   : > { %v2676_v17 = vpop.f32.mrf.mxu0 }
 0x1c5   : > { %3862 = vmatmul.bf16.gmra.mxu2 %v7563_v19 }
 0x1c7   : > { %v2693_v37 = vpop.f32.mrf.mxu1 }
 0x1c8   : > { %v2694_v27 = vadd.f32 %v2693_v37, %v7429_v45  ;;  %v3195_v18 = vpop.f32.mrf.mxu2 }
 0x1c9   : > { %v2647_v22 = vpop.f32.mrf.mxu3 }
 0x1ca   : > { %v2710_v55 = vadd.f32 %v2694_v27, %v7380_v33  ;;  %3838 = vmatmul.bf16.gmra.mxu1 %v7332_v32  ;;  %v2677_v7 = vadd.f32 %v2676_v17, %v2647_v22  ;;  %v3590_v33 = vunpack.c.l.b16 %v2937_v1 }
 0x1cb   : > { %v3248_v59 = vpop.f32.mrf.mxu0 }
 0x1cc   : > { %v3642_v8 = vpack.c.b16 %v3590_v33, %v3276_v50 }
 0x1ce   : > { %3828 = vmatmul.bf16.vlgmr.msrb.gmra.mxu0 %v7564_v25  ;;  %3872 = vmatmul.bf16.vlgmr.msrb.gmra.mxu3 %v3643_v56 }
 0x1cf   : > { %v2695_v63 = vpop.f32.mrf.mxu1 }
 0x1d0   : > { %v2696_v24 = vadd.f32 %v2695_v63, %v7438_v29  ;;  %v3197_v11 = vpop.f32.mrf.mxu2 }
 0x1d1   : > { %v3219_v40 = vpop.f32.mrf.mxu3 }
 0x1d2   : > { %v2711_v45 = vadd.f32 %v2696_v24, %v7404_v5  ;;  %v3220_v38 = vadd.f32 %v3219_v40, %v3190_v47 }
 0x1d3   : > { %v3250_v32 = vpop.f32.mrf.mxu0 }
 0x1d4   : > { %v3249_v26 = vadd.f32 %v3248_v59, %v3220_v38 }
 0x1d5   : > { %3867 = vmatmul.bf16.gmra.mxu2 %v7321_v2 }
 0x1d6   : > { %v7472_v10 = vadd.f32 %v3249_v26, %v2708_v61 }
 0x1d7   : > { %v2698_v31 = vpop.f32.mrf.mxu1 }
 0x1d8   : > { %v2699_v48 = vadd.f32 %v2698_v31, %v2670_v16  ;;  %v3200_v34 = vpop.f32.mrf.mxu2 }
 0x1d9   : > { %v3221_v0 = vpop.f32.mrf.mxu3 }
 0x1da   : > { %v2712_v29 = vadd.f32 %v2699_v48, %v7420_v49  ;;  %3843 = vmatmul.bf16.gmra.mxu1 %v3642_v8  ;;  %v3222_v5 = vadd.f32 %v3221_v0, %v3192_v43 }
 0x1db   : > { %v3253_v30 = vpop.f32.mrf.mxu0 }
 0x1dc   : > { %v3251_v44 = vadd.f32 %v3250_v32, %v3222_v5 }
 0x1de   : > { %v7475_v46 = vadd.f32 %v3251_v44, %v2709_v21 }
 0x1df   : > { %v2700_v52 = vpop.f32.mrf.mxu1 }
 0x1e0   : > { %v2701_v2 = vadd.f32 %v2700_v52, %v2672_v54  ;;  %v3202_v4 = vpop.f32.mrf.mxu2 }
 0x1e1   : > { %v3224_v50 = vpop.f32.mrf.mxu3 }
 0x1e2   : > { %v2713_v14 = vadd.f32 %v2701_v2, %v7432_v35  ;;  %v3225_v53 = vadd.f32 %v3224_v50, %v3195_v18 }
 0x1e3   : > { %v3255_v47 = vpop.f32.mrf.mxu0 }
 0x1e4   : > { %v3254_v61 = vadd.f32 %v3253_v30, %v3225_v53 }
 0x1e6   : > { %v3270_v51 = vadd.f32 %v3254_v61, %v2710_v55 }
 0x1e7   : > { %v2703_v16 = vpop.f32.mrf.mxu1 }
 0x1e8   : > { %v2704_v23 = vadd.f32 %v2703_v16, %v2675_v57  ;;  %v3205_v49 = vpop.f32.mrf.mxu2 }
 0x1e9   : > { %v3226_v12 = vpop.f32.mrf.mxu3 }
 0x1ea   : > { %v2714_v58 = vadd.f32 %v2704_v23, %v7443_v36  ;;  %v3227_v6 = vadd.f32 %v3226_v12, %v3197_v11 }
 0x1eb   : > { %v3258_v13 = vpop.f32.mrf.mxu0 }
 0x1ec   : > { %v3256_v20 = vadd.f32 %v3255_v47, %v3227_v6 }
 0x1ee   : > { %v7479_v9 = vadd.f32 %v3256_v20, %v2711_v45 }
 0x1ef   : > { %v2705_v15 = vpop.f32.mrf.mxu1 }
 0x1f0   : > { %v2706_v54 = vadd.f32 %v2705_v15, %v2677_v7  ;;  %v3207_v43 = vpop.f32.mrf.mxu2 }
 0x1f1   : > { %v3229_v21 = vpop.f32.mrf.mxu3 }
 0x1f2   : > { %v2715_v35 = vadd.f32 %v2706_v54, %v7452_v42  ;;  %v3230_v60 = vadd.f32 %v3229_v21, %v3200_v34 }
 0x1f3   : > { %v3260_v28 = vpop.f32.mrf.mxu0 }
 0x1f4   : > { %v3259_v17 = vadd.f32 %v3258_v13, %v3230_v60 }
 0x1f6   : > { %v3272_v57 = vadd.f32 %v3259_v17, %v2712_v29 }
 0x1f7   : > { %v3504_v19 = vpop.f32.mrf.mxu1 }
 0x1f8   : > { %v3533_v39 = vpop.f32.mrf.mxu2 }
 0x1f9   : > { %v3534_v62 = vadd.f32 %v3533_v39, %v3504_v19  ;;  %v3231_v36 = vpop.f32.mrf.mxu3 }
 0x1fa   : > { %v3232_v37 = vadd.f32 %v3231_v36, %v3202_v4 }
 0x1fb   : > { %v3263_v27 = vpop.f32.mrf.mxu0 }
 0x1fc   : > { %v3261_v18 = vadd.f32 %v3260_v28, %v3232_v37 }
 0x1fe   : > { %v7482_v22 = vadd.f32 %v3261_v18, %v2713_v14 }
 0x1ff   : > { %v3506_v55 = vpop.f32.mrf.mxu1 }
 0x200   : > { %v3535_v3 = vpop.f32.mrf.mxu2 }
 0x201   : > { %v3536_v41 = vadd.f32 %v3535_v3, %v3506_v55  ;;  %v3234_v7 = vpop.f32.mrf.mxu3 }
 0x202   : > { %v3235_v59 = vadd.f32 %v3234_v7, %v3205_v49 }
 0x203   : > { %v3265_v42 = vpop.f32.mrf.mxu0 }
 0x204   : > { %v3264_v56 = vadd.f32 %v3263_v27, %v3235_v59 }
 0x206   : > { %v7484_v1 = vadd.f32 %v3264_v56, %v2714_v58 }
 0x207   : > { %v3509_v25 = vpop.f32.mrf.mxu1 }
 0x208   : > { %v3538_v63 = vpop.f32.mrf.mxu2 }
 0x209   : > { %v3539_v24 = vadd.f32 %v3538_v63, %v3509_v25  ;;  %v3236_v11 = vpop.f32.mrf.mxu3  ;;  %v5732_v25 = vld [vmem:[%s7546_s4] ss:$0 sm:$0xff] }
 0x20a   : > { %v3237_v45 = vadd.f32 %v3236_v11, %v3207_v43 }
 0x20b   : > { %v3800_v40 = vpop.f32.mrf.mxu0 }
 0x20c   : > { %v3266_v33 = vadd.f32 %v3265_v42, %v3237_v45 }
 0x20e   : > { %v7486_v32 = vadd.f32 %v3266_v33, %v2715_v35 }
 0x20f   : > { %v3511_v38 = vpop.f32.mrf.mxu1 }
 0x210   : > { %v3540_v26 = vpop.f32.mrf.mxu2 }
 0x211   : > { %v3562_v8 = vpop.f32.mrf.mxu3  ;;  %v3541_v39 = vadd.f32 %v3540_v26, %v3511_v38 }
 0x212   : > { %v3563_v31 = vadd.f32 %v3562_v8, %v3534_v62 }
 0x213   : > { %v3802_v48 = vpop.f32.mrf.mxu0 }
 0x214   : > { %v3582_v34 = vadd.f32 %v3563_v31, %v7472_v10 }
 0x217   : > { %v3514_v29 = vpop.f32.mrf.mxu1 }
 0x218   : > { %v3543_v0 = vpop.f32.mrf.mxu2 }
 0x219   : > { %v3544_v5 = vadd.f32 %v3543_v0, %v3514_v29  ;;  %v3564_v30 = vpop.f32.mrf.mxu3 }
 0x21a   : > { %v3565_v44 = vadd.f32 %v3564_v30, %v3536_v41 }
 0x21b   : > { %v3805_v52 = vpop.f32.mrf.mxu0 }
 0x21c   : > { %v3583_v2 = vadd.f32 %v3565_v44, %v7475_v46 }
 0x21f   : > { %v7490_v4 = vpop.f32.mrf.mxu1 }
 0x220   : > { %v7492_v14 = vpop.f32.mrf.mxu2 }
 0x221   : > { %v3567_v50 = vpop.f32.mrf.mxu3 }
 0x222   : > { %v3568_v53 = vadd.f32 %v3567_v50, %v3539_v24 }
 0x223   : > { %v3807_v47 = vpop.f32.mrf.mxu0 }
 0x224   : > { %v3584_v61 = vadd.f32 %v3568_v53, %v3270_v51 }
 0x227   : > { %v3519_v16 = vpop.f32.mrf.mxu1 }
 0x228   : > { %v3548_v23 = vpop.f32.mrf.mxu2 }
 0x229   : > { %v3569_v49 = vpop.f32.mrf.mxu3 }
 0x22a   : > { %v3570_v27 = vadd.f32 %v3569_v49, %v3541_v39 }
 0x22b   : > { %v3810_v10 = vpop.f32.mrf.mxu0 }
 0x22c   : > { %v3585_v42 = vadd.f32 %v3570_v27, %v7479_v9 }
 0x22f   : > { %v3521_v58 = vpop.f32.mrf.mxu1 }
 0x230   : > { %v3550_v12 = vpop.f32.mrf.mxu2 }
 0x231   : > { %v3572_v6 = vpop.f32.mrf.mxu3  ;;  %v3551_v50 = vadd.f32 %v3550_v12, %v3521_v58 }
 0x232   : > { %v3573_v13 = vadd.f32 %v3572_v6, %v3544_v5  ;;  %v3549_v5 = vadd.f32 %v3548_v23, %v3519_v16 }
 0x233   : > { %v7494_v20 = vpop.f32.mrf.mxu0 }
 0x234   : > { %v3586_v46 = vadd.f32 %v3573_v13, %v3272_v57 }
 0x237   : > { %v3834_v15 = vpop.f32.mrf.mxu1 }
 0x238   : > { %v3858_v54 = vpop.f32.mrf.mxu2  ;;  %v3835_v62 = vadd.f32 %v3834_v15, %v3805_v52  ;;  %v3546_v52 = vadd.f32 %v7492_v14, %v7490_v4 }
 0x239   : > { %v3574_v43 = vpop.f32.mrf.mxu3 }
 0x23a   : > { %v3575_v13 = vadd.f32 %v3574_v43, %v3546_v52 }
 0x23b   : > { %v3815_v35 = vpop.f32.mrf.mxu0 }
 0x23c   : > { %v3587_v43 = vadd.f32 %v3575_v13, %v7482_v22 }
 0x23f   : > { %v3836_v21 = vpop.f32.mrf.mxu1 }
 0x240   : > { %v3860_v60 = vpop.f32.mrf.mxu2  ;;  %v3837_v3 = vadd.f32 %v3836_v21, %v3807_v47 }
 0x241   : > { %v3577_v51 = vpop.f32.mrf.mxu3 }
 0x242   : > { %v3578_v53 = vadd.f32 %v3577_v51, %v3549_v5 }
 0x243   : > { %v7496_v28 = vpop.f32.mrf.mxu0 }
 0x244   : > { %v3588_v21 = vadd.f32 %v3578_v53, %v7484_v1 }
 0x247   : > { %v3839_v17 = vpop.f32.mrf.mxu1 }
 0x248   : > { %v3863_v19 = vpop.f32.mrf.mxu2  ;;  %v3840_v9 = vadd.f32 %v3839_v17, %v3810_v10 }
 0x249   : > { %v3864_v18 = vadd.f32 %v3863_v19, %v3835_v62  ;;  %v3579_v57 = vpop.f32.mrf.mxu3 }
 0x24a   : > { %v3580_v15 = vadd.f32 %v3579_v57, %v3551_v50 }
 0x24b   : > { %v3829_v36 = vpop.f32.mrf.mxu0  ;;  %v3880_v56 = vadd.f32 %v3864_v18, %v3584_v61 }
 0x24c   : > { %v3830_v37 = vadd.f32 %v3829_v36, %v3800_v40  ;;  %v3589_v17 = vadd.f32 %v3580_v15, %v7486_v32 }
 0x24d   : > { %v3892_v40 = vadd.f32 %v5732_v25, %v3880_v56 }
 0x24e   : > { %v3859_v55 = vadd.f32 %v3858_v54, %v3830_v37 }
 0x24f   : > { %v3841_v41 = vpop.f32.mrf.mxu1  ;;  %v3914_v54 = vmul.f32 %v3892_v40, %v3892_v40 }
 0x250   : > { %v3878_v7 = vadd.f32 %v3859_v55, %v3582_v34  ;;  %v3865_v59 = vpop.f32.mrf.mxu2 }
 0x251   : > { %v3866_v63 = vadd.f32 %v3865_v59, %v3837_v3  ;;  %v3873_v31 = vpop.f32.mrf.mxu3 }
 0x252   : > { %v3890_v34 = vadd.f32 %v5732_v25, %v3878_v7 }
 0x253   : > { %v3881_v24 = vadd.f32 %v3866_v63, %v3585_v42  ;;  %v3831_v11 = vpop.f32.mrf.mxu0 }
 0x254   : > { %v3832_v45 = vadd.f32 %v3831_v11, %v3802_v48  ;;  %v3912_v61 = vmul.f32 %v3890_v34, %v3890_v34 }
 0x255   : > { %v3893_v33 = vadd.f32 %v5732_v25, %v3881_v24 }
 0x256   : > { %v3861_v38 = vadd.f32 %v3860_v60, %v3832_v45  ;;  %v3842_v60 = vadd.f32 %v3841_v41, %v7494_v20 }
 0x257   : > { %v5650_v26 = vpack.c.bf16 %v3893_v33, %v3892_v40  ;;  %v3844_v8 = vpop.f32.mrf.mxu1  ;;  %v3915_v14 = vmul.f32 %v3893_v33, %v3893_v33 }
 0x258   : > { %v3879_v29 = vadd.f32 %v3861_v38, %v3583_v2  ;;  %v3868_v0 = vpop.f32.mrf.mxu2  ;;  %v3845_v30 = vadd.f32 %v3844_v8, %v3815_v35 }
 0x259   : > { %5662 = vst [vmem:[%s7510_s30 + $0x8] sm:$0xff] %v5650_v26   ;;  %v3869_v48 = vadd.f32 %v3868_v0, %v3840_v9  ;;  %v3875_v39 = vpop.f32.mrf.mxu3 }
 0x25a   : > { %v3891_v44 = vadd.f32 %v5732_v25, %v3879_v29  ;;  %v3874_v2 = vadd.f32 %v3873_v31, %v3845_v30 }
 0x25b   : > { %v3882_v47 = vadd.f32 %v3869_v48, %v3586_v46 }
 0x25c   : > { %v3898_v49 = vadd.f32 %v3891_v44, %v3890_v34  ;;  %v3913_v10 = vmul.f32 %v3891_v44, %v3891_v44  ;;  %v5645_v6 = vpack.c.bf16 %v3891_v44, %v3890_v34  ;;  %v3884_v19 = vadd.f32 %v3874_v2, %v3588_v21 }
 0x25d   : > { %v3894_v23 = vadd.f32 %v5732_v25, %v3882_v47 }
 0x25e   : > { %v3920_v16 = vadd.f32 %v3913_v10, %v3912_v61  ;;  %5646 = vst [vmem:[%s7510_s30] sm:$0xff] %v5645_v6   ;;  %v3899_v35 = vadd.f32 %v3898_v49, %v3892_v40  ;;  %v3896_v55 = vadd.f32 %v5732_v25, %v3884_v19 }
 0x25f   : > { %v3846_v4 = vpop.f32.mrf.mxu1  ;;  %v3916_v37 = vmul.f32 %v3894_v23, %v3894_v23 }
 0x260   : > { %v3900_v58 = vadd.f32 %v3899_v35, %v3893_v33  ;;  %v3921_v12 = vadd.f32 %v3920_v16, %v3914_v54  ;;  %v3847_v46 = vadd.f32 %v3846_v4, %v7496_v28  ;;  %v3870_v51 = vpop.f32.mrf.mxu2  ;;  %v3918_v59 = vmul.f32 %v3896_v55, %v3896_v55 }
 0x261   : > { %v3871_v62 = vadd.f32 %v3870_v51, %v3842_v60 }
 0x262   : > { %v3901_v36 = vadd.f32 %v3900_v58, %v3894_v23  ;;  %v3922_v1 = vadd.f32 %v3921_v12, %v3915_v14  ;;  %v3876_v20 = vadd.f32 %v3875_v39, %v3847_v46 }
 0x263   : > { %v3883_v27 = vadd.f32 %v3871_v62, %v3587_v43 }
 0x264   : > { %v3923_v18 = vadd.f32 %v3922_v1, %v3916_v37  ;;  %v3885_v57 = vadd.f32 %v3876_v20, %v3589_v17 }
 0x265   : > { %v3895_v3 = vadd.f32 %v5732_v25, %v3883_v27 }
 0x266   : > { %v3897_v28 = vadd.f32 %v5732_v25, %v3885_v57 }
 0x267   : > { %v3902_v41 = vadd.f32 %v3901_v36, %v3895_v3  ;;  %v3917_v7 = vmul.f32 %v3895_v3, %v3895_v3  ;;  %v5655_v22 = vpack.c.bf16 %v3895_v3, %v3894_v23 }
 0x268   : > { %v5660_v32 = vpack.c.bf16 %v3897_v28, %v3896_v55  ;;  %v3919_v63 = vmul.f32 %v3897_v28, %v3897_v28 }
 0x269   : > { %v3903_v42 = vadd.f32 %v3902_v41, %v3896_v55  ;;  %v3924_v56 = vadd.f32 %v3923_v18, %v3917_v7  ;;  %5663 = vst [vmem:[%s7510_s30 + $0x10] sm:$0xff] %v5655_v22  }
 0x26a   : > { %5664 = vst [vmem:[%s7510_s30 + $0x18] sm:$0xff] %v5660_v32  }
 0x26b   : > { %v3904_v24 = vadd.f32 %v3903_v42, %v3897_v28  ;;  %v3925_v11 = vadd.f32 %v3924_v56, %v3918_v59 }
 0x26d   : > { %v3905_v45 = vrot.slane %v3904_v24, 4  ;;  %v3926_v40 = vadd.f32 %v3925_v11, %v3919_v63 }
 0x26f   : > { %v3906_v33 = vadd.f32 %v3905_v45, %v3904_v24  ;;  %v3927_v38 = vrot.slane %v3926_v40, 4 }
 0x271   : > { %v3907_v9 = vrot.slane %v3906_v33, 2  ;;  %v3928_v26 = vadd.f32 %v3927_v38, %v3926_v40 }
 0x273   : > { %v3908_v25 = vadd.f32 %v3907_v9, %v3906_v33  ;;  %v3929_v8 = vrot.slane %v3928_v26, 2 }
 0x275   : > { %v3909_v31 = vrot.slane %v3908_v25, 1  ;;  %v3930_v34 = vadd.f32 %v3929_v8, %v3928_v26 }
 0x277   : > { %v3910_v29 = vadd.f32 %v3909_v31, %v3908_v25  ;;  %v3931_v0 = vrot.slane %v3930_v34, 1 }
 0x279   : > { %3911 = vst [vmem:[%s472_s20] sm:$0x1] %v3910_v29  ;;  %v3932_v5 = vadd.f32 %v3931_v0, %v3930_v34 }
 0x27b   : > { %3933 = vst [vmem:[%s472_s20 + $0x1] sm:$0x1] %v3932_v5 }
 0x27c PF: > { %s17_s25 = sadd.s32 1, %s5771_s25   ;;  %s7565_s21 = smov %s5763_s23 }
 0x27d   : > { %p14_p9 = scmp.ge.s32.totalorder %s17_s25, 18   ;;  %s7566_s22 = smov %s5767_s24 }
 0x27e   : > { %s7567_s23 = smov %s7570_s26  ;;  %s7568_s24 = smov %s7574_s27 }
 0x27f   :  { %16 = sbr.rel (!%p14_p9) target bundleno = 3 (0x3), region = 96 }

</bundles_post_ra>
